<compile_context>
chip_gen: v7x
topology: tpu7x:2x2x1
jax: 0.10.0
libtpu: 0.0.40
codegen_flags: <defaults>
</compile_context>

<pallas_src>
import functools

import numpy as np

import jax
import jax.numpy as jnp
from jax import lax
from jax.experimental import pallas as pl
from jax.experimental.pallas import tpu as pltpu

H, W = 4, 9          # spatial grid implied by Flatten -> 32 * 4 * 9
EPS = 1e-5           # BatchNorm eps
PAD = 16             # guard rows for shifted stores (> max |shift| = W + 1)
C_IN = 174           # real stem input channels
C_IN_PAD = 256       # zero-padded stem input channels (lane-dense)

# 3x3 taps, row-major (dy, dx) -- must match the w3 im2col row layout.
_TAPS = tuple((dy, dx) for dy in (-1, 0, 1) for dx in (-1, 0, 1))


# ----------------------------------------------------------------------------
# Kernels
# ----------------------------------------------------------------------------
def _trunk_kernel(x_ref, m_ref, w0_ref,
                  s1_ref, b1_ref, w1_ref, s2_ref, b2_ref,
                  w3_ref, s3_ref, b3_ref, w4_ref,
                  ts1_ref, tb1_ref, w5_ref, ts2_ref, tb2_ref,
                  o_ref, buf_ref, *, n, nblk):
    """grid = (row_tiles,); one step = stem + 18 BottleNecks + tail on a tile."""
    c4 = w1_ref.shape[2]            # 64
    kc = 9 * c4                     # 576 im2col width

    # Zero only the read-window rows that no tap ever writes in its own lane
    # block (|shift| <= 10 < PAD).  Pure guard rows are write-only and never
    # read, so they may stay uninitialized.
    strip = jnp.zeros((PAD, kc), jnp.float32)
    buf_ref[pl.ds(PAD, PAD), :] = strip
    buf_ref[pl.ds(n, PAD), :] = strip

    # Stem: Conv2d(174->256, 1x1, bias=False) == one lane-dense bf16 matmul.
    x0 = jnp.dot(x_ref[...], w0_ref[...], preferred_element_type=jnp.float32)

    def block(i, x):
        # BN + ReLU + Conv1x1 (256 -> 64)
        h = jnp.maximum(x * s1_ref[i] + b1_ref[i], 0.0)
        h = jnp.dot(h.astype(jnp.bfloat16), w1_ref[i],
                    preferred_element_type=jnp.float32)
        # BN + ReLU
        h = jnp.maximum(h * s2_ref[i] + b2_ref[i], 0.0)        # (n, 64) f32

        # Conv3x3 (64->64), padding=1, as ONE im2col matmul (n,576)@(576,64).
        # Tap k stores a pre-masked copy of h at row offset PAD - shift_k in
        # lane block k; reading rows [PAD, PAD+n) yields the shifted copy,
        # with out-of-image positions exactly zero (host-precomputed mask +
        # the zeroed strips above).
        for k, (dy, dx) in enumerate(_TAPS):
            s = dy * W + dx
            buf_ref[pl.ds(PAD - s, n), pl.ds(k * c4, c4)] = (
                h * m_ref[:, k:k + 1])
        h = jnp.dot(buf_ref[pl.ds(PAD, n), :].astype(jnp.bfloat16), w3_ref[i],
                    preferred_element_type=jnp.float32)

        # BN + ReLU + Conv1x1 (64 -> 256), then residual add.
        h = jnp.maximum(h * s3_ref[i] + b3_ref[i], 0.0)
        return x + jnp.dot(h.astype(jnp.bfloat16), w4_ref[i],
                           preferred_element_type=jnp.float32)

    x = lax.fori_loop(0, nblk, block, x0)

    # Tail: BN + ReLU + Conv1x1(256->32) + BN + ReLU.
    t = jnp.maximum(x * ts1_ref[...] + tb1_ref[...], 0.0)
    t = jnp.dot(t.astype(jnp.bfloat16), w5_ref[...],
                preferred_element_type=jnp.float32)
    o_ref[...] = jnp.maximum(t * ts2_ref[...] + tb2_ref[...], 0.0)


def _heads_kernel(h_ref, w1_ref, b1_ref, w2_ref, b2_ref, inf_ref,
                  logits_ref, value_ref):
    """Both heads fused: one (B,1152)@(1152,512) + one block-diag (512,236)."""
    n_act = logits_ref.shape[1]
    a = jnp.dot(h_ref[...].astype(jnp.bfloat16), w1_ref[...],
                preferred_element_type=jnp.float32) + b1_ref[...]
    a = jnp.maximum(a, 0.0)
    out = jnp.dot(a.astype(jnp.bfloat16), w2_ref[...],
                  preferred_element_type=jnp.float32) + b2_ref[...]
    logits_ref[...] = out[:, :n_act] + inf_ref[...]
    value_ref[...] = out[:, n_act:n_act + 1]


# ----------------------------------------------------------------------------
# Wrappers
# ----------------------------------------------------------------------------
def _const_spec(a):
    nd = a.ndim
    return pl.BlockSpec(a.shape, lambda t, _nd=nd: (0,) * _nd)


def _choose_tiling(batch):
    """Whole images per row tile.  tile_rows must stay a multiple of 8 (so an
    even image count per tile); aim for >= 2 tiles when possible so the
    "parallel" axis feeds both v7x TensorCores, and balance the tiles so a
    batch just above a multiple does not pad a whole extra tile of zeros."""
    max_imgs = 32
    if batch <= 2:
        return 2, 1
    target_tiles = max(2, -(-batch // max_imgs))        # ceil(B / 32), >= 2
    imgs = -(-batch // target_tiles)                    # balanced ceil split
    imgs += imgs % 2                                    # keep tile_rows % 8 == 0
    num_tiles = -(-batch // imgs)
    return imgs, num_tiles


def _tap_mask(tile_rows):
    """Per-tap row-validity mask, applied to h at STORE time.

    The value stored by tap k at h-row j lands at patch row r = j - shift_k,
    so it is masked by the validity of the (r)'s neighbor (dy, dx) inside the
    4x9 image.  Rows whose store lands in the guard region are never read, so
    the periodic extension used for them is irrelevant."""
    j = np.arange(tile_rows)
    m = np.zeros((tile_rows, 16), np.float32)           # 9 used, 7 lanes pad
    for k, (dy, dx) in enumerate(_TAPS):
        s = dy * W + dx
        r = (j - s) % (H * W)
        hh = r // W
        ww = r % W
        m[:, k] = ((hh + dy >= 0) & (hh + dy < H) &
                   (ww + dx >= 0) & (ww + dx < W)).astype(np.float32)
    return jnp.asarray(m)


def _trunk(x_rows, tap_mask, p, tile_rows, num_tiles):
    n_pad, c_in = x_rows.shape
    nblk = p['w1'].shape[0]
    c4 = p['w1'].shape[2]
    c_tail = p['w5'].shape[1]

    weights = (p['w0'],
               p['s1'], p['b1'], p['w1'], p['s2'], p['b2'],
               p['w3'], p['s3'], p['b3'], p['w4'],
               p['ts1'], p['tb1'], p['w5'], p['ts2'], p['tb2'])

    in_specs = ([pl.BlockSpec((tile_rows, c_in), lambda t: (t, 0)),
                 _const_spec(tap_mask)]
                + [_const_spec(w) for w in weights])

    return pl.pallas_call(
        functools.partial(_trunk_kernel, n=tile_rows, nblk=nblk),
        out_shape=jax.ShapeDtypeStruct((n_pad, c_tail), jnp.float32),
        grid_spec=pltpu.PrefetchScalarGridSpec(
            num_scalar_prefetch=0,
            grid=(num_tiles,),
            in_specs=in_specs,
            out_specs=pl.BlockSpec((tile_rows, c_tail), lambda t: (t, 0)),
            scratch_shapes=[
                pltpu.VMEM((tile_rows + 2 * PAD, 9 * c4), jnp.float32),  # im2col
            ],
        ),
        compiler_params=pltpu.CompilerParams(
            dimension_semantics=("parallel",),
            vmem_limit_bytes=48 * 1024 * 1024),
    )(x_rows, tap_mask, *weights)


def _heads(hidden, inf_mask, p):
    B = hidden.shape[0]
    n_act = inf_mask.shape[1]
    flat, two_hid = p['wh1'].shape
    cost = pl.CostEstimate(
        flops=2 * B * (flat * two_hid + two_hid * (n_act + 1)),
        transcendentals=0,
        bytes_accessed=(flat * two_hid + two_hid * (n_act + 1)) * 2
        + B * (flat + two_hid + 2 * (n_act + 1)) * 4)
    return pl.pallas_call(
        _heads_kernel,
        out_shape=(jax.ShapeDtypeStruct((B, n_act), jnp.float32),
                   jax.ShapeDtypeStruct((B, 1), jnp.float32)),
        cost_estimate=cost,
    )(hidden, p['wh1'], p['bh1'], p['wh2'], p['bh2'], inf_mask)


def forward(params, obs, action_mask):
    """obs: (B, 174, 4, 9) NCHW float32, action_mask: (B, 235) float32."""
    B = obs.shape[0]
    c_in = obs.shape[1]
    c_pad = params['w0'].shape[0]
    c_tail = params['w5'].shape[1]

    imgs_per_tile, num_tiles = _choose_tiling(B)
    b_pad = imgs_per_tile * num_tiles
    tile_rows = imgs_per_tile * H * W

    # NCHW -> channels-last rows (b, h, w, c) -> (B*H*W, C); bf16 for the MXU.
    # Zero-pad rows to a whole number of tiles and channels 174 -> 256 so the
    # x DMA and the stem matmul are lane-dense.
    x = jnp.transpose(obs.astype(jnp.float32), (0, 2, 3, 1))
    x = x.reshape(B * H * W, c_in).astype(jnp.bfloat16)
    x = jnp.pad(x, ((0, (b_pad - B) * H * W), (0, c_pad - c_in)))

    tap_mask = _tap_mask(tile_rows)                      # host-precomputed

    tail = _trunk(x, tap_mask, params, tile_rows, num_tiles)  # (b_pad*36, 32)

    # Free reshape: rows are (b, h, w)-major and contiguous, so
    # (B*36, 32) -> (B, 1152) is a pure view; the first-layer head weights
    # were row-permuted at init to consume this ordering (no NCHW transpose).
    hidden = tail[:B * H * W].reshape(B, H * W * c_tail)

    # Precompute the additive action mask in f32 (log(0) -> -inf -> clip).
    inf_mask = jnp.clip(jnp.log(action_mask.astype(jnp.float32)), -1e38, 1e38)

    logits, value = _heads(hidden, inf_mask, params)
    return logits, value


# ----------------------------------------------------------------------------
# Deterministic parameter initialization (mirrors the module's __init__ shapes)
# ----------------------------------------------------------------------------
def init_params(key, num_blocks=18, c=256, c_tail=32, n_act=235, hid=256):
    c4 = c // 4
    flat = c_tail * H * W
    keys = iter(jax.random.split(key, 256))

    def nk():
        return next(keys)

    def kaiming(shape, fan_in, dtype=jnp.bfloat16):
        # nn.init.kaiming_normal_; stored in bf16 for the MXU (f32 accumulate).
        return (jnp.sqrt(2.0 / fan_in) *
                jax.random.normal(nk(), shape, jnp.float32)).astype(dtype)

    def bn(ch):
        # Eval-mode BN folded to affine (fresh init: gamma=1, beta=0,
        # running_mean=0, running_var=1).
        gamma = jnp.ones((ch,), jnp.float32)
        beta = jnp.zeros((ch,), jnp.float32)
        mean = jnp.zeros((ch,), jnp.float32)
        var = jnp.ones((ch,), jnp.float32)
        scale = gamma / jnp.sqrt(var + EPS)
        bias = beta - mean * scale
        return scale.reshape(1, ch), bias.reshape(1, ch)

    def linear(fan_in, fan_out):
        w = kaiming((fan_in, fan_out), fan_in)
        bound = 1.0 / (fan_in ** 0.5)
        b = jax.random.uniform(nk(), (1, fan_out), jnp.float32, -bound, bound)
        return w, b

    p = {}
    # Stem Conv2d(174, 256, 1): input-channel dim zero-padded 174 -> 256.
    w0 = kaiming((C_IN, c), C_IN)
    p['w0'] = jnp.zeros((C_IN_PAD, c), jnp.bfloat16).at[:C_IN].set(w0)

    s1, b1 = bn(c)
    s2, b2 = bn(c4)
    s3, b3 = bn(c4)
    p['s1'] = jnp.tile(s1[None], (num_blocks, 1, 1))
    p['b1'] = jnp.tile(b1[None], (num_blocks, 1, 1))
    p['s2'] = jnp.tile(s2[None], (num_blocks, 1, 1))
    p['b2'] = jnp.tile(b2[None], (num_blocks, 1, 1))
    p['s3'] = jnp.tile(s3[None], (num_blocks, 1, 1))
    p['b3'] = jnp.tile(b3[None], (num_blocks, 1, 1))
    p['w1'] = jnp.stack([kaiming((c, c4), c) for _ in range(num_blocks)])
    # 3x3 conv weights already in im2col layout (tap*cin, cout); a real
    # PyTorch weight (cout,cin,3,3) maps via transpose(2,3,1,0).reshape(9*cin, cout).
    p['w3'] = jnp.stack([kaiming((9 * c4, c4), 9 * c4) for _ in range(num_blocks)])
    p['w4'] = jnp.stack([kaiming((c4, c), c4) for _ in range(num_blocks)])

    p['ts1'], p['tb1'] = bn(c)
    p['w5'] = kaiming((c, c_tail), c)                        # Conv2d(256,32,1)
    p['ts2'], p['tb2'] = bn(c_tail)

    # Heads, fused to two matmuls:
    #   * first layers concatenated:   (1152, 512)
    #   * second layers block-diagonal:(512, 236)  (235 logits | 1 value)
    # Row-permute the first-layer weights so they consume the (b, h, w, c)
    # row-major hidden (PyTorch flattens NCHW as (c, h, w)).
    perm = np.array([cc * (H * W) + s
                     for s in range(H * W) for cc in range(c_tail)])
    wl1, bl1 = linear(flat, hid)                             # Linear(1152,256)
    wl2, bl2 = linear(hid, n_act)                            # Linear(256,235)
    wv1, bv1 = linear(flat, hid)                             # Linear(1152,256)
    wv2, bv2 = linear(hid, 1)                                # Linear(256,1)
    p['wh1'] = jnp.concatenate([wl1[perm], wv1[perm]], axis=1)   # (1152, 512)
    p['bh1'] = jnp.concatenate([bl1, bv1], axis=1)               # (1, 512)
    wh2 = jnp.zeros((2 * hid, n_act + 1), jnp.float32)
    wh2 = wh2.at[:hid, :n_act].set(wl2.astype(jnp.float32))
    wh2 = wh2.at[hid:, n_act:].set(wv2.astype(jnp.float32))
    p['wh2'] = wh2.astype(jnp.bfloat16)                          # (512, 236)
    p['bh2'] = jnp.concatenate([bl2, bv2], axis=1)               # (1, 236)
    return p


# ----------------------------------------------------------------------------
if __name__ == "__main__":
    key = jax.random.PRNGKey(0)
    kp, kobs, kmask = jax.random.split(key, 3)

    params = init_params(kp)

    B = 2
    obs = jax.random.normal(kobs, (B, 174, H, W), dtype=jnp.float32)
    action_mask = (jax.random.uniform(kmask, (B, 235)) > 0.3).astype(jnp.float32)

    logits, value = jax.jit(forward)(params, obs, action_mask)
    jax.block_until_ready((logits, value))

    assert logits.shape == (B, 235), logits.shape
    assert value.shape == (B, 1), value.shape
    assert bool(jnp.isfinite(value).all())

    print("KERNEL_OK")
</pallas_src>

<mosaic_0001>
module attributes {stable_mosaic.version = 11 : i64} {
  func.func @_trunk_kernel(%arg0: i32, %arg1: memref<72x256xbf16, #tpu.memory_space<vmem>>, %arg2: memref<72x16xf32, #tpu.memory_space<vmem>>, %arg3: memref<256x256xbf16, #tpu.memory_space<vmem>>, %arg4: memref<18x1x256xf32, #tpu.memory_space<vmem>>, %arg5: memref<18x1x256xf32, #tpu.memory_space<vmem>>, %arg6: memref<18x256x64xbf16, #tpu.memory_space<vmem>>, %arg7: memref<18x1x64xf32, #tpu.memory_space<vmem>>, %arg8: memref<18x1x64xf32, #tpu.memory_space<vmem>>, %arg9: memref<18x576x64xbf16, #tpu.memory_space<vmem>>, %arg10: memref<18x1x64xf32, #tpu.memory_space<vmem>>, %arg11: memref<18x1x64xf32, #tpu.memory_space<vmem>>, %arg12: memref<18x64x256xbf16, #tpu.memory_space<vmem>>, %arg13: memref<1x256xf32, #tpu.memory_space<vmem>>, %arg14: memref<1x256xf32, #tpu.memory_space<vmem>>, %arg15: memref<256x32xbf16, #tpu.memory_space<vmem>>, %arg16: memref<1x32xf32, #tpu.memory_space<vmem>>, %arg17: memref<1x32xf32, #tpu.memory_space<vmem>>, %arg18: memref<72x32xf32, #tpu.memory_space<vmem>>, %arg19: memref<104x576xf32, #tpu.memory_space<vmem>>) attributes {dimension_semantics = [#tpu.dimension_semantics<parallel>], iteration_bounds = array<i64: 1>, scalar_prefetch = 0 : i64, scratch_operands = 1 : i64, tpu.core_type = #tpu.core_type<tc>, window_params = [{transform_indices = @transform_0, window_bounds = array<i64: 72, 256>}, {pipeline_mode = #tpu.pipeline_mode<synchronous>, transform_indices = @transform_1, window_bounds = array<i64: 72, 16>}, {pipeline_mode = #tpu.pipeline_mode<synchronous>, transform_indices = @transform_2, window_bounds = array<i64: 256, 256>}, {pipeline_mode = #tpu.pipeline_mode<synchronous>, transform_indices = @transform_3, window_bounds = array<i64: 18, 1, 256>}, {pipeline_mode = #tpu.pipeline_mode<synchronous>, transform_indices = @transform_4, window_bounds = array<i64: 18, 1, 256>}, {pipeline_mode = #tpu.pipeline_mode<synchronous>, transform_indices = @transform_5, window_bounds = array<i64: 18, 256, 64>}, {pipeline_mode = #tpu.pipeline_mode<synchronous>, transform_indices = @transform_6, window_bounds = array<i64: 18, 1, 64>}, {pipeline_mode = #tpu.pipeline_mode<synchronous>, transform_indices = @transform_7, window_bounds = array<i64: 18, 1, 64>}, {pipeline_mode = #tpu.pipeline_mode<synchronous>, transform_indices = @transform_8, window_bounds = array<i64: 18, 576, 64>}, {pipeline_mode = #tpu.pipeline_mode<synchronous>, transform_indices = @transform_9, window_bounds = array<i64: 18, 1, 64>}, {pipeline_mode = #tpu.pipeline_mode<synchronous>, transform_indices = @transform_10, window_bounds = array<i64: 18, 1, 64>}, {pipeline_mode = #tpu.pipeline_mode<synchronous>, transform_indices = @transform_11, window_bounds = array<i64: 18, 64, 256>}, {pipeline_mode = #tpu.pipeline_mode<synchronous>, transform_indices = @transform_12, window_bounds = array<i64: 1, 256>}, {pipeline_mode = #tpu.pipeline_mode<synchronous>, transform_indices = @transform_13, window_bounds = array<i64: 1, 256>}, {pipeline_mode = #tpu.pipeline_mode<synchronous>, transform_indices = @transform_14, window_bounds = array<i64: 256, 32>}, {pipeline_mode = #tpu.pipeline_mode<synchronous>, transform_indices = @transform_15, window_bounds = array<i64: 1, 32>}, {pipeline_mode = #tpu.pipeline_mode<synchronous>, transform_indices = @transform_16, window_bounds = array<i64: 1, 32>}, {transform_indices = @transform_17, window_bounds = array<i64: 72, 32>}]} {
    %cst = arith.constant 0.000000e+00 : f32
    %0 = vector.broadcast %cst : f32 to vector<16x576xf32>
    %c16 = arith.constant 16 : index
    %c0 = arith.constant 0 : index
    %1 = vector.load %arg19[%c16, %c0] : memref<104x576xf32, #tpu.memory_space<vmem>>, vector<16x576xf32>
    tpu.vector_store %arg19[%c16, %c0], %0 {strides = array<i32>} : memref<104x576xf32, #tpu.memory_space<vmem>>, vector<16x576xf32>,
    %c72 = arith.constant 72 : index
    %c0_0 = arith.constant 0 : index
    %2 = vector.load %arg19[%c72, %c0_0] : memref<104x576xf32, #tpu.memory_space<vmem>>, vector<16x576xf32>
    tpu.vector_store %arg19[%c72, %c0_0], %0 {strides = array<i32>} : memref<104x576xf32, #tpu.memory_space<vmem>>, vector<16x576xf32>,
    %c0_1 = arith.constant 0 : index
    %c0_2 = arith.constant 0 : index
    %3 = vector.load %arg1[%c0_1, %c0_2] : memref<72x256xbf16, #tpu.memory_space<vmem>>, vector<72x256xbf16>
    %c0_3 = arith.constant 0 : index
    %c0_4 = arith.constant 0 : index
    %4 = vector.load %arg3[%c0_3, %c0_4] : memref<256x256xbf16, #tpu.memory_space<vmem>>, vector<256x256xbf16>
    %cst_5 = arith.constant dense<0.000000e+00> : vector<72x256xf32>
    %5 = tpu.matmul %3, %4, %cst_5 {dimension_numbers = #tpu.dot_dimension_numbers<[1], [0], [0], [1], [0, 0, 1, 1], [], []>} : vector<72x256xbf16>, vector<256x256xbf16>, vector<72x256xf32> -> vector<72x256xf32>
    %c0_i32 = arith.constant 0 : i32
    %c18_i32 = arith.constant 18 : i32
    %6 = arith.addi %c0_i32, %c18_i32 : i32
    %c1_i32 = arith.constant 1 : i32
    %7 = scf.for %arg20 = %c0_i32 to %6 step %c1_i32 iter_args(%arg21 = %5) -> (vector<72x256xf32>)  : i32 {
      %28 = arith.index_cast %arg20 : i32 to index
      %c0_22 = arith.constant 0 : index
      %c0_23 = arith.constant 0 : index
      %29 = vector.load %arg4[%28, %c0_22, %c0_23] : memref<18x1x256xf32, #tpu.memory_space<vmem>>, vector<1x1x256xf32>
      %30 = vector.shape_cast %29 : vector<1x1x256xf32> to vector<1x256xf32>
      %31 = vector.broadcast %30 : vector<1x256xf32> to vector<72x256xf32>
      %32 = arith.mulf %arg21, %31 : vector<72x256xf32>
      %33 = arith.index_cast %arg20 : i32 to index
      %c0_24 = arith.constant 0 : index
      %c0_25 = arith.constant 0 : index
      %34 = vector.load %arg5[%33, %c0_24, %c0_25] : memref<18x1x256xf32, #tpu.memory_space<vmem>>, vector<1x1x256xf32>
      %35 = vector.shape_cast %34 : vector<1x1x256xf32> to vector<1x256xf32>
      %36 = vector.broadcast %35 : vector<1x256xf32> to vector<72x256xf32>
      %37 = arith.addf %32, %36 : vector<72x256xf32>
      %cst_26 = arith.constant 0.000000e+00 : f32
      %38 = vector.broadcast %cst_26 : f32 to vector<72x256xf32>
      %39 = arith.maximumf %37, %38 : vector<72x256xf32>
      %40 = arith.truncf %39 : vector<72x256xf32> to vector<72x256xbf16>
      %41 = arith.index_cast %arg20 : i32 to index
      %c0_27 = arith.constant 0 : index
      %c0_28 = arith.constant 0 : index
      %42 = vector.load %arg6[%41, %c0_27, %c0_28] : memref<18x256x64xbf16, #tpu.memory_space<vmem>>, vector<1x256x64xbf16>
      %43 = vector.shape_cast %42 : vector<1x256x64xbf16> to vector<256x64xbf16>
      %cst_29 = arith.constant dense<0.000000e+00> : vector<72x64xf32>
      %44 = tpu.matmul %40, %43, %cst_29 {dimension_numbers = #tpu.dot_dimension_numbers<[1], [0], [0], [1], [0, 0, 1, 1], [], []>} : vector<72x256xbf16>, vector<256x64xbf16>, vector<72x64xf32> -> vector<72x64xf32>
      %45 = arith.index_cast %arg20 : i32 to index
      %c0_30 = arith.constant 0 : index
      %c0_31 = arith.constant 0 : index
      %46 = vector.load %arg7[%45, %c0_30, %c0_31] : memref<18x1x64xf32, #tpu.memory_space<vmem>>, vector<1x1x64xf32>
      %47 = vector.shape_cast %46 : vector<1x1x64xf32> to vector<1x64xf32>
      %48 = vector.broadcast %47 : vector<1x64xf32> to vector<72x64xf32>
      %49 = arith.mulf %44, %48 : vector<72x64xf32>
      %50 = arith.index_cast %arg20 : i32 to index
      %c0_32 = arith.constant 0 : index
      %c0_33 = arith.constant 0 : index
      %51 = vector.load %arg8[%50, %c0_32, %c0_33] : memref<18x1x64xf32, #tpu.memory_space<vmem>>, vector<1x1x64xf32>
      %52 = vector.shape_cast %51 : vector<1x1x64xf32> to vector<1x64xf32>
      %53 = vector.broadcast %52 : vector<1x64xf32> to vector<72x64xf32>
      %54 = arith.addf %49, %53 : vector<72x64xf32>
      %cst_34 = arith.constant 0.000000e+00 : f32
      %55 = vector.broadcast %cst_34 : f32 to vector<72x64xf32>
      %56 = arith.maximumf %54, %55 : vector<72x64xf32>
      %c0_35 = arith.constant 0 : index
      %c0_36 = arith.constant 0 : index
      %57 = vector.load %arg2[%c0_35, %c0_36] : memref<72x16xf32, #tpu.memory_space<vmem>>, vector<72x1xf32>
      %58 = vector.broadcast %57 : vector<72x1xf32> to vector<72x64xf32>
      %59 = arith.mulf %56, %58 : vector<72x64xf32>
      %c26 = arith.constant 26 : index
      %c0_37 = arith.constant 0 : index
      %60 = vector.load %arg19[%c26, %c0_37] : memref<104x576xf32, #tpu.memory_space<vmem>>, vector<72x64xf32>
      tpu.vector_store %arg19[%c26, %c0_37], %59 {strides = array<i32>} : memref<104x576xf32, #tpu.memory_space<vmem>>, vector<72x64xf32>,
      %c0_38 = arith.constant 0 : index
      %c1 = arith.constant 1 : index
      %61 = vector.load %arg2[%c0_38, %c1] : memref<72x16xf32, #tpu.memory_space<vmem>>, vector<72x1xf32>
      %62 = vector.broadcast %61 : vector<72x1xf32> to vector<72x64xf32>
      %63 = arith.mulf %56, %62 : vector<72x64xf32>
      %c25 = arith.constant 25 : index
      %c64 = arith.constant 64 : index
      %64 = vector.load %arg19[%c25, %c64] : memref<104x576xf32, #tpu.memory_space<vmem>>, vector<72x64xf32>
      tpu.vector_store %arg19[%c25, %c64], %63 {strides = array<i32>} : memref<104x576xf32, #tpu.memory_space<vmem>>, vector<72x64xf32>,
      %c0_39 = arith.constant 0 : index
      %c2 = arith.constant 2 : index
      %65 = vector.load %arg2[%c0_39, %c2] : memref<72x16xf32, #tpu.memory_space<vmem>>, vector<72x1xf32>
      %66 = vector.broadcast %65 : vector<72x1xf32> to vector<72x64xf32>
      %67 = arith.mulf %56, %66 : vector<72x64xf32>
      %c24 = arith.constant 24 : index
      %c128 = arith.constant 128 : index
      %68 = vector.load %arg19[%c24, %c128] : memref<104x576xf32, #tpu.memory_space<vmem>>, vector<72x64xf32>
      tpu.vector_store %arg19[%c24, %c128], %67 {strides = array<i32>} : memref<104x576xf32, #tpu.memory_space<vmem>>, vector<72x64xf32>,
      %c0_40 = arith.constant 0 : index
      %c3 = arith.constant 3 : index
      %69 = vector.load %arg2[%c0_40, %c3] : memref<72x16xf32, #tpu.memory_space<vmem>>, vector<72x1xf32>
      %70 = vector.broadcast %69 : vector<72x1xf32> to vector<72x64xf32>
      %71 = arith.mulf %56, %70 : vector<72x64xf32>
      %c17 = arith.constant 17 : index
      %c192 = arith.constant 192 : index
      %72 = vector.load %arg19[%c17, %c192] : memref<104x576xf32, #tpu.memory_space<vmem>>, vector<72x64xf32>
      tpu.vector_store %arg19[%c17, %c192], %71 {strides = array<i32>} : memref<104x576xf32, #tpu.memory_space<vmem>>, vector<72x64xf32>,
      %c0_41 = arith.constant 0 : index
      %c4 = arith.constant 4 : index
      %73 = vector.load %arg2[%c0_41, %c4] : memref<72x16xf32, #tpu.memory_space<vmem>>, vector<72x1xf32>
      %74 = vector.broadcast %73 : vector<72x1xf32> to vector<72x64xf32>
      %75 = arith.mulf %56, %74 : vector<72x64xf32>
      %c16_42 = arith.constant 16 : index
      %c256 = arith.constant 256 : index
      %76 = vector.load %arg19[%c16_42, %c256] : memref<104x576xf32, #tpu.memory_space<vmem>>, vector<72x64xf32>
      tpu.vector_store %arg19[%c16_42, %c256], %75 {strides = array<i32>} : memref<104x576xf32, #tpu.memory_space<vmem>>, vector<72x64xf32>,
      %c0_43 = arith.constant 0 : index
      %c5 = arith.constant 5 : index
      %77 = vector.load %arg2[%c0_43, %c5] : memref<72x16xf32, #tpu.memory_space<vmem>>, vector<72x1xf32>
      %78 = vector.broadcast %77 : vector<72x1xf32> to vector<72x64xf32>
      %79 = arith.mulf %56, %78 : vector<72x64xf32>
      %c15 = arith.constant 15 : index
      %c320 = arith.constant 320 : index
      %80 = vector.load %arg19[%c15, %c320] : memref<104x576xf32, #tpu.memory_space<vmem>>, vector<72x64xf32>
      tpu.vector_store %arg19[%c15, %c320], %79 {strides = array<i32>} : memref<104x576xf32, #tpu.memory_space<vmem>>, vector<72x64xf32>,
      %c0_44 = arith.constant 0 : index
      %c6 = arith.constant 6 : index
      %81 = vector.load %arg2[%c0_44, %c6] : memref<72x16xf32, #tpu.memory_space<vmem>>, vector<72x1xf32>
      %82 = vector.broadcast %81 : vector<72x1xf32> to vector<72x64xf32>
      %83 = arith.mulf %56, %82 : vector<72x64xf32>
      %c8 = arith.constant 8 : index
      %c384 = arith.constant 384 : index
      %84 = vector.load %arg19[%c8, %c384] : memref<104x576xf32, #tpu.memory_space<vmem>>, vector<72x64xf32>
      tpu.vector_store %arg19[%c8, %c384], %83 {strides = array<i32>} : memref<104x576xf32, #tpu.memory_space<vmem>>, vector<72x64xf32>,
      %c0_45 = arith.constant 0 : index
      %c7 = arith.constant 7 : index
      %85 = vector.load %arg2[%c0_45, %c7] : memref<72x16xf32, #tpu.memory_space<vmem>>, vector<72x1xf32>
      %86 = vector.broadcast %85 : vector<72x1xf32> to vector<72x64xf32>
      %87 = arith.mulf %56, %86 : vector<72x64xf32>
      %c7_46 = arith.constant 7 : index
      %c448 = arith.constant 448 : index
      %88 = vector.load %arg19[%c7_46, %c448] : memref<104x576xf32, #tpu.memory_space<vmem>>, vector<72x64xf32>
      tpu.vector_store %arg19[%c7_46, %c448], %87 {strides = array<i32>} : memref<104x576xf32, #tpu.memory_space<vmem>>, vector<72x64xf32>,
      %c0_47 = arith.constant 0 : index
      %c8_48 = arith.constant 8 : index
      %89 = vector.load %arg2[%c0_47, %c8_48] : memref<72x16xf32, #tpu.memory_space<vmem>>, vector<72x1xf32>
      %90 = vector.broadcast %89 : vector<72x1xf32> to vector<72x64xf32>
      %91 = arith.mulf %56, %90 : vector<72x64xf32>
      %c6_49 = arith.constant 6 : index
      %c512 = arith.constant 512 : index
      %92 = vector.load %arg19[%c6_49, %c512] : memref<104x576xf32, #tpu.memory_space<vmem>>, vector<72x64xf32>
      tpu.vector_store %arg19[%c6_49, %c512], %91 {strides = array<i32>} : memref<104x576xf32, #tpu.memory_space<vmem>>, vector<72x64xf32>,
      %c16_50 = arith.constant 16 : index
      %c0_51 = arith.constant 0 : index
      %93 = vector.load %arg19[%c16_50, %c0_51] : memref<104x576xf32, #tpu.memory_space<vmem>>, vector<72x576xf32>
      %94 = arith.truncf %93 : vector<72x576xf32> to vector<72x576xbf16>
      %95 = arith.index_cast %arg20 : i32 to index
      %c0_52 = arith.constant 0 : index
      %c0_53 = arith.constant 0 : index
      %96 = vector.load %arg9[%95, %c0_52, %c0_53] : memref<18x576x64xbf16, #tpu.memory_space<vmem>>, vector<1x576x64xbf16>
      %97 = vector.shape_cast %96 : vector<1x576x64xbf16> to vector<576x64xbf16>
      %cst_54 = arith.constant dense<0.000000e+00> : vector<72x64xf32>
      %98 = tpu.matmul %94, %97, %cst_54 {dimension_numbers = #tpu.dot_dimension_numbers<[1], [0], [0], [1], [0, 0, 1, 1], [], []>} : vector<72x576xbf16>, vector<576x64xbf16>, vector<72x64xf32> -> vector<72x64xf32>
      %99 = arith.index_cast %arg20 : i32 to index
      %c0_55 = arith.constant 0 : index
      %c0_56 = arith.constant 0 : index
      %100 = vector.load %arg10[%99, %c0_55, %c0_56] : memref<18x1x64xf32, #tpu.memory_space<vmem>>, vector<1x1x64xf32>
      %101 = vector.shape_cast %100 : vector<1x1x64xf32> to vector<1x64xf32>
      %102 = vector.broadcast %101 : vector<1x64xf32> to vector<72x64xf32>
      %103 = arith.mulf %98, %102 : vector<72x64xf32>
      %104 = arith.index_cast %arg20 : i32 to index
      %c0_57 = arith.constant 0 : index
      %c0_58 = arith.constant 0 : index
      %105 = vector.load %arg11[%104, %c0_57, %c0_58] : memref<18x1x64xf32, #tpu.memory_space<vmem>>, vector<1x1x64xf32>
      %106 = vector.shape_cast %105 : vector<1x1x64xf32> to vector<1x64xf32>
      %107 = vector.broadcast %106 : vector<1x64xf32> to vector<72x64xf32>
      %108 = arith.addf %103, %107 : vector<72x64xf32>
      %cst_59 = arith.constant 0.000000e+00 : f32
      %109 = vector.broadcast %cst_59 : f32 to vector<72x64xf32>
      %110 = arith.maximumf %108, %109 : vector<72x64xf32>
      %111 = arith.truncf %110 : vector<72x64xf32> to vector<72x64xbf16>
      %112 = arith.index_cast %arg20 : i32 to index
      %c0_60 = arith.constant 0 : index
      %c0_61 = arith.constant 0 : index
      %113 = vector.load %arg12[%112, %c0_60, %c0_61] : memref<18x64x256xbf16, #tpu.memory_space<vmem>>, vector<1x64x256xbf16>
      %114 = vector.shape_cast %113 : vector<1x64x256xbf16> to vector<64x256xbf16>
      %cst_62 = arith.constant dense<0.000000e+00> : vector<72x256xf32>
      %115 = tpu.matmul %111, %114, %cst_62 {dimension_numbers = #tpu.dot_dimension_numbers<[1], [0], [0], [1], [0, 0, 1, 1], [], []>} : vector<72x64xbf16>, vector<64x256xbf16>, vector<72x256xf32> -> vector<72x256xf32>
      %116 = arith.addf %arg21, %115 : vector<72x256xf32>
      scf.yield %116 : vector<72x256xf32>
    }
    %c18_i32_6 = arith.constant 18 : i32
    %c0_7 = arith.constant 0 : index
    %c0_8 = arith.constant 0 : index
    %8 = vector.load %arg13[%c0_7, %c0_8] : memref<1x256xf32, #tpu.memory_space<vmem>>, vector<1x256xf32>
    %9 = vector.broadcast %8 : vector<1x256xf32> to vector<72x256xf32>
    %10 = arith.mulf %7, %9 : vector<72x256xf32>
    %c0_9 = arith.constant 0 : index
    %c0_10 = arith.constant 0 : index
    %11 = vector.load %arg14[%c0_9, %c0_10] : memref<1x256xf32, #tpu.memory_space<vmem>>, vector<1x256xf32>
    %12 = vector.broadcast %11 : vector<1x256xf32> to vector<72x256xf32>
    %13 = arith.addf %10, %12 : vector<72x256xf32>
    %cst_11 = arith.constant 0.000000e+00 : f32
    %14 = vector.broadcast %cst_11 : f32 to vector<72x256xf32>
    %15 = arith.maximumf %13, %14 : vector<72x256xf32>
    %16 = arith.truncf %15 : vector<72x256xf32> to vector<72x256xbf16>
    %c0_12 = arith.constant 0 : index
    %c0_13 = arith.constant 0 : index
    %17 = vector.load %arg15[%c0_12, %c0_13] : memref<256x32xbf16, #tpu.memory_space<vmem>>, vector<256x32xbf16>
    %cst_14 = arith.constant dense<0.000000e+00> : vector<72x32xf32>
    %18 = tpu.matmul %16, %17, %cst_14 {dimension_numbers = #tpu.dot_dimension_numbers<[1], [0], [0], [1], [0, 0, 1, 1], [], []>} : vector<72x256xbf16>, vector<256x32xbf16>, vector<72x32xf32> -> vector<72x32xf32>
    %c0_15 = arith.constant 0 : index
    %c0_16 = arith.constant 0 : index
    %19 = vector.load %arg16[%c0_15, %c0_16] : memref<1x32xf32, #tpu.memory_space<vmem>>, vector<1x32xf32>
    %20 = vector.broadcast %19 : vector<1x32xf32> to vector<72x32xf32>
    %21 = arith.mulf %18, %20 : vector<72x32xf32>
    %c0_17 = arith.constant 0 : index
    %c0_18 = arith.constant 0 : index
    %22 = vector.load %arg17[%c0_17, %c0_18] : memref<1x32xf32, #tpu.memory_space<vmem>>, vector<1x32xf32>
    %23 = vector.broadcast %22 : vector<1x32xf32> to vector<72x32xf32>
    %24 = arith.addf %21, %23 : vector<72x32xf32>
    %cst_19 = arith.constant 0.000000e+00 : f32
    %25 = vector.broadcast %cst_19 : f32 to vector<72x32xf32>
    %26 = arith.maximumf %24, %25 : vector<72x32xf32>
    %c0_20 = arith.constant 0 : index
    %c0_21 = arith.constant 0 : index
    %27 = vector.load %arg18[%c0_20, %c0_21] : memref<72x32xf32, #tpu.memory_space<vmem>>, vector<72x32xf32>
    tpu.vector_store %arg18[%c0_20, %c0_21], %26 {strides = array<i32>} : memref<72x32xf32, #tpu.memory_space<vmem>>, vector<72x32xf32>,
    return
  }
  func.func @transform_0(%arg0: i32) -> (i32, i32) {
    %c0_i32 = arith.constant 0 : i32
    %c0_i32_0 = arith.constant 0 : i32
    return %arg0, %c0_i32 : i32, i32
  }
  func.func @transform_1(%arg0: i32) -> (i32, i32) {
    %c0_i32 = arith.constant 0 : i32
    %c0_i32_0 = arith.constant 0 : i32
    %c0_i32_1 = arith.constant 0 : i32
    return %c0_i32, %c0_i32_0 : i32, i32
  }
  func.func @transform_2(%arg0: i32) -> (i32, i32) {
    %c0_i32 = arith.constant 0 : i32
    %c0_i32_0 = arith.constant 0 : i32
    %c0_i32_1 = arith.constant 0 : i32
    return %c0_i32, %c0_i32_0 : i32, i32
  }
  func.func @transform_3(%arg0: i32) -> (i32, i32, i32) {
    %c0_i32 = arith.constant 0 : i32
    %c0_i32_0 = arith.constant 0 : i32
    %c0_i32_1 = arith.constant 0 : i32
    %c0_i32_2 = arith.constant 0 : i32
    return %c0_i32, %c0_i32_0, %c0_i32_1 : i32, i32, i32
  }
  func.func @transform_4(%arg0: i32) -> (i32, i32, i32) {
    %c0_i32 = arith.constant 0 : i32
    %c0_i32_0 = arith.constant 0 : i32
    %c0_i32_1 = arith.constant 0 : i32
    %c0_i32_2 = arith.constant 0 : i32
    return %c0_i32, %c0_i32_0, %c0_i32_1 : i32, i32, i32
  }
  func.func @transform_5(%arg0: i32) -> (i32, i32, i32) {
    %c0_i32 = arith.constant 0 : i32
    %c0_i32_0 = arith.constant 0 : i32
    %c0_i32_1 = arith.constant 0 : i32
    %c0_i32_2 = arith.constant 0 : i32
    return %c0_i32, %c0_i32_0, %c0_i32_1 : i32, i32, i32
  }
  func.func @transform_6(%arg0: i32) -> (i32, i32, i32) {
    %c0_i32 = arith.constant 0 : i32
    %c0_i32_0 = arith.constant 0 : i32
    %c0_i32_1 = arith.constant 0 : i32
    %c0_i32_2 = arith.constant 0 : i32
    return %c0_i32, %c0_i32_0, %c0_i32_1 : i32, i32, i32
  }
  func.func @transform_7(%arg0: i32) -> (i32, i32, i32) {
    %c0_i32 = arith.constant 0 : i32
    %c0_i32_0 = arith.constant 0 : i32
    %c0_i32_1 = arith.constant 0 : i32
    %c0_i32_2 = arith.constant 0 : i32
    return %c0_i32, %c0_i32_0, %c0_i32_1 : i32, i32, i32
  }
  func.func @transform_8(%arg0: i32) -> (i32, i32, i32) {
    %c0_i32 = arith.constant 0 : i32
    %c0_i32_0 = arith.constant 0 : i32
    %c0_i32_1 = arith.constant 0 : i32
    %c0_i32_2 = arith.constant 0 : i32
    return %c0_i32, %c0_i32_0, %c0_i32_1 : i32, i32, i32
  }
  func.func @transform_9(%arg0: i32) -> (i32, i32, i32) {
    %c0_i32 = arith.constant 0 : i32
    %c0_i32_0 = arith.constant 0 : i32
    %c0_i32_1 = arith.constant 0 : i32
    %c0_i32_2 = arith.constant 0 : i32
    return %c0_i32, %c0_i32_0, %c0_i32_1 : i32, i32, i32
  }
  func.func @transform_10(%arg0: i32) -> (i32, i32, i32) {
    %c0_i32 = arith.constant 0 : i32
    %c0_i32_0 = arith.constant 0 : i32
    %c0_i32_1 = arith.constant 0 : i32
    %c0_i32_2 = arith.constant 0 : i32
    return %c0_i32, %c0_i32_0, %c0_i32_1 : i32, i32, i32
  }
  func.func @transform_11(%arg0: i32) -> (i32, i32, i32) {
    %c0_i32 = arith.constant 0 : i32
    %c0_i32_0 = arith.constant 0 : i32
    %c0_i32_1 = arith.constant 0 : i32
    %c0_i32_2 = arith.constant 0 : i32
    return %c0_i32, %c0_i32_0, %c0_i32_1 : i32, i32, i32
  }
  func.func @transform_12(%arg0: i32) -> (i32, i32) {
    %c0_i32 = arith.constant 0 : i32
    %c0_i32_0 = arith.constant 0 : i32
    %c0_i32_1 = arith.constant 0 : i32
    return %c0_i32, %c0_i32_0 : i32, i32
  }
  func.func @transform_13(%arg0: i32) -> (i32, i32) {
    %c0_i32 = arith.constant 0 : i32
    %c0_i32_0 = arith.constant 0 : i32
    %c0_i32_1 = arith.constant 0 : i32
    return %c0_i32, %c0_i32_0 : i32, i32
  }
  func.func @transform_14(%arg0: i32) -> (i32, i32) {
    %c0_i32 = arith.constant 0 : i32
    %c0_i32_0 = arith.constant 0 : i32
    %c0_i32_1 = arith.constant 0 : i32
    return %c0_i32, %c0_i32_0 : i32, i32
  }
  func.func @transform_15(%arg0: i32) -> (i32, i32) {
    %c0_i32 = arith.constant 0 : i32
    %c0_i32_0 = arith.constant 0 : i32
    %c0_i32_1 = arith.constant 0 : i32
    return %c0_i32, %c0_i32_0 : i32, i32
  }
  func.func @transform_16(%arg0: i32) -> (i32, i32) {
    %c0_i32 = arith.constant 0 : i32
    %c0_i32_0 = arith.constant 0 : i32
    %c0_i32_1 = arith.constant 0 : i32
    return %c0_i32, %c0_i32_0 : i32, i32
  }
  func.func @transform_17(%arg0: i32) -> (i32, i32) {
    %c0_i32 = arith.constant 0 : i32
    %c0_i32_0 = arith.constant 0 : i32
    return %arg0, %c0_i32 : i32, i32
  }
}

module attributes {stable_mosaic.version = 11 : i64} {
  func.func @_heads_kernel(%arg0: memref<2x1152xf32, #tpu.memory_space<vmem>>, %arg1: memref<1152x512xbf16, #tpu.memory_space<vmem>>, %arg2: memref<1x512xf32, #tpu.memory_space<vmem>>, %arg3: memref<512x236xbf16, #tpu.memory_space<vmem>>, %arg4: memref<1x236xf32, #tpu.memory_space<vmem>>, %arg5: memref<2x235xf32, #tpu.memory_space<vmem>>, %arg6: memref<2x235xf32, #tpu.memory_space<vmem>>, %arg7: memref<2x1xf32, #tpu.memory_space<vmem>>) attributes {dimension_semantics = [], scalar_prefetch = 0 : i64, scratch_operands = 0 : i64, tpu.core_type = #tpu.core_type<tc>} {
    %c0 = arith.constant 0 : index
    %c0_0 = arith.constant 0 : index
    %0 = vector.load %arg0[%c0, %c0_0] : memref<2x1152xf32, #tpu.memory_space<vmem>>, vector<2x1152xf32>
    %1 = arith.truncf %0 : vector<2x1152xf32> to vector<2x1152xbf16>
    %c0_1 = arith.constant 0 : index
    %c0_2 = arith.constant 0 : index
    %2 = vector.load %arg1[%c0_1, %c0_2] : memref<1152x512xbf16, #tpu.memory_space<vmem>>, vector<1152x512xbf16>
    %cst = arith.constant dense<0.000000e+00> : vector<2x512xf32>
    %3 = tpu.matmul %1, %2, %cst {dimension_numbers = #tpu.dot_dimension_numbers<[1], [0], [0], [1], [0, 0, 1, 1], [], []>} : vector<2x1152xbf16>, vector<1152x512xbf16>, vector<2x512xf32> -> vector<2x512xf32>
    %c0_3 = arith.constant 0 : index
    %c0_4 = arith.constant 0 : index
    %4 = vector.load %arg2[%c0_3, %c0_4] : memref<1x512xf32, #tpu.memory_space<vmem>>, vector<1x512xf32>
    %5 = vector.broadcast %4 : vector<1x512xf32> to vector<2x512xf32>
    %6 = arith.addf %3, %5 : vector<2x512xf32>
    %cst_5 = arith.constant 0.000000e+00 : f32
    %7 = vector.broadcast %cst_5 : f32 to vector<2x512xf32>
    %8 = arith.maximumf %6, %7 : vector<2x512xf32>
    %9 = arith.truncf %8 : vector<2x512xf32> to vector<2x512xbf16>
    %c0_6 = arith.constant 0 : index
    %c0_7 = arith.constant 0 : index
    %10 = vector.load %arg3[%c0_6, %c0_7] : memref<512x236xbf16, #tpu.memory_space<vmem>>, vector<512x236xbf16>
    %cst_8 = arith.constant dense<0.000000e+00> : vector<2x236xf32>
    %11 = tpu.matmul %9, %10, %cst_8 {dimension_numbers = #tpu.dot_dimension_numbers<[1], [0], [0], [1], [0, 0, 1, 1], [], []>} : vector<2x512xbf16>, vector<512x236xbf16>, vector<2x236xf32> -> vector<2x236xf32>
    %c0_9 = arith.constant 0 : index
    %c0_10 = arith.constant 0 : index
    %12 = vector.load %arg4[%c0_9, %c0_10] : memref<1x236xf32, #tpu.memory_space<vmem>>, vector<1x236xf32>
    %13 = vector.broadcast %12 : vector<1x236xf32> to vector<2x236xf32>
    %14 = arith.addf %11, %13 : vector<2x236xf32>
    %15 = vector.extract_strided_slice %14 {offsets = [0, 0], sizes = [2, 235], strides = [1, 1]} : vector<2x236xf32> to vector<2x235xf32>
    %c0_11 = arith.constant 0 : index
    %c0_12 = arith.constant 0 : index
    %16 = vector.load %arg5[%c0_11, %c0_12] : memref<2x235xf32, #tpu.memory_space<vmem>>, vector<2x235xf32>
    %17 = arith.addf %15, %16 : vector<2x235xf32>
    %c0_13 = arith.constant 0 : index
    %c0_14 = arith.constant 0 : index
    %18 = vector.load %arg6[%c0_13, %c0_14] : memref<2x235xf32, #tpu.memory_space<vmem>>, vector<2x235xf32>
    tpu.vector_store %arg6[%c0_13, %c0_14], %17 {strides = array<i32>} : memref<2x235xf32, #tpu.memory_space<vmem>>, vector<2x235xf32>,
    %19 = vector.extract_strided_slice %14 {offsets = [0, 235], sizes = [2, 1], strides = [1, 1]} : vector<2x236xf32> to vector<2x1xf32>
    %c0_15 = arith.constant 0 : index
    %c0_16 = arith.constant 0 : index
    %20 = vector.load %arg7[%c0_15, %c0_16] : memref<2x1xf32, #tpu.memory_space<vmem>>, vector<2x1xf32>
    tpu.vector_store %arg7[%c0_15, %c0_16], %19 {strides = array<i32>} : memref<2x1xf32, #tpu.memory_space<vmem>>, vector<2x1xf32>,
    return
  }
}

</mosaic_0001>

<bundles_post_ra>
// kernel: forward.2
= control target key start
LH: loop header
LB: loop body
LE: loop exit
PB: predicated region body
PF: predicated region fallthrough
CT: control target
= control target key end

     0   :  { %vm61_vm0 = vcmask 523264   ;;  %v3887_v0 = vmov 0.0   ;;  %s5506_s1 = inlined_call_operand.vmem [shape: f32[72,16], index: 1, kind: input, shape index: {}]   ;;  %s5507_s2 = inlined_call_operand.vmem [shape: bf16[256,256], index: 2, kind: input, shape index: {}]   ;;  %s5508_s3 = inlined_call_operand.vmem [shape: f32[18,1,256], index: 3, kind: input, shape index: {}]   ;;  %s5509_s4 = inlined_call_operand.vmem [shape: f32[18,1,256], index: 4, kind: input, shape index: {}]   ;;  %s5510_s5 = inlined_call_operand.vmem [shape: bf16[18,256,64], index: 5, kind: input, shape index: {}]   ;;  %s5511_s6 = inlined_call_operand.vmem [shape: f32[18,1,64], index: 6, kind: input, shape index: {}]   ;;  %s5512_s7 = inlined_call_operand.vmem [shape: f32[18,1,64], index: 7, kind: input, shape index: {}]   ;;  %s5513_s8 = inlined_call_operand.vmem [shape: bf16[18,576,64], index: 8, kind: input, shape index: {}]   ;;  %s5514_s9 = inlined_call_operand.vmem [shape: f32[18,1,64], index: 9, kind: input, shape index: {}]   ;;  %s5515_s10 = inlined_call_operand.vmem [shape: f32[18,1,64], index: 10, kind: input, shape index: {}]   ;;  %s5516_s11 = inlined_call_operand.vmem [shape: bf16[18,64,256], index: 11, kind: input, shape index: {}]   ;;  %s5517_s12 = inlined_call_operand.vmem [shape: f32[1,256], index: 12, kind: input, shape index: {}]   ;;  %s5518_s13 = inlined_call_operand.vmem [shape: f32[1,256], index: 13, kind: input, shape index: {}]   ;;  %s5519_s14 = inlined_call_operand.vmem [shape: bf16[256,32], index: 14, kind: input, shape index: {}]   ;;  %s5520_s15 = inlined_call_operand.vmem [shape: f32[1,32], index: 15, kind: input, shape index: {}]   ;;  %s5521_s16 = inlined_call_operand.vmem [shape: f32[1,32], index: 16, kind: input, shape index: {}]   ;;  %s5522_s17 = inlined_call_operand.vmem [shape: f32[72,32], index: 17, kind: output, shape index: {}]   ;;  %s5523_s0 = inlined_call_operand.vmem [shape: bf16[72,256], index: 0, kind: input, shape index: {}]  }
   0x1   :  { %5556 = sst [smem:[#allocation29_spill]] %s5506_s1  ;;  %57 = vst [vmem:[#allocation2 + $0x50] sm:$0xff] %v3887_v0  ;;  %58 = vst [vmem:[#allocation2 + $0x58] sm:$0xff] %v3887_v0  ;;  %v3595_v14 = vld [vmem:[%s5523_s0 + $0x4] ss:$8 sps:$4 sm:$0xff]  }
   0x2   :  { %5557 = sst [smem:[#allocation30_spill]] %s5507_s2  ;;  %59 = vst [vmem:[#allocation2 + $0x60] sm:$0xff] %v3887_v0  ;;  %60 = vst [vmem:[#allocation2 + $0x68] sm:$0xff] %v3887_v0  ;;  %v3598_v16 = vld [vmem:[%s5523_s0 + $0x34] ss:$8 sps:$4 sm:$0xff]   ;;  %358 = vmatprep.mubr.bf16.mxu0 %v3595_v14  ;;  %v86_v35 = vld [vmem:[%s5523_s0 + $0x40] sm:$0xff] }
   0x3   :  { %62 = vst.msk [vmem:[#allocation2 + $0x70] sm:$0xff] %vm61_vm0, %v3887_v0  ;;  %63 = vst [vmem:[#allocation2 + $0x78] sm:$0xff] %v3887_v0  ;;  %s5558_s26 = sld [smem:[#allocation30_spill]]  ;;  %388 = vmatprep.mubr.bf16.mxu1 %v3598_v16  ;;  %v3593_v36 = vld [vmem:[%s5523_s0] ss:$8 sps:$4 sm:$0xff]   ;;  %v2961_v39 = vcombine.high %v86_v35, %v86_v35  ;;  %v2960_v41 = vcombine.low %v86_v35, %v86_v35 }
   0x4   :  { %64 = vst [vmem:[#allocation2 + $0x80] sm:$0xff] %v3887_v0  ;;  %65 = vst [vmem:[#allocation2 + $0x88] sm:$0xff] %v3887_v0  ;;  %v3596_v37 = vld [vmem:[%s5523_s0 + $0x30] ss:$8 sps:$4 sm:$0xff]   ;;  %v3599_v38 = vld [vmem:[%s5523_s0 + $0x14] ss:$8 sps:$4 sm:$0xff]  }
   0x5   :  { %66 = vst [vmem:[#allocation2 + $0x90] sm:$0xff] %v3887_v0  ;;  %67 = vst.msk [vmem:[#allocation2 + $0x98] sm:$0xff] %vm61_vm0, %v3887_v0  ;;  %v3601_v40 = vld [vmem:[%s5523_s0 + $0x10] ss:$8 sps:$4 sm:$0xff]   ;;  %v3604_v42 = vld [vmem:[%s5523_s0 + $0x24] ss:$8 sps:$4 sm:$0xff]  }
   0x6   :  { %68 = vst [vmem:[#allocation2 + $0x168] sm:$0xff] %v3887_v0  ;;  %69 = vst [vmem:[#allocation2 + $0x170] sm:$0xff] %v3887_v0  ;;  %v3606_v43 = vld [vmem:[%s5523_s0 + $0x20] ss:$8 sps:$4 sm:$0xff]   ;;  %s4153_s0 = smov 0  }
   0x7   :  { %70 = vst [vmem:[#allocation2 + $0x178] sm:$0xff] %v3887_v0  ;;  %71 = vst [vmem:[#allocation2 + $0x180] sm:$0xff] %v3887_v0 }
   0x8   :  { %72 = vst.msk [vmem:[#allocation2 + $0x188] sm:$0xff] %vm61_vm0, %v3887_v0  ;;  %73 = vst [vmem:[#allocation2 + $0x190] sm:$0xff] %v3887_v0 }
   0x9   :  { %74 = vst [vmem:[#allocation2 + $0x198] sm:$0xff] %v3887_v0  ;;  %75 = vst [vmem:[#allocation2 + $0x1a0] sm:$0xff] %v3887_v0  ;;  %v3545_v1 = vld [vmem:[%s5558_s26 + $0x4] ss:$8 sps:$4 sm:$0xff]   ;;  %v3547_v2 = vld [vmem:[%s5558_s26] ss:$8 sps:$4 sm:$0xff]  }
   0xa   :  { %76 = vst [vmem:[#allocation2 + $0x1a8] sm:$0xff] %v3887_v0  ;;  %77 = vst.msk [vmem:[#allocation2 + $0x1b0] sm:$0xff] %vm61_vm0, %v3887_v0  ;;  %326 = vmatprep.subr.bf16.mxu0 %v3545_v1  ;;  %v3548_v3 = vld [vmem:[%s5558_s26 + $0x14] ss:$8 sps:$4 sm:$0xff]   ;;  %3316 = vmatprep.subr.bf16.mxu1 %v3545_v1  ;;  %v3550_v4 = vld [vmem:[%s5558_s26 + $0x10] ss:$8 sps:$4 sm:$0xff]  }
   0xb   :  { %327 = vmatpush1.bf16.msra.mxu0 %v3547_v2  ;;  %3332 = vmatpush1.bf16.msra.mxu1 %v3547_v2  ;;  %v3551_v5 = vld [vmem:[%s5558_s26 + $0x24] ss:$8 sps:$4 sm:$0xff]   ;;  %v3553_v6 = vld [vmem:[%s5558_s26 + $0x20] ss:$8 sps:$4 sm:$0xff]   ;;  %v3554_v7 = vld [vmem:[%s5558_s26 + $0x34] ss:$8 sps:$4 sm:$0xff]  }
   0xc   :  { %328 = vmatprep.subr.bf16.mxu0 %v3548_v3  ;;  %3317 = vmatprep.subr.bf16.mxu1 %v3548_v3  ;;  %v3556_v8 = vld [vmem:[%s5558_s26 + $0x30] ss:$8 sps:$4 sm:$0xff]   ;;  %v3557_v9 = vld [vmem:[%s5558_s26 + $0x44] ss:$8 sps:$4 sm:$0xff]   ;;  %v3559_v10 = vld [vmem:[%s5558_s26 + $0x40] ss:$8 sps:$4 sm:$0xff]  }
   0xd   :  { %v3560_v11 = vld [vmem:[%s5558_s26 + $0x54] ss:$8 sps:$4 sm:$0xff]   ;;  %v3562_v12 = vld [vmem:[%s5558_s26 + $0x50] ss:$8 sps:$4 sm:$0xff]   ;;  %v3563_v13 = vld [vmem:[%s5558_s26 + $0x64] ss:$8 sps:$4 sm:$0xff]  }
   0xe   :  { %v3565_v15 = vld [vmem:[%s5558_s26 + $0x60] ss:$8 sps:$4 sm:$0xff]   ;;  %v3566_v17 = vld [vmem:[%s5558_s26 + $0x74] ss:$8 sps:$4 sm:$0xff]   ;;  %v3568_v18 = vld [vmem:[%s5558_s26 + $0x70] ss:$8 sps:$4 sm:$0xff]  }
   0xf   :  { %329 = vmatpush1.bf16.msra.mxu0 %v3550_v4  ;;  %3333 = vmatpush1.bf16.msra.mxu1 %v3550_v4  ;;  %v3569_v19 = vld [vmem:[%s5558_s26 + $0x84] ss:$8 sps:$4 sm:$0xff]   ;;  %v3571_v20 = vld [vmem:[%s5558_s26 + $0x80] ss:$8 sps:$4 sm:$0xff]   ;;  %v3572_v21 = vld [vmem:[%s5558_s26 + $0x94] ss:$8 sps:$4 sm:$0xff]  }
  0x10   :  { %330 = vmatprep.subr.bf16.mxu0 %v3551_v5  ;;  %3318 = vmatprep.subr.bf16.mxu1 %v3551_v5  ;;  %v3574_v22 = vld [vmem:[%s5558_s26 + $0x90] ss:$8 sps:$4 sm:$0xff]   ;;  %v3575_v23 = vld [vmem:[%s5558_s26 + $0xa4] ss:$8 sps:$4 sm:$0xff]   ;;  %v3577_v24 = vld [vmem:[%s5558_s26 + $0xa0] ss:$8 sps:$4 sm:$0xff]  }
  0x11   :  { %v3578_v25 = vld [vmem:[%s5558_s26 + $0xb4] ss:$8 sps:$4 sm:$0xff]   ;;  %v3580_v26 = vld [vmem:[%s5558_s26 + $0xb0] ss:$8 sps:$4 sm:$0xff]   ;;  %v3581_v27 = vld [vmem:[%s5558_s26 + $0xc4] ss:$8 sps:$4 sm:$0xff]  }
  0x12   :  { %v3583_v28 = vld [vmem:[%s5558_s26 + $0xc0] ss:$8 sps:$4 sm:$0xff]   ;;  %v3584_v29 = vld [vmem:[%s5558_s26 + $0xd4] ss:$8 sps:$4 sm:$0xff]   ;;  %v3586_v30 = vld [vmem:[%s5558_s26 + $0xd0] ss:$8 sps:$4 sm:$0xff]  }
  0x13   :  { %331 = vmatpush1.bf16.msra.mxu0 %v3553_v6  ;;  %3334 = vmatpush1.bf16.msra.mxu1 %v3553_v6  ;;  %v3587_v31 = vld [vmem:[%s5558_s26 + $0xe4] ss:$8 sps:$4 sm:$0xff]   ;;  %v3589_v32 = vld [vmem:[%s5558_s26 + $0xe0] ss:$8 sps:$4 sm:$0xff]   ;;  %v3590_v33 = vld [vmem:[%s5558_s26 + $0xf4] ss:$8 sps:$4 sm:$0xff]  }
  0x14   :  { %332 = vmatprep.subr.bf16.mxu0 %v3554_v7  ;;  %3319 = vmatprep.subr.bf16.mxu1 %v3554_v7  ;;  %v3592_v34 = vld [vmem:[%s5558_s26 + $0xf0] ss:$8 sps:$4 sm:$0xff]  }
  0x17   :  { %333 = vmatpush1.bf16.msra.mxu0 %v3556_v8  ;;  %3335 = vmatpush1.bf16.msra.mxu1 %v3556_v8 }
  0x18   :  { %334 = vmatprep.subr.bf16.mxu0 %v3557_v9  ;;  %3320 = vmatprep.subr.bf16.mxu1 %v3557_v9 }
  0x1b   :  { %335 = vmatpush1.bf16.msra.mxu0 %v3559_v10  ;;  %3336 = vmatpush1.bf16.msra.mxu1 %v3559_v10 }
  0x1c   :  { %336 = vmatprep.subr.bf16.mxu0 %v3560_v11  ;;  %3321 = vmatprep.subr.bf16.mxu1 %v3560_v11 }
  0x1f   :  { %337 = vmatpush1.bf16.msra.mxu0 %v3562_v12  ;;  %3337 = vmatpush1.bf16.msra.mxu1 %v3562_v12 }
  0x20   :  { %338 = vmatprep.subr.bf16.mxu0 %v3563_v13  ;;  %3322 = vmatprep.subr.bf16.mxu1 %v3563_v13 }
  0x23   :  { %339 = vmatpush1.bf16.msra.mxu0 %v3565_v15  ;;  %3338 = vmatpush1.bf16.msra.mxu1 %v3565_v15 }
  0x24   :  { %340 = vmatprep.subr.bf16.mxu0 %v3566_v17  ;;  %3323 = vmatprep.subr.bf16.mxu1 %v3566_v17 }
  0x27   :  { %341 = vmatpush1.bf16.msra.mxu0 %v3568_v18  ;;  %3339 = vmatpush1.bf16.msra.mxu1 %v3568_v18 }
  0x28   :  { %342 = vmatprep.subr.bf16.mxu0 %v3569_v19  ;;  %3324 = vmatprep.subr.bf16.mxu1 %v3569_v19 }
  0x2b   :  { %343 = vmatpush1.bf16.msra.mxu0 %v3571_v20  ;;  %3340 = vmatpush1.bf16.msra.mxu1 %v3571_v20 }
  0x2c   :  { %344 = vmatprep.subr.bf16.mxu0 %v3572_v21  ;;  %3325 = vmatprep.subr.bf16.mxu1 %v3572_v21 }
  0x2f   :  { %345 = vmatpush1.bf16.msra.mxu0 %v3574_v22  ;;  %3341 = vmatpush1.bf16.msra.mxu1 %v3574_v22 }
  0x30   :  { %346 = vmatprep.subr.bf16.mxu0 %v3575_v23  ;;  %3326 = vmatprep.subr.bf16.mxu1 %v3575_v23 }
  0x33   :  { %347 = vmatpush1.bf16.msra.mxu0 %v3577_v24  ;;  %3342 = vmatpush1.bf16.msra.mxu1 %v3577_v24 }
  0x34   :  { %348 = vmatprep.subr.bf16.mxu0 %v3578_v25  ;;  %3327 = vmatprep.subr.bf16.mxu1 %v3578_v25 }
  0x37   :  { %349 = vmatpush1.bf16.msra.mxu0 %v3580_v26  ;;  %3343 = vmatpush1.bf16.msra.mxu1 %v3580_v26 }
  0x38   :  { %350 = vmatprep.subr.bf16.mxu0 %v3581_v27  ;;  %3328 = vmatprep.subr.bf16.mxu1 %v3581_v27 }
  0x3b   :  { %351 = vmatpush1.bf16.msra.mxu0 %v3583_v28  ;;  %3344 = vmatpush1.bf16.msra.mxu1 %v3583_v28 }
  0x3c   :  { %352 = vmatprep.subr.bf16.mxu0 %v3584_v29  ;;  %3329 = vmatprep.subr.bf16.mxu1 %v3584_v29 }
  0x3f   :  { %353 = vmatpush1.bf16.msra.mxu0 %v3586_v30  ;;  %3345 = vmatpush1.bf16.msra.mxu1 %v3586_v30 }
  0x40   :  { %354 = vmatprep.subr.bf16.mxu0 %v3587_v31  ;;  %3330 = vmatprep.subr.bf16.mxu1 %v3587_v31 }
  0x43   :  { %355 = vmatpush1.bf16.msra.mxu0 %v3589_v32  ;;  %3346 = vmatpush1.bf16.msra.mxu1 %v3589_v32 }
  0x44   :  { %356 = vmatprep.subr.bf16.mxu0 %v3590_v33  ;;  %3331 = vmatprep.subr.bf16.mxu1 %v3590_v33 }
  0x47   :  { %357 = vmatpush1.bf16.msra.mxu0 %v3592_v34  ;;  %3347 = vmatpush1.bf16.msra.mxu1 %v3592_v34 }
  0x4a   :  { %359 = vmatmul.mubr.bf16.vlgmr.msra.gmra.mrb[0].mxu0 %v3593_v36  ;;  %389 = vmatmul.mubr.bf16.vlgmr.msra.gmra.mrb[0].mxu1 %v3596_v37 }
  0x4b   :  { %368 = vmatprep.mubr.bf16.mxu0 %v3599_v38  ;;  %398 = vmatprep.mubr.bf16.mxu1 %v2961_v39 }
  0x52   :  { %369 = vmatmul.mubr.bf16.gmra.mrb[4].mxu0 %v3601_v40  ;;  %399 = vmatmul.mubr.bf16.gmra.mrb[4].mxu1 %v2960_v41 }
  0x53   :  { %378 = vmatprep.mubr.bf16.mxu0 %v3604_v42 }
  0x5a   :  { %379 = vmatmul.mubr.bf16.gmra.mrb[8].mxu0 %v3606_v43 }
 0x11d   :  { %v360_v44 = vpop.f32.mrb[0].mxu0   ;;  %v390_v45 = vpop.f32.mrb[0].mxu1  }
 0x11e   :  { %v362_v46 = vpop.f32.mrb[1].mxu0   ;;  %v392_v47 = vpop.f32.mrb[1].mxu1  }
 0x11f   :  { %v364_v48 = vpop.f32.mrb[2].mxu0   ;;  %v394_v49 = vpop.f32.mrb[2].mxu1  }
 0x120   :  { %v366_v50 = vpop.f32.mrb[3].mxu0   ;;  %v396_v51 = vpop.f32.mrb[3].mxu1  }
 0x125   :  { %v370_v52 = vpop.f32.mrb[4].mxu0   ;;  %v400_v53 = vpop.f32.mrb[4].mxu1  }
 0x126   :  { %v372_v54 = vpop.f32.mrb[5].mxu0   ;;  %v402_v55 = vpop.f32.mrb[5].mxu1  }
 0x127   :  { %v374_v56 = vpop.f32.mrb[6].mxu0   ;;  %v404_v57 = vpop.f32.mrb[6].mxu1 }
 0x128   :  { %v376_v58 = vpop.f32.mrb[7].mxu0   ;;  %v405_v59 = vpop.f32.mrb[7].mxu1 }
 0x12d   :  { %v380_v60 = vpop.f32.mrb[8].mxu0  }
 0x12e   :  { %v382_v61 = vpop.f32.mrb[9].mxu0  }
 0x12f   :  { %v384_v62 = vpop.f32.mrb[10].mxu0  }
 0x130   :  { %v386_v63 = vpop.f32.mrb[11].mxu0  }
 0x131 LB: > { %5559 = vst [vmem:[#allocation3_spill] sm:$0xff] %v3813_v55  ;;  %5560 = vst [vmem:[#allocation4_spill] sm:$0xff] %v3817_v53  ;;  %s5577_s23 = sld [smem:[#allocation29_spill]]  ;;  %v5531_v1 = vmov 1   ;;  %v3889_v2 = vmov 3   ;;  %s3092_s24 = sshll.u32 %s3885_s0, 7  ;;  %v435_v10 = vlaneseq  ;;  %s3885_s0 = sphi %s4153_s0, %s412_s0   ;;  %v3881_v44 = vphi %v360_v44, %v5652_v44   ;;  %v3877_v46 = vphi %v362_v46, %v5651_v46   ;;  %v3873_v48 = vphi %v364_v48, %v5650_v48   ;;  %v3869_v50 = vphi %v366_v50, %v5649_v50   ;;  %v3865_v52 = vphi %v370_v52, %v5648_v52   ;;  %v3861_v54 = vphi %v372_v54, %v5647_v54   ;;  %v3857_v56 = vphi %v374_v56, %v5646_v56   ;;  %v3853_v58 = vphi %v376_v58, %v5645_v58   ;;  %v3849_v60 = vphi %v380_v60, %v5644_v60   ;;  %v3845_v61 = vphi %v382_v61, %v5643_v61   ;;  %v3841_v62 = vphi %v384_v62, %v5642_v62   ;;  %v3837_v63 = vphi %v386_v63, %v5641_v63   ;;  %v3833_v45 = vphi %v390_v45, %v5640_v45   ;;  %v3829_v47 = vphi %v392_v47, %v5639_v47   ;;  %v3825_v49 = vphi %v394_v49, %v5638_v49   ;;  %v3821_v51 = vphi %v396_v51, %v5637_v51   ;;  %v3817_v53 = vphi %v400_v53, %v5636_v53   ;;  %v3813_v55 = vphi %v402_v55, %v5635_v55  }
 0x132   : > { %5561 = vst [vmem:[#allocation5_spill] sm:$0xff] %v3821_v51  ;;  %5562 = vst [vmem:[#allocation6_spill] sm:$0xff] %v3825_v49  ;;  %3608 = vset.pattern.permute.xlu1 %v5531_v1  ;;  %3607 = vset.pattern.permute.xlu0 %v3889_v2  ;;  %s4230_s1 = scalar_lea.vmem %s5510_s5, %s3092_s24  ;;  %s2994_s21 = sshll.u32 %s3885_s0, 1  ;;  %vm952_vm1 = vcmask 1040384   ;;  %vm868_vm2 = vcmask 523266   ;;  %vm840_vm3 = vcmask 1041408  }
 0x133   : > { %5563 = vst [vmem:[#allocation7_spill] sm:$0xff] %v3829_v47  ;;  %5564 = vst [vmem:[#allocation8_spill] sm:$0xff] %v3833_v45  ;;  %v3654_v4 = vld [vmem:[%s4230_s1 + $0x40] sm:$0xff]   ;;  %v3656_v7 = vld [vmem:[%s4230_s1 + $0x48] sm:$0xff]   ;;  %v436_v15 = vshrl.u32 %v435_v10, 7  ;;  %s3093_s25 = smul.u32 288, %s3885_s0  ;;  %s432_s30 = scalar_lea.vmem %s5508_s3, %s2994_s21 }
 0x134   : > { %5565 = vst [vmem:[#allocation9_spill] sm:$0xff] %v3837_v63  ;;  %5566 = vst [vmem:[#allocation10_spill] sm:$0xff] %v3841_v62  ;;  %v3655_v5 = vld [vmem:[%s4230_s1] sm:$0xff]   ;;  %3095 = vmatprep.subr.bf16.mxu0 %v3654_v4  ;;  %v3657_v8 = vld [vmem:[%s4230_s1 + $0x8] sm:$0xff]   ;;  %s463_s2 = scalar_lea.vmem %s5509_s4, %s2994_s21  ;;  %s725_s26 = scalar_lea.vmem %s5511_s6, %s3885_s0  ;;  %vm1358_vm4 = vcmask 1046528   ;;  %vm1691_vm5 = vcmask 1045504  }
 0x135   : > { %5567 = vst [vmem:[#allocation11_spill] sm:$0xff] %v3845_v61  ;;  %5568 = vst [vmem:[#allocation12_spill] sm:$0xff] %v3849_v60  ;;  %3096 = vmatpush3.bf16.msra.mxu0 %v3655_v5  ;;  %v3658_v9 = vld [vmem:[%s4230_s1 + $0x50] sm:$0xff]   ;;  %v3660_v13 = vld [vmem:[%s4230_s1 + $0x58] sm:$0xff]   ;;  %v4279_v20 = vsub.s32 0, %v436_v15  ;;  %v4281_v21 = vsub.s32 1, %v436_v15  ;;  %s4291_s24 = scalar_lea.vmem %s5513_s8, %s3093_s25  ;;  %s742_s19 = scalar_lea.vmem %s5512_s7, %s3885_s0 }
 0x136   : > { %5569 = vst [vmem:[#allocation13_spill] sm:$0xff] %v3853_v58  ;;  %5570 = vst [vmem:[#allocation14_spill] sm:$0xff] %v3857_v56  ;;  %3097 = vmatprep.subr.bf16.mxu0 %v3656_v7  ;;  %v3659_v12 = vld [vmem:[%s4230_s1 + $0x10] sm:$0xff]   ;;  %v3661_v17 = vld [vmem:[%s4230_s1 + $0x18] sm:$0xff]   ;;  %vm1000_vm6 = vcmask 1048065   ;;  %vm1002_vm7 = vcmask 1048064   ;;  %s2323_s18 = scalar_lea.vmem %s5514_s9, %s3885_s0  ;;  %s2340_s22 = scalar_lea.vmem %s5515_s10, %s3885_s0 }
 0x137   : > { %5571 = vst [vmem:[#allocation15_spill] sm:$0xff] %v3861_v54  ;;  %5572 = vst [vmem:[#allocation16_spill] sm:$0xff] %v3865_v52  ;;  %v4215_v0 = vld [vmem:[%s5577_s23] sm:$0xff]  ;;  %v4225_v3 = vld [vmem:[%s5577_s23 + $0x10] sm:$0xff]  ;;  %vm1416_vm8 = vcmask 1047040   ;;  %vm3899_vm9 = vmmov 0  }
 0x138   : > { %5573 = vst [vmem:[#allocation17_spill] sm:$0xff] %v3869_v50  ;;  %5574 = vst [vmem:[#allocation18_spill] sm:$0xff] %v3873_v48  ;;  %891 = vperm.xlu1 %3608, %v4215_v0   ;;  %1096 = vperm.xlu0 %3607, %v4215_v0   ;;  %v4237_v6 = vld [vmem:[%s5577_s23 + $0x8] sm:$0xff]  ;;  %v4248_v11 = vld [vmem:[%s5577_s23 + $0x18] sm:$0xff]  ;;  %vm1729_vm10 = vcmask 521216  }
 0x139   : > { %5575 = vst [vmem:[#allocation19_spill] sm:$0xff] %v3877_v46  ;;  %5576 = vst [vmem:[#allocation20_spill] sm:$0xff] %v3881_v44  ;;  %3098 = vmatpush3.bf16.msra.mxu0 %v3657_v8  ;;  %v4257_v14 = vld [vmem:[%s5577_s23 + $0x20] sm:$0xff]  ;;  %v4264_v16 = vld [vmem:[%s5577_s23 + $0x30] sm:$0xff] }
 0x13a   : > { %3099 = vmatprep.subr.bf16.mxu0 %v3658_v9  ;;  %v4272_v18 = vld [vmem:[%s5577_s23 + $0x28] sm:$0xff]  ;;  %v3662_v19 = vld [vmem:[%s4230_s1 + $0x60] sm:$0xff]   ;;  %5578 = vst [vmem:[#allocation21_spill] sm:$0xff] %v4279_v20  ;;  %5579 = vst [vmem:[#allocation22_spill] sm:$0xff] %v4281_v21 }
 0x13b   : > { %v3663_v22 = vld [vmem:[%s4230_s1 + $0x20] sm:$0xff]   ;;  %v3664_v23 = vld [vmem:[%s4230_s1 + $0x68] sm:$0xff]   ;;  %v3666_v31 = vld [vmem:[%s4230_s1 + $0x70] sm:$0xff]  }
 0x13c   : > { %3609 = vset.pattern.permute.xlu1 %v3889_v2  ;;  %1101 = vperm.xlu0 %3607, %v4237_v6   ;;  %v433_v24 = vld [vmem:[%s432_s30] sm:$0x3]  ;;  %v3665_v26 = vld [vmem:[%s4230_s1 + $0x28] sm:$0xff]   ;;  %v4331_v42 = vld [vmem:[%s5577_s23 + $0x38] sm:$0xff] }
 0x13d   : > { %1106 = vperm.xlu1 %3609, %v4225_v3   ;;  %3100 = vmatpush3.bf16.msra.mxu0 %v3659_v12  ;;  %v464_v25 = vld [vmem:[%s463_s2] sm:$0x3]  ;;  %v4297_v27 = vrot.slane %v433_v24, %v4279_v20  ;;  %v4300_v28 = vrot.slane %v433_v24, %v4281_v21  ;;  %v3667_v59 = vld [vmem:[%s4230_s1 + $0x30] sm:$0xff]   ;;  %v3668_v4 = vld [vmem:[%s4230_s1 + $0x78] sm:$0xff]   ;;  %s3897_s2 = smov 64  }
 0x13e   : > { %3101 = vmatprep.subr.bf16.mxu0 %v3660_v13  ;;  %v4303_v29 = vrot.slane %v464_v25, %v4279_v20  ;;  %v4306_v30 = vrot.slane %v464_v25, %v4281_v21  ;;  %v3669_v13 = vld [vmem:[%s4230_s1 + $0x38] sm:$0xff]   ;;  %v3671_v21 = vld [vmem:[%s4291_s24] sm:$0xff]   ;;  %v3672_v20 = vld [vmem:[%s4291_s24 + $0x48] sm:$0xff]  }
 0x13f   : > { %v446_v32 = vmul.f32 %v3877_v46, %v4300_v28  ;;  %v448_v33 = vmul.f32 %v3869_v50, %v4300_v28  ;;  %v445_v34 = vmul.f32 %v3881_v44, %v4297_v27  ;;  %v447_v35 = vmul.f32 %v3873_v48, %v4297_v27  ;;  %v3682_v44 = vld [vmem:[%s4291_s24 + $0x70] sm:$0xff]  }
 0x140   : > { %1111 = vperm.xlu0 %3607, %v4248_v11   ;;  %v450_v36 = vmul.f32 %v3861_v54, %v4300_v28  ;;  %v452_v37 = vmul.f32 %v3853_v58, %v4300_v28  ;;  %v453_v24 = vmul.f32 %v3849_v60, %v4297_v27  ;;  %v455_v25 = vmul.f32 %v3841_v62, %v4297_v27  ;;  %v3676_v62 = vld [vmem:[%s4291_s24 + $0x58] sm:$0xff]   ;;  %v4584_v54 = vld [vmem:[%s742_s19] ss:$0 sm:$0xff] }
 0x141   : > { %3610 = vset.pattern.permute.xlu1 %v5531_v1  ;;  %3102 = vmatpush3.bf16.msra.mxu0 %v3661_v17  ;;  %v477_v38 = vadd.f32 %v4306_v30, %v446_v32  ;;  %v479_v39 = vadd.f32 %v4306_v30, %v448_v33  ;;  %v476_v40 = vadd.f32 %v4303_v29, %v445_v34 }
 0x142   : > { %896 = vperm.xlu1 %3610, %v4237_v6   ;;  %3103 = vmatprep.subr.bf16.mxu0 %v3662_v19  ;;  %v478_v41 = vadd.f32 %v4303_v29, %v447_v35  ;;  %v481_v43 = vadd.f32 %v4306_v30, %v450_v36  ;;  %v483_v57 = vadd.f32 %v4306_v30, %v452_v37 }
 0x143   : > { %v495_v5 = vmax.f32 %v477_v38, 0.0  ;;  %v497_v7 = vmax.f32 %v479_v39, 0.0  ;;  %v494_v8 = vmax.f32 %v476_v40, 0.0  ;;  %v449_v17 = vmul.f32 %v3865_v52, %v4297_v27  ;;  %v4369_v40 = vld [vmem:[%s5577_s23 + $0x40] sm:$0xff] }
 0x144   : > { %1126 = vperm.xlu0 %3607, %v4264_v16   ;;  %v496_v9 = vmax.f32 %v478_v41, 0.0  ;;  %v499_v10 = vmax.f32 %v481_v43, 0.0  ;;  %v501_v12 = vmax.f32 %v483_v57, 0.0  ;;  %v451_v19 = vmul.f32 %v3857_v56, %v4297_v27  ;;  %v3680_v56 = vld [vmem:[%s4291_s24 + $0x68] sm:$0xff]  }
 0x145   : > { %3104 = vmatpush3.bf16.msra.mxu0 %v3663_v22  ;;  %v513_v15 = vpack.c.bf16 %v497_v7, %v495_v5  ;;  %v454_v22 = vmul.f32 %v3845_v61, %v4300_v28  ;;  %v480_v32 = vadd.f32 %v4303_v29, %v449_v17  ;;  %v484_v38 = vadd.f32 %v4303_v29, %v453_v24  ;;  %v3679_v61 = vld [vmem:[%s4291_s24 + $0x20] sm:$0xff]  }
 0x146   : > { %3611 = vset.pattern.permute.xlu1 %v3889_v2  ;;  %3105 = vmatprep.subr.bf16.mxu0 %v3664_v23  ;;  %v456_v23 = vmul.f32 %v3837_v63, %v4300_v28  ;;  %v482_v33 = vadd.f32 %v4303_v29, %v451_v19  ;;  %v512_v34 = vpack.c.bf16 %v496_v9, %v494_v8 }
 0x147   : > { %1116 = vperm.xlu1 %3611, %v4257_v14   ;;  %685 = vmatprep.mubr.bf16.mxu0 %v513_v15  ;;  %v485_v35 = vadd.f32 %v4306_v30, %v454_v22  ;;  %v515_v37 = vpack.c.bf16 %v501_v12, %v499_v10  ;;  %v486_v39 = vadd.f32 %v4303_v29, %v455_v25  ;;  %v498_v57 = vmax.f32 %v480_v32, 0.0 }
 0x148   : > { %3613 = vset.pattern.permute.xlu0 %v5531_v1  ;;  %v487_v36 = vadd.f32 %v4306_v30, %v456_v23  ;;  %v502_v7 = vmax.f32 %v484_v38, 0.0  ;;  %v5530_v12 = vmov 7   ;;  %v457_v17 = vmul.f32 %v3833_v45, %v4297_v27 }
 0x149   : > { %3106 = vmatpush3.bf16.msra.mxu0 %v3665_v26  ;;  %901 = vperm.xlu0 %3613, %v4225_v3   ;;  %v458_v26 = vmul.f32 %v3829_v47, %v4300_v28  ;;  %v504_v8 = vmax.f32 %v486_v39, 0.0  ;;  %v462_v19 = vmul.f32 %v3813_v55, %v4300_v28  ;;  %v3894_v39 = vmov 4   ;;  %v3675_v47 = vld [vmem:[%s4291_s24 + $0x10] sm:$0xff]  }
 0x14a   : > { %3107 = vmatprep.subr.bf16.mxu0 %v3666_v31  ;;  %v460_v31 = vmul.f32 %v3821_v51, %v4300_v28  ;;  %v505_v5 = vmax.f32 %v487_v36, 0.0  ;;  %v488_v23 = vadd.f32 %v4303_v29, %v457_v17  ;;  %v461_v28 = vmul.f32 %v3817_v53, %v4297_v27  ;;  %v3673_v53 = vld [vmem:[%s4291_s24 + $0x8] sm:$0xff]  }
 0x14b   : > { %1121 = vperm.xlu1 %3611, %v4272_v18   ;;  %v489_v41 = vadd.f32 %v4306_v30, %v458_v26  ;;  %v516_v22 = vpack.c.bf16 %v504_v8, %v502_v7  ;;  %v493_v26 = vadd.f32 %v4306_v30, %v462_v19 }
 0x14c   : > { %v491_v43 = vadd.f32 %v4306_v30, %v460_v31  ;;  %v506_v31 = vmax.f32 %v488_v23, 0.0  ;;  %v492_v36 = vadd.f32 %v4303_v29, %v461_v28 }
 0x14d   : > { %3108 = vmatpush3.bf16.msra.mxu0 %v3667_v59  ;;  %906 = vperm.xlu0 %3613, %v4248_v11   ;;  %v500_v59 = vmax.f32 %v482_v33, 0.0  ;;  %v507_v9 = vmax.f32 %v489_v41, 0.0  ;;  %v511_v33 = vmax.f32 %v493_v26, 0.0  ;;  %v5526_v41 = vmov 6  }
 0x14e   : > { %3109 = vmatprep.subr.bf16.mxu0 %v3668_v4  ;;  %v503_v4 = vmax.f32 %v485_v35, 0.0  ;;  %v509_v10 = vmax.f32 %v491_v43, 0.0  ;;  %v510_v30 = vmax.f32 %v492_v36, 0.0 }
 0x14f   : > { %3612 = vset.pattern.permute.xlu1 %v5531_v1 }
 0x150   : > { %911 = vperm.xlu1 %3612, %v4257_v14   ;;  %v517_v15 = vpack.c.bf16 %v505_v5, %v503_v4  ;;  %v519_v25 = vpack.c.bf16 %v509_v10, %v507_v9  ;;  %v520_v38 = vpack.c.bf16 %v510_v30, %v510_v30 }
 0x151   : > { %3110 = vmatpush3.bf16.msra.mxu0 %v3669_v13  ;;  %921 = vperm.xlu0 %3613, %v4264_v16   ;;  %v514_v13 = vpack.c.bf16 %v500_v59, %v498_v57 }
 0x154   : > { %3614 = vset.pattern.permute.xlu1 %v3889_v2  ;;  %686 = vmatmul.mubr.bf16.vlgmr.msra.gmra.mrb[0].mxu0 %v512_v34  ;;  %v3891_v34 = vmov 5  }
 0x155   : > { %1131 = vperm.xlu1 %3614, %v4331_v42   ;;  %693 = vmatprep.mubr.bf16.mxu0 %v515_v37  ;;  %v521_v37 = vpack.c.bf16 %v511_v33, %v511_v33 }
 0x156   : > { %3618 = vset.pattern.permute.xlu0 %v5530_v12 }
 0x157   : > { %1526 = vperm.xlu0 %3618, %v4272_v18  }
 0x159   : > { %3615 = vset.pattern.permute.xlu1 %v5531_v1 }
 0x15a   : > { %916 = vperm.xlu1 %3615, %v4272_v18  }
 0x15b   : > { %1541 = vperm.xlu0 %3618, %v4369_v40  }
 0x15c   : > { %694 = vmatmul.mubr.bf16.gmra.mrb[4].mxu0 %v514_v13 }
 0x15d   : > { %701 = vmatprep.mubr.bf16.mxu0 %v517_v15 }
 0x15e   : > { %3616 = vset.pattern.permute.xlu1 %v3889_v2  ;;  %v459_v2 = vmul.f32 %v3825_v49, %v4297_v27  ;;  %v5527_v27 = vmov 2   ;;  %v3674_v49 = vld [vmem:[%s4291_s24 + $0x50] sm:$0xff]  }
 0x15f   : > { %1136 = vperm.xlu1 %3616, %v4369_v40   ;;  %1516 = vperm.xlu0 %3618, %v4248_v11  }
 0x160   : > { %v490_v24 = vadd.f32 %v4303_v29, %v459_v2  ;;  %v5528_v29 = vmov 0  }
 0x162   : > { %v508_v32 = vmax.f32 %v490_v24, 0.0 }
 0x163   : > { %3617 = vset.pattern.permute.xlu1 %v5531_v1  ;;  %3622 = vset.pattern.permute.xlu0 %v3891_v34  ;;  %v3670_v1 = vld [vmem:[%s4291_s24 + $0x40] sm:$0xff]  }
 0x164   : > { %926 = vperm.xlu1 %3617, %v4331_v42   ;;  %702 = vmatmul.mubr.bf16.gmra.mrb[8].mxu0 %v516_v22  ;;  %v518_v35 = vpack.c.bf16 %v508_v32, %v506_v31 }
 0x165   : > { %709 = vmatprep.mubr.bf16.mxu0 %v519_v25  ;;  %1317 = vperm.xlu0 %3622, %v4257_v14  }
 0x166   : > { %3141 = vmatprep.subr.bf16.mxu1 %v3670_v1  ;;  %v3677_v1 = vld [vmem:[%s4291_s24 + $0x18] sm:$0xff]  }
 0x167   : > { %3142 = vmatpush3.bf16.msra.mxu1 %v3671_v21  ;;  %v3678_v21 = vld [vmem:[%s4291_s24 + $0x60] sm:$0xff]  }
 0x168   : > { %3619 = vset.pattern.permute.xlu1 %v5530_v12  ;;  %3143 = vmatprep.subr.bf16.mxu1 %v3672_v20 }
 0x169   : > { %1531 = vperm.xlu1 %3619, %v4264_v16   ;;  %1302 = vperm.xlu0 %3622, %v4237_v6  }
 0x16b   : > { %3144 = vmatpush3.bf16.msra.mxu1 %v3673_v53 }
 0x16c   : > { %710 = vmatmul.mubr.bf16.gmra.mrb[12].mxu0 %v518_v35  ;;  %3145 = vmatprep.subr.bf16.mxu1 %v3674_v49  ;;  %v4579_v49 = vld [vmem:[%s725_s26] ss:$0 sm:$0xff] }
 0x16d   : > { %1536 = vperm.xlu1 %3619, %v4331_v42   ;;  %717 = vmatprep.mubr.bf16.mxu0 %v521_v37 }
 0x16e   : > { %3628 = vset.pattern.permute.xlu0 %v5527_v27 }
 0x16f   : > { %1034 = vperm.xlu0 %3628, %v4225_v3   ;;  %3146 = vmatpush3.bf16.msra.mxu1 %v3675_v47 }
 0x170   : > { %3147 = vmatprep.subr.bf16.mxu1 %v3676_v62 }
 0x171   : > { %3620 = vset.pattern.permute.xlu1 %v3891_v34 }
 0x172   : > { %1322 = vperm.xlu1 %3620, %v4272_v18  }
 0x173   : > { %1044 = vperm.xlu0 %3628, %v4257_v14   ;;  %3148 = vmatpush3.bf16.msra.mxu1 %v3677_v1 }
 0x174   : > { %718 = vmatmul.mubr.bf16.gmra.mrb[16].mxu0 %v520_v38  ;;  %3149 = vmatprep.subr.bf16.mxu1 %v3678_v21  ;;  %v3681_v21 = vld [vmem:[%s4291_s24 + $0x28] sm:$0xff]  }
 0x176   : > { %1327 = vperm.xlu1 %3620, %v4264_v16  }
 0x177   : > { %1054 = vperm.xlu0 %3628, %v4264_v16   ;;  %3150 = vmatpush3.bf16.msra.mxu1 %v3679_v61 }
 0x178   : > { %3151 = vmatprep.subr.bf16.mxu1 %v3680_v56 }
 0x17a   : > { %1332 = vperm.xlu1 %3620, %v4331_v42  }
 0x17b   : > { %3634 = vset.pattern.permute.xlu0 %v5528_v29  ;;  %3152 = vmatpush3.bf16.msra.mxu1 %v3681_v21 }
 0x17c   : > { %779 = vperm.xlu0 %3634, %v4215_v0   ;;  %3153 = vmatprep.subr.bf16.mxu1 %v3682_v44 }
 0x17e   : > { %1337 = vperm.xlu1 %3620, %v4369_v40  }
 0x180   : > { %789 = vperm.xlu0 %3634, %v4225_v3  }
 0x182   : > { %3621 = vset.pattern.permute.xlu1 %v5530_v12 }
 0x183   : > { %1506 = vperm.xlu1 %3621, %v4237_v6  }
 0x184   : > { %794 = vperm.xlu0 %3634, %v4248_v11  }
 0x187   : > { %1511 = vperm.xlu1 %3621, %v4225_v3  }
 0x188   : > { %804 = vperm.xlu0 %3634, %v4272_v18  }
 0x18b   : > { %3623 = vset.pattern.permute.xlu1 %v5527_v27 }
 0x18c   : > { %1024 = vperm.xlu1 %3623, %v4215_v0   ;;  %814 = vperm.xlu0 %3634, %v4331_v42  }
 0x190   : > { %3624 = vset.pattern.permute.xlu1 %v3891_v34  ;;  %3638 = vset.pattern.permute.xlu0 %v3894_v39 }
 0x191   : > { %1297 = vperm.xlu1 %3624, %v4215_v0   ;;  %1255 = vperm.xlu0 %3638, %v4264_v16  }
 0x195   : > { %1307 = vperm.xlu1 %3624, %v4225_v3   ;;  %1230 = vperm.xlu0 %3638, %v4237_v6  }
 0x199   : > { %3625 = vset.pattern.permute.xlu1 %v5528_v29  ;;  %3642 = vset.pattern.permute.xlu0 %v5526_v41 }
 0x19a   : > { %784 = vperm.xlu1 %3625, %v4237_v6   ;;  %1459 = vperm.xlu0 %3642, %v4264_v16  }
 0x19e   : > { %3626 = vset.pattern.permute.xlu1 %v5530_v12  ;;  %1464 = vperm.xlu0 %3642, %v4331_v42  }
 0x19f   : > { %1521 = vperm.xlu1 %3626, %v4257_v14  }
 0x1a2   : > { %1434 = vperm.xlu0 %3642, %v4237_v6  }
 0x1a3   : > { %3627 = vset.pattern.permute.xlu1 %v5527_v27 }
 0x1a4   : > { %1029 = vperm.xlu1 %3627, %v4237_v6  }
 0x1a8   : > { %3629 = vset.pattern.permute.xlu1 %v3891_v34 }
 0x1a9   : > { %1312 = vperm.xlu1 %3629, %v4248_v11  }
 0x1ad   : > { %3630 = vset.pattern.permute.xlu1 %v5528_v29 }
 0x1ae   : > { %799 = vperm.xlu1 %3630, %v4257_v14  }
 0x1b2   : > { %3631 = vset.pattern.permute.xlu1 %v5527_v27 }
 0x1b3   : > { %1039 = vperm.xlu1 %3631, %v4248_v11  }
 0x1b7   : > { %3632 = vset.pattern.permute.xlu1 %v5528_v29  ;;  %v4439_v43 = vpop.permute.xlu1 %891  ;;  %v4442_v57 = vpop.permute.xlu0 %1096 }
 0x1b8   : > { %809 = vperm.xlu1 %3632, %v4264_v16  }
 0x1bb   : > { %v4448_v4 = vpop.permute.xlu0 %1101 }
 0x1bc   : > { %3633 = vset.pattern.permute.xlu1 %v5527_v27  ;;  %v4445_v59 = vpop.permute.xlu1 %1106 }
 0x1bd   : > { %1049 = vperm.xlu1 %3633, %v4272_v18  }
 0x1bf   : > { %v4453_v7 = vpop.permute.xlu0 %1111 }
 0x1c1   : > { %1059 = vperm.xlu1 %3633, %v4331_v42   ;;  %v4451_v5 = vpop.permute.xlu1 %896 }
 0x1c3   : > { %v4462_v9 = vpop.permute.xlu0 %1126 }
 0x1c5   : > { %3635 = vset.pattern.permute.xlu1 %v5526_v41 }
 0x1c6   : > { %1454 = vperm.xlu1 %3635, %v4272_v18   ;;  %v4457_v16 = vpop.permute.xlu1 %1116 }
 0x1c8   : > { %v4468_v13 = vpop.permute.xlu0 %901 }
 0x1ca   : > { %3636 = vset.pattern.permute.xlu1 %v3894_v39  ;;  %v4460_v8 = vpop.permute.xlu1 %1121 }
 0x1cb   : > { %1245 = vperm.xlu1 %3636, %v4257_v14  }
 0x1cc   : > { %v4474_v17 = vpop.permute.xlu0 %906 }
 0x1cf   : > { %1250 = vperm.xlu1 %3636, %v4272_v18   ;;  %v4466_v10 = vpop.permute.xlu1 %911 }
 0x1d0   : > { %v4480_v14 = vpop.permute.xlu0 %921 }
 0x1d3   : > { %3637 = vset.pattern.permute.xlu1 %v5526_v41 }
 0x1d4   : > { %1469 = vperm.xlu1 %3637, %v4369_v40   ;;  %v4472_v15 = vpop.permute.xlu1 %1131 }
 0x1d6   : > { %v4485_v19 = vpop.permute.xlu0 %1526 }
 0x1d8   : > { %3639 = vset.pattern.permute.xlu1 %v3894_v39 }
 0x1d9   : > { %1260 = vperm.xlu1 %3639, %v4331_v42   ;;  %v4478_v2 = vpop.permute.xlu1 %916 }
 0x1da   : > { %v4491_v23 = vpop.permute.xlu0 %1541 }
 0x1dd   : > { %1265 = vperm.xlu1 %3639, %v4369_v40   ;;  %v5532_v40 = vmov 8  }
 0x1de   : > { %v4483_v18 = vpop.permute.xlu1 %1136  ;;  %v4497_v24 = vpop.permute.xlu0 %1516 }
 0x1df   : > { %5580 = vst [vmem:[#allocation23_spill] sm:$0xff] %v4497_v24 }
 0x1e1   : > { %3640 = vset.pattern.permute.xlu1 %v5526_v41 }
 0x1e2   : > { %1439 = vperm.xlu1 %3640, %v4225_v3  }
 0x1e3   : > { %v4489_v22 = vpop.permute.xlu1 %926 }
 0x1e4   : > { %v4503_v26 = vpop.permute.xlu0 %1317 }
 0x1e6   : > { %3641 = vset.pattern.permute.xlu1 %v3894_v39 }
 0x1e7   : > { %1225 = vperm.xlu1 %3641, %v4215_v0  }
 0x1e8   : > { %v4495_v42 = vpop.permute.xlu1 %1531  ;;  %v4508_v32 = vpop.permute.xlu0 %1302 }
 0x1e9   : > { %5581 = vst [vmem:[#allocation24_spill] sm:$0xff] %v4508_v32 }
 0x1eb   : > { %3643 = vset.pattern.permute.xlu1 %v5532_v40 }
 0x1ec   : > { %1635 = vperm.xlu1 %3643, %v4237_v6   ;;  %v4501_v25 = vpop.permute.xlu1 %1536 }
 0x1ee   : > { %v4514_v28 = vpop.permute.xlu0 %1034 }
 0x1f0   : > { %1640 = vperm.xlu1 %3643, %v4225_v3  }
 0x1f1   : > { %v4506_v31 = vpop.permute.xlu1 %1322 }
 0x1f2   : > { %v4519_v6 = vpop.permute.xlu0 %1044 }
 0x1f4   : > { %3644 = vset.pattern.permute.xlu1 %v5526_v41 }
 0x1f5   : > { %1444 = vperm.xlu1 %3644, %v4248_v11   ;;  %v4512_v0 = vpop.permute.xlu1 %1327 }
 0x1f6   : > { %v4523_v34 = vpop.permute.xlu0 %1054 }
 0x1f9   : > { %v4516_v33 = vpop.permute.xlu1 %1332  ;;  %3646 = vset.pattern.permute.xlu1 %v3894_v39 }
 0x1fb   : > { %v4527_v11 = vpop.permute.xlu0 %779 }
 0x1fd   : > { %v4521_v3 = vpop.permute.xlu1 %1337 }
 0x1ff   : > { %v4531_v37 = vpop.permute.xlu0 %789 }
 0x202   : > { %v4525_v35 = vpop.permute.xlu1 %1506 }
 0x203   : > { %v4535_v38 = vpop.permute.xlu0 %794 }
 0x206   : > { %v4529_v36 = vpop.permute.xlu1 %1511 }
 0x207   : > { %v4539_v41 = vpop.permute.xlu0 %804 }
 0x20b   : > { %v4533_v30 = vpop.permute.xlu1 %1024  ;;  %v4545_v12 = vpop.permute.xlu0 %814 }
 0x210   : > { %v4537_v39 = vpop.permute.xlu1 %1297  ;;  %v4552_v55 = vpop.permute.xlu0 %1255 }
 0x211   : > { %5582 = vst [vmem:[#allocation25_spill] sm:$0xff] %v4537_v39 }
 0x214   : > { %v4541_v27 = vpop.permute.xlu1 %1307  ;;  %v4559_v45 = vpop.permute.xlu0 %1230 }
 0x215   : > { %5583 = vst [vmem:[#allocation26_spill] sm:$0xff] %v4541_v27 }
 0x219   : > { %v4543_v29 = vpop.permute.xlu1 %784  ;;  %v4565_v20 = vpop.permute.xlu0 %1459 }
 0x21d   : > { %v4581_v58 = vpop.permute.xlu0 %1464 }
 0x21e   : > { %v4548_v40 = vpop.permute.xlu1 %1521 }
 0x21f   : > { %5584 = vst [vmem:[#allocation27_spill] sm:$0xff] %v4548_v40 }
 0x223   : > { %v4555_v51 = vpop.permute.xlu1 %1029 }
 0x227   : > { %v3111_v60 = vpop.f32.mrb[0].mxu0 }
 0x228   : > { %v4561_v63 = vpop.permute.xlu1 %1312  ;;  %v3112_v47 = vpop.f32.mrb[1].mxu0 }
 0x229   : > { %5585 = vst [vmem:[#allocation28_spill] sm:$0xff] %v4561_v63  ;;  %v3113_v62 = vadd.f32 %v3112_v47, %v3111_v60  ;;  %v3114_v1 = vpop.f32.mrb[2].mxu0 }
 0x22a   : > { %v3115_v52 = vpop.f32.mrb[3].mxu0 }
 0x22b   : > { %v733_v48 = vmul.f32 %v3113_v62, %v4579_v49  ;;  %v3116_v46 = vadd.f32 %v3115_v52, %v3114_v1  ;;  %v1435_v62 = vpop.permute.xlu0 %1434  ;;  %v3683_v52 = vld [vmem:[%s4291_s24 + $0x30] sm:$0xff]  }
 0x22c   : > { %3154 = vmatpush3.bf16.msra.mxu1 %v3683_v52 }
 0x22d   : > { %v4571_v53 = vpop.permute.xlu1 %799  ;;  %v750_v61 = vadd.f32 %v4584_v54, %v733_v48  ;;  %v734_v60 = vmul.f32 %v3116_v46, %v4579_v49  ;;  %v3684_v46 = vld [vmem:[%s4291_s24 + $0x78] sm:$0xff]  }
 0x22e   : > { %3155 = vmatprep.subr.bf16.mxu1 %v3684_v46 }
 0x22f   : > { %v4593_v47 = vmax.f32 %v750_v61, 0.0  ;;  %v751_v63 = vadd.f32 %v4584_v54, %v734_v60  ;;  %v3117_v27 = vpop.f32.mrb[4].mxu0 }
 0x230   : > { %v3118_v24 = vpop.f32.mrb[5].mxu0 }
 0x231   : > { %v4599_v56 = vmax.f32 %v751_v63, 0.0  ;;  %v3119_v1 = vadd.f32 %v3118_v24, %v3117_v27  ;;  %v3120_v39 = vpop.f32.mrb[6].mxu0  ;;  %v1139_v48 = vmul.f32 %v4442_v57, %v4593_v47  ;;  %v934_v61 = vmul.f32 %v4439_v43, %v4593_v47 }
 0x232   : > { %v4586_v50 = vpop.permute.xlu1 %1039  ;;  %v3121_v21 = vpop.f32.mrb[7].mxu0  ;;  %v1067_v60 = vmul.f32 %v4533_v30, %v4593_v47  ;;  %v4610_v44 = vmul.f32 %v4527_v11, %v4593_v47  ;;  %v3685_v11 = vld [vmem:[%s4291_s24 + $0x38] sm:$0xff]  }
 0x233   : > { %v735_v63 = vmul.f32 %v3119_v1, %v4579_v49  ;;  %v1473_v27 = vmul.f32 %v1435_v62, %v4599_v56  ;;  %v3122_v24 = vadd.f32 %v3121_v21, %v3120_v39  ;;  %v1157_v57 = vrot.slane %v1139_v48, 7  ;;  %3156 = vmatpush3.bf16.msra.mxu1 %v3685_v11 }
 0x234   : > { %v1140_v43 = vmul.f32 %v4448_v4, %v4599_v56  ;;  %v935_v30 = vmul.f32 %v4451_v5, %v4599_v56  ;;  %1076 = vst.msk [vmem:[#allocation2 + $0x80] sm:$0xff] %vm61_vm0, %v1067_v60  ;;  %v841_v4 = vrot.slane %v4610_v44, 6  ;;  %v953_v46 = vrot.slane %v934_v61, 7 }
 0x235   : > { %v752_v52 = vadd.f32 %v4584_v54, %v735_v63  ;;  %1482 = vst.msk [vmem:[#allocation2 + $0x68] sm:$0xff] %vm61_vm0, %v1473_v27  ;;  %v736_v62 = vmul.f32 %v3122_v24, %v4579_v49  ;;  %1174 = vrot.lane.b32.xlu1 %v1157_v57, %s3897_s2  ;;  %v4635_v24 = vmul.f32 %v4543_v29, %v4599_v56 }
 0x236   : > { %v1158_v39 = vrot.slane %v1140_v43, 7  ;;  %v954_v21 = vrot.slane %v935_v30, 7  ;;  %869 = vst.msk [vmem:[#allocation2 + $0x78] sm:$0xfc] %vm868_vm2, %v841_v4  ;;  %v1068_v44 = vmul.f32 %v4555_v51, %v4599_v56  ;;  %v1269_v43 = vmul.f32 %v4559_v45, %v4599_v56 }
 0x237   : > { %v4596_v40 = vpop.permute.xlu1 %809  ;;  %v4627_v1 = vmax.f32 %v752_v52, 0.0  ;;  %v753_v5 = vadd.f32 %v4584_v54, %v736_v62  ;;  %v3123_v48 = vpop.f32.mrb[8].mxu0 }
 0x238   : > { %v1159_v60 = vsel %vm952_vm1, %v1157_v57, %v1158_v39  ;;  %v3124_v63 = vpop.f32.mrb[9].mxu0  ;;  %1077 = vst.msk [vmem:[#allocation2 + $0xa8] sm:$0xff] %vm61_vm0, %v1068_v44  ;;  %1278 = vst.msk [vmem:[#allocation2 + $0x88] sm:$0xff] %vm61_vm0, %v1269_v43 }
 0x239   : > { %v4641_v11 = vmax.f32 %v753_v5, 0.0  ;;  %1176 = vrot.lane.b32.xlu0 %v1159_v60, %s3897_s2  ;;  %v3125_v61 = vadd.f32 %v3124_v63, %v3123_v48  ;;  %970 = vrot.lane.b32.xlu1 %v953_v46, %s3897_s2  ;;  %v3126_v57 = vpop.f32.mrb[10].mxu0  ;;  %v1141_v30 = vmul.f32 %v4445_v59, %v4627_v1  ;;  %v936_v29 = vmul.f32 %v4468_v13, %v4627_v1 }
 0x23a   : > { %v3127_v52 = vpop.f32.mrb[11].mxu0  ;;  %v955_v48 = vsel %vm952_vm1, %v953_v46, %v954_v21  ;;  %v842_v60 = vrot.slane %v4635_v24, 6 }
 0x23b   : > { %v737_v45 = vmul.f32 %v3125_v61, %v4579_v49  ;;  %v3128_v51 = vadd.f32 %v3127_v52, %v3126_v57  ;;  %v1160_v62 = vrot.slane %v1141_v30, 7  ;;  %v4654_v5 = vmul.f32 %v4474_v17, %v4641_v11 }
 0x23c   : > { %v4614_v32 = vpop.permute.xlu1 %1049  ;;  %v956_v59 = vrot.slane %v936_v29, 7  ;;  %v1142_v13 = vmul.f32 %v4453_v7, %v4641_v11 }
 0x23d   : > { %v754_v63 = vadd.f32 %v4584_v54, %v737_v45  ;;  %v738_v44 = vmul.f32 %v3128_v51, %v4579_v49  ;;  %972 = vrot.lane.b32.xlu0 %v955_v48, %s3897_s2  ;;  %v1161_v61 = vsel %vm952_vm1, %v1158_v39, %v1160_v62  ;;  %v958_v17 = vrot.slane %v4654_v5, 7 }
 0x23e   : > { %1178 = vrot.lane.b32.xlu1 %v1161_v61, %s3897_s2  ;;  %v957_v52 = vsel %vm952_vm1, %v954_v21, %v956_v59  ;;  %v843_v45 = vsel %vm840_vm3, %v841_v4, %v842_v60  ;;  %v1162_v48 = vrot.slane %v1142_v13, 7 }
 0x23f   : > { %v4666_v46 = vmax.f32 %v754_v63, 0.0  ;;  %v755_v57 = vadd.f32 %v4584_v54, %v738_v44  ;;  %v3129_v7 = vpop.f32.mrb[12].mxu0  ;;  %v959_v30 = vsel %vm952_vm1, %v956_v59, %v958_v17  ;;  %870 = vst.msk [vmem:[#allocation2 + $0xa0] sm:$0xff] %vm61_vm0, %v843_v45 }
 0x240   : > { %v4631_v27 = vpop.permute.xlu1 %1059  ;;  %v3130_v29 = vpop.f32.mrb[13].mxu0 }
 0x241   : > { %v4674_v51 = vmax.f32 %v755_v57, 0.0  ;;  %976 = vrot.lane.b32.xlu0 %v959_v30, %s3897_s2  ;;  %v3131_v39 = vadd.f32 %v3130_v29, %v3129_v7  ;;  %v3132_v5 = vpop.f32.mrb[14].mxu0  ;;  %v1143_v63 = vmul.f32 %v4457_v16, %v4666_v46  ;;  %v938_v13 = vmul.f32 %v4466_v10, %v4666_v46 }
 0x242   : > { %974 = vrot.lane.b32.xlu1 %v957_v52, %s3897_s2  ;;  %v3133_v21 = vpop.f32.mrb[15].mxu0  ;;  %v1163_v29 = vsel %vm952_vm1, %v1160_v62, %v1162_v48 }
 0x243   : > { %v739_v4 = vmul.f32 %v3131_v39, %v4579_v49  ;;  %v3134_v57 = vadd.f32 %v3133_v21, %v3132_v5  ;;  %v1164_v30 = vrot.slane %v1143_v63, 7  ;;  %v939_v5 = vmul.f32 %v4478_v2, %v4674_v51 }
 0x244   : > { %v960_v21 = vrot.slane %v938_v13, 7  ;;  %v4701_v62 = vmul.f32 %v4460_v8, %v4674_v51 }
 0x245   : > { %v1455_v43 = vpop.permute.xlu1 %1454  ;;  %v756_v16 = vadd.f32 %v4584_v54, %v739_v4  ;;  %v740_v7 = vmul.f32 %v3134_v57, %v4579_v49 }
 0x246   : > { %v1477_v59 = vmul.f32 %v1455_v43, %v4674_v51  ;;  %1180 = vrot.lane.b32.xlu1 %v1163_v29, %s3897_s2 }
 0x247   : > { %v4692_v52 = vmax.f32 %v756_v16, 0.0  ;;  %v757_v45 = vadd.f32 %v4584_v54, %v740_v7  ;;  %v3135_v39 = vpop.f32.mrb[16].mxu0  ;;  %v962_v7 = vrot.slane %v939_v5, 7  ;;  %v4732_v5 = vld [vmem:[%s4291_s24 + $0x80] sm:$0xff]  }
 0x248   : > { %1486 = vst.msk [vmem:[#allocation2 + $0x108] sm:$0xff] %vm61_vm0, %v1477_v59  ;;  %v3136_v63 = vpop.f32.mrb[17].mxu0 }
 0x249   : > { %v4703_v59 = vmax.f32 %v757_v45, 0.0  ;;  %v3137_v4 = vadd.f32 %v3136_v63, %v3135_v39  ;;  %v4712_v2 = vmul.f32 %v4512_v0, %v4692_v52  ;;  %v3138_v57 = vpop.f32.mrb[18].mxu0  ;;  %v961_v0 = vsel %vm952_vm1, %v958_v17, %v960_v21 }
 0x24a   : > { %v1246_v44 = vpop.permute.xlu1 %1245  ;;  %v3139_v8 = vpop.f32.mrb[19].mxu0  ;;  %v1073_v24 = vmul.f32 %v4523_v34, %v4692_v52 }
 0x24b   : > { %v1272_v61 = vmul.f32 %v1246_v44, %v4666_v46  ;;  %v1165_v44 = vsel %vm952_vm1, %v1162_v48, %v1164_v30  ;;  %v3686_v48 = vld [vmem:[%s4291_s24 + $0xc0] sm:$0xff]   ;;  %v741_v13 = vmul.f32 %v3137_v4, %v4579_v49  ;;  %v1370_v49 = vrot.slane %v4712_v2, 1  ;;  %v4765_v8 = vld [vmem:[%s4291_s24 + $0xc8] sm:$0xff]  }
 0x24c   : > { %1182 = vrot.lane.b32.xlu1 %v1165_v44, %s3897_s2  ;;  %3348 = vmatprep.subr.bf16.mxu1 %v3686_v48  ;;  %v4729_v39 = vmul.f32 %v4472_v15, %v4703_v59  ;;  %v4748_v15 = vmul.f32 %v4462_v9, %v4692_v52  ;;  %1082 = vst.msk [vmem:[#allocation2 + $0x170] sm:$0xff] %vm61_vm0, %v1073_v24  ;;  %v4903_v2 = vld [vmem:[%s4291_s24 + $0xa0] sm:$0xff]   ;;  %v4944_v24 = vld [vmem:[%s4291_s24 + $0xf0] sm:$0xff]  }
 0x24d   : > { %1281 = vst.msk [vmem:[#allocation2 + $0x100] sm:$0xff] %vm61_vm0, %v1272_v61  ;;  %v4708_v61 = vmul.f32 %v4480_v14, %v4692_v52  ;;  %v1345_v14 = vmul.f32 %v4506_v31, %v4674_v51  ;;  %3187 = vmatprep.subr.bf16.mxu0 %v3686_v48  ;;  %v758_v45 = vadd.f32 %v4584_v54, %v741_v13 }
 0x24e   : > { %v1251_v43 = vpop.permute.xlu1 %1250  ;;  %v4738_v54 = vmul.f32 %v4503_v26, %v4666_v46  ;;  %v4742_v31 = vmul.f32 %v4501_v25, %v4703_v59  ;;  %3188 = vmatpush3.bf16.msra.mxu0 %v4732_v5  ;;  %v4756_v25 = vmul.f32 %v4495_v42, %v4692_v52  ;;  %v1170_v48 = vrot.slane %v4729_v39, 7 }
 0x24f   : > { %v1273_v10 = vmul.f32 %v1251_v43, %v4674_v51  ;;  %v964_v29 = vrot.slane %v4708_v61, 7  ;;  %v1166_v43 = vrot.slane %v4701_v62, 7  ;;  %v4744_v17 = vmax.f32 %v758_v45, 0.0  ;;  %3189 = vmatprep.subr.bf16.mxu0 %v4765_v8 }
 0x250   : > { %978 = vrot.lane.b32.xlu1 %v961_v0, %s3897_s2  ;;  %v1368_v63 = vrot.slane %v1345_v14, 1  ;;  %v963_v42 = vsel %vm952_vm1, %v960_v21, %v962_v7  ;;  %v1575_v13 = vrot.slane %v4742_v31, 1  ;;  %v4777_v14 = vld [vmem:[%s4291_s24 + $0x88] sm:$0xff]   ;;  %v1168_v0 = vrot.slane %v4748_v15, 7  ;;  %v4897_v15 = vld [vmem:[%s4291_s24 + $0xe0] sm:$0xff]  }
 0x251   : > { %1282 = vst.msk [vmem:[#allocation2 + $0x128] sm:$0xff] %vm61_vm0, %v1273_v10  ;;  %v965_v10 = vsel %vm952_vm1, %v962_v7, %v964_v29  ;;  %v1167_v26 = vsel %vm952_vm1, %v1164_v30, %v1166_v43  ;;  %v1366_v30 = vrot.slane %v4738_v54, 1  ;;  %v4784_v45 = vmul.f32 %v4485_v19, %v4674_v51  ;;  %v5589_v31 = vld [vmem:[#allocation23_spill] sm:$0xff]  ;;  %v888_v54 = vld [vmem:[%s5577_s23 + $0x40] sm:$0xff] }
 0x252   : > { %982 = vrot.lane.b32.xlu0 %v965_v10, %s3897_s2  ;;  %v1371_v9 = vsel %vm1358_vm4, %v1368_v63, %v1370_v49  ;;  %v825_v21 = vmul.f32 %v4535_v38, %v4641_v11  ;;  %v824_v7 = vmul.f32 %v4531_v37, %v4627_v1  ;;  %v1069_v19 = vmul.f32 %v4514_v28, %v4627_v1 }
 0x253   : > { %v1470_v16 = vpop.permute.xlu1 %1469  ;;  %v1070_v38 = vmul.f32 %v4586_v50, %v4641_v11  ;;  %3190 = vmatpush3.bf16.msra.mxu0 %v4777_v14  ;;  %v4894_v62 = vmul.f32 %v4489_v22, %v4703_v59  ;;  %v1552_v39 = vmul.f32 %v4491_v23, %v4744_v17  ;;  %v1348_v61 = vmul.f32 %v4521_v3, %v4744_v17  ;;  %v3718_v3 = vld [vmem:[%s5577_s23 + $0x18] sm:$0xff] }
 0x254   : > { %v1480_v4 = vmul.f32 %v1470_v16, %v4744_v17  ;;  %1184 = vrot.lane.b32.xlu1 %v1167_v26, %s3897_s2  ;;  %v4774_v16 = vmul.f32 %v4516_v33, %v4703_v59  ;;  %v4791_v33 = vld [vmem:[%s4291_s24 + $0xd0] sm:$0xff]   ;;  %v1573_v26 = vrot.slane %v4756_v25, 1  ;;  %1078 = vst.msk [vmem:[#allocation2 + $0xd0] sm:$0xff] %vm61_vm0, %v1069_v19  ;;  %v828_v19 = vmul.f32 %v4596_v40, %v4692_v52  ;;  %v4930_v25 = vld [vmem:[%s4291_s24 + $0xa8] sm:$0xff]  }
 0x255   : > { %3191 = vmatprep.subr.bf16.mxu0 %v4791_v33  ;;  %1079 = vst.msk [vmem:[#allocation2 + $0xf8] sm:$0xff] %vm61_vm0, %v1070_v38  ;;  %v4839_v38 = vld [vmem:[%s4291_s24 + $0xd8] sm:$0xff]  }
 0x256   : > { %1388 = vrot.lane.b32.xlu0 %v1371_v9, %s3897_s2  ;;  %1489 = vst.msk [vmem:[#allocation2 + $0x180] sm:$0xff] %vm61_vm0, %v1480_v4  ;;  %v1171_v4 = vsel %vm952_vm1, %v1168_v0, %v1170_v48  ;;  %v1576_v50 = vsel %vm1358_vm4, %v1573_v26, %v1575_v13  ;;  %v1372_v28 = vrot.slane %v4774_v16, 1  ;;  %v4820_v9 = vmul.f32 %v4483_v18, %v4744_v17 }
 0x257   : > { %v827_v18 = vmul.f32 %v4539_v41, %v4674_v51 }
 0x258   : > { %v1261_v44 = vpop.permute.xlu1 %1260  ;;  %980 = vrot.lane.b32.xlu1 %v963_v42, %s3897_s2  ;;  %v826_v42 = vmul.f32 %v4571_v53, %v4666_v46 }
 0x259   : > { %v1275_v57 = vmul.f32 %v1261_v44, %v4703_v59  ;;  %v1369_v44 = vsel %vm1358_vm4, %v1366_v30, %v1368_v63  ;;  %v846_v63 = vrot.slane %v825_v21, 6  ;;  %v4827_v21 = vld [vmem:[%s4291_s24 + $0x90] sm:$0xff]   ;;  %v850_v40 = vrot.slane %v827_v18, 6 }
 0x25a   : > { %1188 = vrot.lane.b32.xlu0 %v1171_v4, %s3897_s2  ;;  %v848_v53 = vrot.slane %v826_v42, 6  ;;  %3192 = vmatpush3.bf16.msra.mxu0 %v4827_v21  ;;  %v852_v4 = vrot.slane %v828_v19, 6  ;;  %v1274_v42 = vmul.f32 %v4552_v55, %v4692_v52  ;;  %v4865_v55 = vld [vmem:[%s4291_s24 + $0x98] sm:$0xff]  }
 0x25b   : > { %1284 = vst.msk [vmem:[#allocation2 + $0x178] sm:$0xff] %vm61_vm0, %v1275_v57  ;;  %v844_v57 = vrot.slane %v824_v7, 6  ;;  %3193 = vmatprep.subr.bf16.mxu0 %v4839_v38 }
 0x25c   : > { %v1266_v10 = vpop.permute.xlu1 %1265  ;;  %1386 = vrot.lane.b32.xlu1 %v1369_v44, %s3897_s2  ;;  %v849_v34 = vsel %vm840_vm3, %v846_v63, %v848_v53  ;;  %v851_v44 = vsel %vm840_vm3, %v848_v53, %v850_v40  ;;  %1283 = vst.msk [vmem:[#allocation2 + $0x150] sm:$0xff] %vm61_vm0, %v1274_v42  ;;  %v966_v53 = vrot.slane %v4894_v62, 7 }
 0x25d   : > { %v1276_v37 = vmul.f32 %v1266_v10, %v4744_v17  ;;  %v847_v7 = vsel %vm840_vm3, %v844_v57, %v846_v63  ;;  %v845_v10 = vsel %vm840_vm3, %v842_v60, %v844_v57  ;;  %v1478_v60 = vmul.f32 %v4565_v20, %v4692_v52  ;;  %873 = vst.msk [vmem:[#allocation2 + $0x118] sm:$0xff] %vm61_vm0, %v849_v34 }
 0x25e   : > { %872 = vst.msk [vmem:[#allocation2 + $0xf0] sm:$0xff] %vm61_vm0, %v847_v7  ;;  %871 = vst.msk [vmem:[#allocation2 + $0xc8] sm:$0xff] %vm61_vm0, %v845_v10  ;;  %v1072_v57 = vmul.f32 %v4614_v32, %v4674_v51  ;;  %1593 = vrot.lane.b32.xlu0 %v1576_v50, %s3897_s2  ;;  %v1074_v32 = vmul.f32 %v4631_v27, %v4703_v59  ;;  %v853_v20 = vsel %vm840_vm3, %v850_v40, %v852_v4  ;;  %v4909_v10 = vld [vmem:[%s4291_s24 + $0xe8] sm:$0xff]  }
 0x25f   : > { %1285 = vst.msk [vmem:[#allocation2 + $0x1a0] sm:$0xff] %vm61_vm0, %v1276_v37  ;;  %v1071_v37 = vmul.f32 %v4519_v6, %v4666_v46  ;;  %1487 = vst.msk [vmem:[#allocation2 + $0x130] sm:$0xff] %vm61_vm0, %v1478_v60  ;;  %v829_v63 = vmul.f32 %v4545_v12, %v4703_v59  ;;  %v1479_v50 = vmul.f32 %v4581_v58, %v4703_v59  ;;  %3194 = vmatpush3.bf16.msra.mxu0 %v4865_v55 }
 0x260   : > { %1081 = vst.msk [vmem:[#allocation2 + $0x148] sm:$0xff] %vm61_vm0, %v1072_v57  ;;  %v1169_v27 = vsel %vm952_vm1, %v1166_v43, %v1168_v0  ;;  %875 = vst.msk [vmem:[#allocation2 + $0x168] sm:$0xff] %vm61_vm0, %v853_v20  ;;  %v1373_v58 = vsel %vm1358_vm4, %v1370_v49, %v1372_v28  ;;  %v1172_v12 = vrot.slane %v4820_v9, 7  ;;  %v1571_v7 = vrot.slane %v4784_v45, 1  ;;  %3195 = vmatprep.subr.bf16.mxu0 %v4897_v15  ;;  %v1626_v45 = vld [vmem:[%s5577_s23 + $0x38] sm:$0xff] }
 0x261   : > { %v1440_v41 = vpop.permute.xlu1 %1439  ;;  %1080 = vst.msk [vmem:[#allocation2 + $0x120] sm:$0xff] %vm61_vm0, %v1071_v37  ;;  %874 = vst.msk [vmem:[#allocation2 + $0x140] sm:$0xff] %vm61_vm0, %v851_v44  ;;  %v854_v43 = vrot.slane %v829_v63, 6  ;;  %1186 = vrot.lane.b32.xlu1 %v1169_v27, %s3897_s2  ;;  %v1546_v34 = vmul.f32 %v4529_v36, %v4627_v1  ;;  %v1374_v63 = vrot.slane %v1348_v61, 1 }
 0x262   : > { %v1474_v6 = vmul.f32 %v1440_v41, %v4627_v1  ;;  %1083 = vst.msk [vmem:[#allocation2 + $0x198] sm:$0xff] %vm61_vm0, %v1074_v32  ;;  %1488 = vst.msk [vmem:[#allocation2 + $0x158] sm:$0xff] %vm61_vm0, %v1479_v50  ;;  %1390 = vrot.lane.b32.xlu0 %v1373_v58, %s3897_s2  ;;  %v1574_v18 = vsel %vm1358_vm4, %v1571_v7, %v1573_v26  ;;  %v1173_v19 = vsel %vm952_vm1, %v1170_v48, %v1172_v12  ;;  %v1422_v26 = vld [vmem:[%s5577_s23 + $0x20] sm:$0xff]  ;;  %v4949_v41 = vld [vmem:[%s4291_s24 + $0xb0] sm:$0xff]  }
 0x263   : > { %v855_v22 = vsel %vm840_vm3, %v852_v4, %v854_v43  ;;  %3196 = vmatpush3.bf16.msra.mxu0 %v4903_v2  ;;  %v967_v48 = vsel %vm952_vm1, %v964_v29, %v966_v53  ;;  %v1577_v4 = vrot.slane %v1552_v39, 1  ;;  %v4959_v29 = vld [vmem:[%s4291_s24 + $0xf8] sm:$0xff]   ;;  %v4978_v50 = vmul.f32 %v4525_v35, %v4599_v56  ;;  %v5587_v43 = vld [vmem:[#allocation24_spill] sm:$0xff] }
 0x264   : > { %1483 = vst.msk [vmem:[#allocation2 + $0x90] sm:$0xff] %vm61_vm0, %v1474_v6  ;;  %876 = vst.msk [vmem:[#allocation2 + $0x190] sm:$0xff] %vm61_vm0, %v855_v22  ;;  %3197 = vmatprep.subr.bf16.mxu0 %v4909_v10  ;;  %v5586_v6 = vmov 8   ;;  %v4967_v32 = vld [vmem:[%s4291_s24 + $0xb8] sm:$0xff]   ;;  %v1565_v58 = vrot.slane %v1546_v34, 1  ;;  %v1216_v35 = vld [vmem:[%s5577_s23 + $0x10] sm:$0xff] }
 0x265   : > { %1591 = vrot.lane.b32.xlu1 %v1574_v18, %s3897_s2  ;;  %v1578_v27 = vsel %vm1358_vm4, %v1575_v13, %v1577_v4  ;;  %v5588_v22 = vld [vmem:[#allocation25_spill] sm:$0xff]  ;;  %v1547_v13 = vmul.f32 %v5589_v31, %v4641_v11  ;;  %v5595_v31 = vmov 0  }
 0x266   : > { %v1226_v0 = vpop.permute.xlu1 %1225  ;;  %1190 = vrot.lane.b32.xlu0 %v1173_v19, %s3897_s2  ;;  %v4997_v18 = vmul.f32 %v5588_v22, %v4593_v47  ;;  %v5594_v22 = vmov 7  }
 0x267   : > { %v1268_v49 = vmul.f32 %v1226_v0, %v4593_v47  ;;  %3198 = vmatpush3.bf16.msra.mxu0 %v4930_v25  ;;  %v1341_v0 = vmul.f32 %v5587_v43, %v4599_v56 }
 0x268   : > { %3199 = vmatprep.subr.bf16.mxu0 %v4944_v24  ;;  %v1359_v39 = vrot.slane %v4997_v18, 1 }
 0x269   : > { %1277 = vst.msk [vmem:[#allocation2 + $0x60] sm:$0xff] %vm61_vm0, %v1268_v49  ;;  %984 = vrot.lane.b32.xlu1 %v967_v48, %s3897_s2  ;;  %v1563_v49 = vrot.slane %v4978_v50, 1  ;;  %v1360_v19 = vrot.slane %v1341_v0, 1  ;;  %v1567_v48 = vrot.slane %v1547_v13, 1  ;;  %v1619_v0 = vld [vmem:[%s5577_s23] sm:$0xff]  ;;  %v5596_v13 = vmov 2  }
 0x26a   : > { %1449 = vperm.xlu0 %3642, %v1422_v26  }
 0x26b   : > { %v1636_v37 = vpop.permute.xlu1 %1635  ;;  %3200 = vmatpush3.bf16.msra.mxu0 %v4949_v41  ;;  %v1568_v61 = vsel %vm1358_vm4, %v1565_v58, %v1567_v48 }
 0x26c   : > { %v1674_v60 = vmul.f32 %v1636_v37, %v4599_v56  ;;  %3201 = vmatprep.subr.bf16.mxu0 %v4959_v29  ;;  %v1566_v56 = vsel %vm1358_vm4, %v1563_v49, %v1565_v58  ;;  %v1217_v37 = vld [vmem:[%s5577_s23 + $0x18] sm:$0xff] }
 0x26d   : > { %1597 = vrot.lane.b32.xlu1 %v1577_v4, %s3897_s2 }
 0x26e   : > { %v1693_v57 = vrot.slane %v1674_v60, 2  ;;  %3645 = vset.pattern.permute.xlu0 %v5586_v6  ;;  %v1361_v60 = vsel %vm1358_vm4, %v1359_v39, %v1360_v19 }
 0x26f   : > { %v1641_v40 = vpop.permute.xlu1 %1640  ;;  %1645 = vperm.xlu0 %3645, %v3718_v3   ;;  %3202 = vmatpush3.bf16.msra.mxu0 %v4967_v32 }
 0x270   : > { %v4953_v23 = vmul.f32 %v1641_v40, %v4627_v1  ;;  %v5590_v40 = vld [vmem:[#allocation27_spill] sm:$0xff] }
 0x271   : > { %1394 = vrot.lane.b32.xlu1 %v1374_v63, %s3897_s2  ;;  %v1548_v4 = vmul.f32 %v5590_v40, %v4666_v46 }
 0x272   : > { %v1695_v42 = vrot.slane %v4953_v23, 2  ;;  %v3705_v23 = vld [vmem:[%s4291_s24 + $0x118] sm:$0xff]  }
 0x273   : > { %1595 = vrot.lane.b32.xlu0 %v1578_v27, %s3897_s2  ;;  %v1569_v3 = vrot.slane %v1548_v4, 1 }
 0x274   : > { %v1696_v20 = vsel %vm1691_vm5, %v1693_v57, %v1695_v42  ;;  %v1445_v44 = vpop.permute.xlu1 %1444  ;;  %v5591_v57 = vld [vmem:[#allocation26_spill] sm:$0xff] }
 0x275   : > { %1722 = vst.msk [vmem:[#allocation2 + $0x70] sm:$0xff] %vm61_vm0, %v1696_v20  ;;  %v1475_v36 = vmul.f32 %v1445_v44, %v4641_v11  ;;  %1235 = vperm.xlu1 %3646, %v1216_v35   ;;  %v1342_v34 = vmul.f32 %v5591_v57, %v4627_v1  ;;  %v5592_v20 = vld [vmem:[#allocation28_spill] sm:$0xff]  ;;  %v1572_v58 = vsel %vm1358_vm4, %v1569_v3, %v1571_v7 }
 0x276   : > { %v1343_v44 = vmul.f32 %v5592_v20, %v4641_v11  ;;  %v1570_v7 = vsel %vm1358_vm4, %v1567_v48, %v1569_v3  ;;  %v1625_v35 = vld [vmem:[%s5577_s23 + $0x30] sm:$0xff] }
 0x277   : > { %1484 = vst.msk [vmem:[#allocation2 + $0xb8] sm:$0xff] %vm61_vm0, %v1475_v36  ;;  %1583 = vrot.lane.b32.xlu0 %v1566_v56, %s3897_s2  ;;  %v1375_v36 = vsel %vm1358_vm4, %v1372_v28, %v1374_v63  ;;  %v1362_v27 = vrot.slane %v1342_v34, 1  ;;  %v1624_v28 = vld [vmem:[%s5577_s23 + $0x28] sm:$0xff]  ;;  %v1731_v48 = vld [vmem:[#allocation2 + $0x50] sm:$0xff] }
 0x279   : > { %1240 = vperm.xlu1 %3646, %v1217_v37   ;;  %v1363_v43 = vsel %vm1358_vm4, %v1360_v19, %v1362_v27 }
 0x27b   : > { %1378 = vrot.lane.b32.xlu0 %v1361_v60, %s3897_s2 }
 0x27c   : > { %v1735_v62 = vld [vmem:[#allocation2 + $0x70] sm:$0xff] }
 0x27d   : > { %1585 = vrot.lane.b32.xlu1 %v1568_v61, %s3897_s2 }
 0x27e   : > { %3647 = vset.pattern.permute.xlu1 %v5586_v6 }
 0x27f   : > { %1650 = vperm.xlu0 %3645, %v1422_v26   ;;  %v1364_v26 = vrot.slane %v1343_v44, 1 }
 0x281   : > { %1392 = vrot.lane.b32.xlu1 %v1375_v36, %s3897_s2  ;;  %v1367_v16 = vsel %vm1358_vm4, %v1364_v26, %v1366_v30  ;;  %v5593_v30 = vmov 1   ;;  %v1365_v63 = vsel %vm1358_vm4, %v1362_v27, %v1364_v26 }
 0x283   : > { %1589 = vrot.lane.b32.xlu0 %v1572_v58, %s3897_s2 }
 0x285   : > { %1380 = vrot.lane.b32.xlu1 %v1363_v43, %s3897_s2 }
 0x287   : > { %1384 = vrot.lane.b32.xlu0 %v1367_v16, %s3897_s2 }
 0x289   : > { %1655 = vperm.xlu1 %3647, %v1624_v28  }
 0x28b   : > { %1665 = vperm.xlu0 %3645, %v1626_v45  }
 0x28d   : > { %1587 = vrot.lane.b32.xlu1 %v1570_v7, %s3897_s2 }
 0x28f   : > { %3648 = vset.pattern.permute.xlu0 %v5593_v30 }
 0x290   : > { %931 = vperm.xlu0 %3648, %v888_v54  }
 0x291   : > { %1382 = vrot.lane.b32.xlu1 %v1365_v63, %s3897_s2 }
 0x294   : > { %3651 = vset.pattern.permute.xlu0 %v5586_v6  ;;  %v5597_v6 = vmov 6  }
 0x295   : > { %1630 = vperm.xlu0 %3651, %v1619_v0   ;;  %1660 = vperm.xlu1 %3647, %v1625_v35  }
 0x299   : > { %1192 = vrot.lane.b32.xlu0 %v1172_v12, %s3897_s2  ;;  %1670 = vperm.xlu1 %3647, %v888_v54  }
 0x29d   : > { %3649 = vset.pattern.permute.xlu1 %v5594_v22 }
 0x29e   : > { %1501 = vperm.xlu1 %3649, %v1619_v0  }
 0x2a2   : > { %3650 = vset.pattern.permute.xlu1 %v5595_v31 }
 0x2a3   : > { %819 = vperm.xlu1 %3650, %v888_v54  }
 0x2a7   : > { %3652 = vset.pattern.permute.xlu1 %v5596_v13  ;;  %v1175_v56 = vpop.permute.xlu1 %1174 }
 0x2a8   : > { %1064 = vperm.xlu1 %3652, %v888_v54   ;;  %1204 = vst.msk [vmem:[#allocation2 + $0x58] sm:$0xfe] %vm1000_vm6, %v1175_v56 }
 0x2ab   : > { %v1177_v19 = vpop.permute.xlu0 %1176  ;;  %v971_v9 = vpop.permute.xlu1 %970 }
 0x2ac   : > { %3653 = vset.pattern.permute.xlu1 %v5597_v6  ;;  %1205 = vst.msk [vmem:[#allocation2 + $0x80] sm:$0xff] %vm1002_vm7, %v1177_v19 }
 0x2ad   : > { %1429 = vperm.xlu1 %3653, %v1619_v0   ;;  %1001 = vst.msk [vmem:[#allocation2 + $0x78] sm:$0xfe] %vm1000_vm6, %v971_v9 }
 0x2af   : > { %v973_v12 = vpop.permute.xlu0 %972  ;;  %v1732_v40 = vld [vmem:[#allocation2 + $0x58] sm:$0xff] }
 0x2b0   : > { %1003 = vst.msk [vmem:[#allocation2 + $0xa0] sm:$0xff] %vm1002_vm7, %v973_v12  ;;  %v1179_v37 = vpop.permute.xlu1 %1178 }
 0x2b1   : > { %1206 = vst.msk [vmem:[#allocation2 + $0xa8] sm:$0xff] %vm1002_vm7, %v1179_v37 }
 0x2b3   : > { %v977_v60 = vpop.permute.xlu0 %976  ;;  %v1737_v4 = vld [vmem:[#allocation2 + $0x80] sm:$0xff] }
 0x2b4   : > { %v1736_v61 = vld [vmem:[#allocation2 + $0x78] sm:$0xff]  ;;  %1005 = vst.msk [vmem:[#allocation2 + $0xf0] sm:$0xff] %vm1002_vm7, %v977_v60  ;;  %v975_v57 = vpop.permute.xlu1 %974  ;;  %v1777_v34 = vpack.c.bf16 %v1737_v4, %v1732_v40 }
 0x2b5   : > { %v1776_v3 = vpack.c.bf16 %v1736_v61, %v1731_v48  ;;  %1004 = vst.msk [vmem:[#allocation2 + $0xc8] sm:$0xff] %vm1002_vm7, %v975_v57 }
 0x2b6   : > { %2139 = vmatprep.mubr.bf16.mxu1 %v1777_v34 }
 0x2b7   : > { %2140 = vmatmul.mubr.bf16.vlgmr.msra.gmra.mrb[0].mxu1 %v1776_v3 }
 0x2b8   : > { %v1181_v20 = vpop.permute.xlu1 %1180  ;;  %3356 = vmatpush3.bf16.msra.mxu1 %v4732_v5  ;;  %v1742_v26 = vld [vmem:[#allocation2 + $0xa8] sm:$0xff] }
 0x2b9   : > { %1207 = vst.msk [vmem:[#allocation2 + $0xd0] sm:$0xff] %vm1002_vm7, %v1181_v20  ;;  %3349 = vmatprep.subr.bf16.mxu1 %v4765_v8  ;;  %v1741_v8 = vld [vmem:[#allocation2 + $0xa0] sm:$0xff] }
 0x2ba   : > { %v3702_v20 = vld [vmem:[%s4291_s24 + $0x100] sm:$0xff]  }
 0x2bc   : > { %3357 = vmatpush3.bf16.msra.mxu1 %v4777_v14  ;;  %v1746_v36 = vld [vmem:[#allocation2 + $0xc8] sm:$0xff] }
 0x2bd   : > { %3350 = vmatprep.subr.bf16.mxu1 %v4791_v33  ;;  %v1781_v14 = vpack.c.bf16 %v1746_v36, %v1741_v8 }
 0x2be   : > { %v1183_v44 = vpop.permute.xlu1 %1182 }
 0x2bf   : > { %1208 = vst.msk [vmem:[#allocation2 + $0xf8] sm:$0xff] %vm1002_vm7, %v1183_v44 }
 0x2c0   : > { %v1747_v43 = vld [vmem:[#allocation2 + $0xd0] sm:$0xff]  ;;  %3358 = vmatpush3.bf16.msra.mxu1 %v4827_v21 }
 0x2c1   : > { %v1782_v5 = vpack.c.bf16 %v1747_v43, %v1742_v26  ;;  %3351 = vmatprep.subr.bf16.mxu1 %v4839_v38  ;;  %v3703_v26 = vld [vmem:[%s4291_s24 + $0x108] sm:$0xff]  }
 0x2c2   : > { %v979_v27 = vpop.permute.xlu1 %978 }
 0x2c3   : > { %1006 = vst.msk [vmem:[#allocation2 + $0x118] sm:$0xff] %vm1002_vm7, %v979_v27  ;;  %2147 = vmatprep.mubr.bf16.mxu1 %v1782_v5 }
 0x2c4   : > { %v983_v58 = vpop.permute.xlu0 %982  ;;  %2148 = vmatmul.mubr.bf16.gmra.mrb[4].mxu1 %v1781_v14  ;;  %v3704_v14 = vld [vmem:[%s4291_s24 + $0x110] sm:$0xff]   ;;  %s3094_s24 = sshll.u32 %s3885_s0, 6  ;;  %s412_s0 = sadd.s32 1, %s3885_s0  }
 0x2c5   : > { %1008 = vst.msk [vmem:[#allocation2 + $0x168] sm:$0xff] %vm1002_vm7, %v983_v58  ;;  %3359 = vmatpush3.bf16.msra.mxu1 %v4865_v55  ;;  %s2373_s29 = scalar_lea.vmem %s5516_s11, %s3094_s24  ;;  %p5293_p0 = scmp.ge.s32.totalorder %s412_s0, 18  }
 0x2c6   : > { %v1185_v16 = vpop.permute.xlu1 %1184  ;;  %3352 = vmatprep.subr.bf16.mxu1 %v4897_v15  ;;  %v1752_v54 = vld [vmem:[#allocation2 + $0xf8] sm:$0xff]  ;;  %v1751_v15 = vld [vmem:[#allocation2 + $0xf0] sm:$0xff]  ;;  %vm2865_vm11 = vcmask (%p5293_p0), 261120  }
 0x2c7   : > { %1209 = vst.msk [vmem:[#allocation2 + $0x120] sm:$0xff] %vm1002_vm7, %v1185_v16 }
 0x2c8   : > { %v1389_v33 = vpop.permute.xlu0 %1388 }
 0x2c9   : > { %1413 = vst.msk [vmem:[#allocation2 + $0x128] sm:$0xff] %vm1002_vm7, %v1389_v33  ;;  %3360 = vmatpush3.bf16.msra.mxu1 %v4903_v2 }
 0x2ca   : > { %v981_v21 = vpop.permute.xlu1 %980  ;;  %3353 = vmatprep.subr.bf16.mxu1 %v4909_v10  ;;  %v1756_v38 = vld [vmem:[#allocation2 + $0x118] sm:$0xff] }
 0x2cb   : > { %1007 = vst.msk [vmem:[#allocation2 + $0x140] sm:$0xff] %vm1002_vm7, %v981_v21  ;;  %v1786_v63 = vpack.c.bf16 %v1756_v38, %v1751_v15 }
 0x2cc   : > { %v1189_v28 = vpop.permute.xlu0 %1188  ;;  %v1766_v6 = vld [vmem:[#allocation2 + $0x168] sm:$0xff] }
 0x2cd   : > { %1211 = vst.msk [vmem:[#allocation2 + $0x170] sm:$0xff] %vm1002_vm7, %v1189_v28  ;;  %3361 = vmatpush3.bf16.msra.mxu1 %v4930_v25  ;;  %v3898_v25 = vmov 0.0  }
 0x2ce   : > { %v1387_v45 = vpop.permute.xlu1 %1386  ;;  %v1757_v30 = vld [vmem:[#allocation2 + $0x120] sm:$0xff]  ;;  %3354 = vmatprep.subr.bf16.mxu1 %v4944_v24 }
 0x2cf   : > { %1412 = vst.msk [vmem:[#allocation2 + $0x100] sm:$0xff] %vm1002_vm7, %v1387_v45  ;;  %v1787_v55 = vpack.c.bf16 %v1757_v30, %v1752_v54 }
 0x2d0   : > { %v1594_v7 = vpop.permute.xlu0 %1593  ;;  %v1758_v3 = vld [vmem:[#allocation2 + $0x128] sm:$0xff] }
 0x2d1   : > { %1616 = vst.msk [vmem:[#allocation2 + $0x130] sm:$0xff] %vm1002_vm7, %v1594_v7  ;;  %2155 = vmatprep.mubr.bf16.mxu1 %v1787_v55  ;;  %3362 = vmatpush3.bf16.msra.mxu1 %v4949_v41 }
 0x2d2   : > { %2156 = vmatmul.mubr.bf16.gmra.mrb[8].mxu1 %v1786_v63  ;;  %3355 = vmatprep.subr.bf16.mxu1 %v4959_v29  ;;  %v1761_v24 = vld [vmem:[#allocation2 + $0x140] sm:$0xff] }
 0x2d3   : > { %v1187_v2 = vpop.permute.xlu1 %1186  ;;  %v1791_v29 = vpack.c.bf16 %v1766_v6, %v1761_v24 }
 0x2d4   : > { %v1391_v10 = vpop.permute.xlu0 %1390  ;;  %1210 = vst.msk [vmem:[#allocation2 + $0x148] sm:$0xff] %vm1002_vm7, %v1187_v2  ;;  %v1767_v56 = vld [vmem:[#allocation2 + $0x170] sm:$0xff] }
 0x2d5   : > { %1414 = vst.msk [vmem:[#allocation2 + $0x150] sm:$0xff] %vm1002_vm7, %v1391_v10  ;;  %3363 = vmatpush3.bf16.msra.mxu1 %v4967_v32 }
 0x2d6   : > { %3288 = vmatprep.subr.bf16.mxu1 %v3898_v25  ;;  %v1753_v34 = vld [vmem:[#allocation2 + $0x100] sm:$0xff] }
 0x2d7   : > { %v1592_v0 = vpop.permute.xlu1 %1591  ;;  %v1788_v36 = vpack.c.bf16 %v1758_v3, %v1753_v34 }
 0x2d8   : > { %v1191_v35 = vpop.permute.xlu0 %1190  ;;  %1615 = vst.msk [vmem:[#allocation2 + $0x108] sm:$0xff] %vm1002_vm7, %v1592_v0  ;;  %v1759_v40 = vld [vmem:[#allocation2 + $0x130] sm:$0xff] }
 0x2d9   : > { %1212 = vst.msk [vmem:[#allocation2 + $0x198] sm:$0xff] %vm1002_vm7, %v1191_v35 }
 0x2db   : > { %v985_v22 = vpop.permute.xlu1 %984  ;;  %v1762_v13 = vld [vmem:[#allocation2 + $0x148] sm:$0xff] }
 0x2dc   : > { %1009 = vst.msk [vmem:[#allocation2 + $0x190] sm:$0xff] %vm1002_vm7, %v985_v22  ;;  %v1792_v41 = vpack.c.bf16 %v1767_v56, %v1762_v13  ;;  %v1774_v22 = vld [vmem:[#allocation2 + $0x1a8] sm:$0xff]  ;;  %v1763_v13 = vld [vmem:[#allocation2 + $0x150] sm:$0xff] }
 0x2de   : > { %2163 = vmatprep.mubr.bf16.mxu1 %v1792_v41  ;;  %v1799_v41 = vpack.c.bf16 %v1774_v22, %v1774_v22  ;;  %v3708_v22 = vld [vmem:[%s2373_s29 + $0x4] ss:$8 sps:$4 sm:$0xff]  }
 0x2df   : > { %2164 = vmatmul.mubr.bf16.gmra.mrb[12].mxu1 %v1791_v29  ;;  %v1598_v19 = vpop.permute.xlu1 %1597  ;;  %v1754_v48 = vld [vmem:[#allocation2 + $0x108] sm:$0xff]  ;;  %2437 = vmatprep.subr.bf16.mxu0 %v3708_v22 }
 0x2e0   : > { %v1772_v9 = vld [vmem:[#allocation2 + $0x198] sm:$0xff]  ;;  %1618 = vst.msk [vmem:[#allocation2 + $0x180] sm:$0x7f] %vm1416_vm8, %v1598_v19  ;;  %v1789_v4 = vpack.c.bf16 %v1759_v40, %v1754_v48 }
 0x2e1   : > { %v1797_v12 = vpack.c.bf16 %v1772_v9, %v1772_v9 }
 0x2e3   : > { %2171 = vmatprep.mubr.bf16.mxu1 %v1797_v12  ;;  %v1395_v32 = vpop.permute.xlu1 %1394  ;;  %v1771_v37 = vld [vmem:[#allocation2 + $0x190] sm:$0xff] }
 0x2e4   : > { %1417 = vst.msk [vmem:[#allocation2 + $0x1a0] sm:$0x7f] %vm1416_vm8, %v1395_v32  ;;  %v1796_v60 = vpack.c.bf16 %v1771_v37, %v1771_v37 }
 0x2e7   : > { %2172 = vmatmul.mubr.bf16.gmra.mrb[16].mxu1 %v1796_v60  ;;  %v1769_v45 = vld [vmem:[#allocation2 + $0x180] sm:$0xff] }
 0x2e8   : > { %2227 = vmatprep.mubr.bf16.mxu1 %v1789_v4 }
 0x2e9   : > { %v1450_v61 = vpop.permute.xlu0 %1449 }
 0x2ea   : > { %v1476_v57 = vmul.f32 %v1450_v61, %v4666_v46 }
 0x2eb   : > { %v1773_v4 = vld [vmem:[#allocation2 + $0x1a0] sm:$0xff] }
 0x2ec   : > { %1485 = vst.msk [vmem:[#allocation2 + $0xe0] sm:$0xff] %vm61_vm0, %v1476_v57  ;;  %v1798_v34 = vpack.c.bf16 %v1773_v4, %v1773_v4 }
 0x2ee   : > { %v1646_v44 = vpop.permute.xlu0 %1645 }
 0x2ef   : > { %v1676_v27 = vmul.f32 %v1646_v44, %v4641_v11  ;;  %2228 = vmatmul.mubr.bf16.vlgmr.msra.gmra.mrb[20].mxu1 %v1788_v36 }
 0x2f0   : > { %3289 = vmatpush3.bf16.msra.mxu1 %v3702_v20 }
 0x2f1   : > { %v1697_v58 = vrot.slane %v1676_v27, 2  ;;  %3290 = vmatprep.subr.bf16.mxu1 %v3898_v25 }
 0x2f2   : > { %v1596_v43 = vpop.permute.xlu0 %1595 }
 0x2f3   : > { %v1698_v5 = vsel %vm1691_vm5, %v1695_v42, %v1697_v58  ;;  %1617 = vst.msk [vmem:[#allocation2 + $0x158] sm:$0xff] %vm1002_vm7, %v1596_v43 }
 0x2f4   : > { %1723 = vst.msk [vmem:[#allocation2 + $0x98] sm:$0xff] %vm61_vm0, %v1698_v5  ;;  %v1236_v8 = vpop.permute.xlu1 %1235  ;;  %3291 = vmatpush3.bf16.msra.mxu1 %v3703_v26 }
 0x2f5   : > { %v1270_v16 = vmul.f32 %v1236_v8, %v4627_v1  ;;  %3292 = vmatprep.subr.bf16.mxu1 %v3898_v25 }
 0x2f6   : > { %v1584_v33 = vpop.permute.xlu0 %1583 }
 0x2f7   : > { %1611 = vst.msk [vmem:[#allocation2 + $0x68] sm:$0xff] %vm1002_vm7, %v1584_v33 }
 0x2f8   : > { %1279 = vst.msk [vmem:[#allocation2 + $0xb0] sm:$0xff] %vm61_vm0, %v1270_v16  ;;  %v1241_v21 = vpop.permute.xlu1 %1240  ;;  %3293 = vmatpush3.bf16.msra.mxu1 %v3704_v14 }
 0x2f9   : > { %v1271_v42 = vmul.f32 %v1241_v21, %v4641_v11  ;;  %3294 = vmatprep.subr.bf16.mxu1 %v3898_v25 }
 0x2fa   : > { %v1379_v28 = vpop.permute.xlu0 %1378  ;;  %v1764_v38 = vld [vmem:[#allocation2 + $0x158] sm:$0xff] }
 0x2fb   : > { %1408 = vst.msk [vmem:[#allocation2 + $0x60] sm:$0xff] %vm1002_vm7, %v1379_v28  ;;  %v1794_v1 = vpack.c.bf16 %v1769_v45, %v1764_v38  ;;  %v1740_v43 = vld [vmem:[#allocation2 + $0x98] sm:$0xff] }
 0x2fc   : > { %1280 = vst.msk [vmem:[#allocation2 + $0xd8] sm:$0xff] %vm61_vm0, %v1271_v42  ;;  %v1586_v7 = vpop.permute.xlu1 %1585  ;;  %3295 = vmatpush3.bf16.msra.mxu1 %v3705_v23  ;;  %v1780_v33 = vpack.c.bf16 %v1740_v43, %v1735_v62 }
 0x2fd   : > { %2235 = vmatprep.mubr.bf16.mxu1 %v1794_v1  ;;  %1612 = vst.msk [vmem:[#allocation2 + $0x90] sm:$0xff] %vm1002_vm7, %v1586_v7 }
 0x2fe   : > { %v1651_v54 = vpop.permute.xlu0 %1650  ;;  %v1734_v10 = vld [vmem:[#allocation2 + $0x68] sm:$0xff] }
 0x2ff   : > { %v1677_v30 = vmul.f32 %v1651_v54, %v4666_v46 }
 0x300   : > { %v1393_v11 = vpop.permute.xlu1 %1392 }
 0x301   : > { %v1699_v55 = vrot.slane %v1677_v30, 2  ;;  %1415 = vst.msk [vmem:[#allocation2 + $0x178] sm:$0xff] %vm1002_vm7, %v1393_v11 }
 0x302   : > { %v1590_v15 = vpop.permute.xlu0 %1589  ;;  %v1733_v32 = vld [vmem:[#allocation2 + $0x60] sm:$0xff] }
 0x303   : > { %v1700_v63 = vsel %vm1691_vm5, %v1697_v58, %v1699_v55  ;;  %1614 = vst.msk [vmem:[#allocation2 + $0xe0] sm:$0xff] %vm1002_vm7, %v1590_v15 }
 0x304   : > { %1724 = vst.msk [vmem:[#allocation2 + $0xc0] sm:$0xff] %vm61_vm0, %v1700_v63  ;;  %v1381_v2 = vpop.permute.xlu1 %1380  ;;  %v1739_v0 = vld [vmem:[#allocation2 + $0x90] sm:$0xff] }
 0x305   : > { %1409 = vst.msk [vmem:[#allocation2 + $0x88] sm:$0xff] %vm1002_vm7, %v1381_v2  ;;  %v1779_v24 = vpack.c.bf16 %v1739_v0, %v1734_v10  ;;  %v1775_v0 = vld [vmem:[#allocation2 + $0x1b0] sm:$0xff] }
 0x306   : > { %v1385_v35 = vpop.permute.xlu0 %1384 }
 0x307   : > { %1411 = vst.msk [vmem:[#allocation2 + $0xd8] sm:$0xff] %vm1002_vm7, %v1385_v35  ;;  %2211 = vmatprep.mubr.bf16.mxu0 %v1779_v24  ;;  %v1800_v35 = vpack.c.bf16 %v1775_v0, %v1775_v0  ;;  %v3706_v24 = vld [vmem:[%s2373_s29] ss:$8 sps:$4 sm:$0xff]  }
 0x308   : > { %v1656_v46 = vpop.permute.xlu1 %1655  ;;  %v1768_v56 = vld [vmem:[#allocation2 + $0x178] sm:$0xff] }
 0x309   : > { %v1678_v6 = vmul.f32 %v1656_v46, %v4674_v51  ;;  %v1793_v19 = vpack.c.bf16 %v1768_v56, %v1763_v13  ;;  %v3709_v46 = vld [vmem:[%s2373_s29 + $0x10] ss:$8 sps:$4 sm:$0xff]   ;;  %v3711_v13 = vld [vmem:[%s2373_s29 + $0x14] ss:$8 sps:$4 sm:$0xff]   ;;  %v3712_v56 = vld [vmem:[%s2373_s29 + $0x20] ss:$8 sps:$4 sm:$0xff]  }
 0x30a   : > { %v1666_v29 = vpop.permute.xlu0 %1665  ;;  %v1749_v58 = vld [vmem:[#allocation2 + $0xe0] sm:$0xff] }
 0x30b   : > { %v1701_v9 = vrot.slane %v1678_v6, 2  ;;  %2236 = vmatmul.mubr.bf16.gmra.mrb[24].mxu1 %v1793_v19  ;;  %v1680_v3 = vmul.f32 %v1666_v29, %v4703_v59  ;;  %v1745_v1 = vld [vmem:[#allocation2 + $0xc0] sm:$0xff]  ;;  %v3717_v6 = vld [vmem:[%s2373_s29 + $0x34] ss:$8 sps:$4 sm:$0xff]  }
 0x30c   : > { %v1588_v12 = vpop.permute.xlu1 %1587  ;;  %v1738_v37 = vld [vmem:[#allocation2 + $0x88] sm:$0xff]  ;;  %2243 = vmatprep.mubr.bf16.mxu1 %v1799_v41 }
 0x30d   : > { %v1702_v48 = vsel %vm1691_vm5, %v1699_v55, %v1701_v9  ;;  %1613 = vst.msk [vmem:[#allocation2 + $0xb8] sm:$0xff] %vm1002_vm7, %v1588_v12  ;;  %v1778_v60 = vpack.c.bf16 %v1738_v37, %v1733_v32  ;;  %v1705_v5 = vrot.slane %v1680_v3, 2  ;;  %v3714_v41 = vld [vmem:[%s2373_s29 + $0x24] ss:$8 sps:$4 sm:$0xff]  }
 0x30e   : > { %1725 = vst.msk [vmem:[#allocation2 + $0xe8] sm:$0xff] %vm61_vm0, %v1702_v48  ;;  %v1748_v16 = vld [vmem:[#allocation2 + $0xd8] sm:$0xff] }
 0x30f   : > { %v932_v40 = vpop.permute.xlu0 %931  ;;  %2212 = vmatmul.mubr.bf16.vlgmr.msra.gmra.mrb[20].mxu0 %v1778_v60 }
 0x310   : > { %v942_v61 = vmul.f32 %v932_v40, %v4744_v17  ;;  %v1383_v51 = vpop.permute.xlu1 %1382  ;;  %2438 = vmatpush1.bf16.msra.mxu0 %v3706_v24 }
 0x311   : > { %1410 = vst.msk [vmem:[#allocation2 + $0xb0] sm:$0xff] %vm1002_vm7, %v1383_v51  ;;  %2439 = vmatprep.subr.bf16.mxu0 %v3711_v13 }
 0x312   : > { %v968_v57 = vrot.slane %v942_v61, 7 }
 0x313   : > { %2244 = vmatmul.mubr.bf16.gmra.mrb[28].mxu1 %v1798_v34 }
 0x314   : > { %988 = vrot.lane.b32.xlu1 %v968_v57, %s3897_s2  ;;  %v1631_v20 = vpop.permute.xlu0 %1630  ;;  %v969_v44 = vsel %vm952_vm1, %v966_v53, %v968_v57  ;;  %v1661_v36 = vpop.permute.xlu1 %1660  ;;  %v1744_v27 = vld [vmem:[#allocation2 + $0xb8] sm:$0xff]  ;;  %3296 = vmatprep.mubr.msk.bf16.mxu1 %vm3899_vm9, %v3898_v25 }
 0x315   : > { %986 = vrot.lane.b32.xlu0 %v969_v44, %s3897_s2  ;;  %v1679_v26 = vmul.f32 %v1661_v36, %v4692_v52  ;;  %v1784_v59 = vpack.c.bf16 %v1749_v58, %v1744_v27  ;;  %v1750_v38 = vld [vmem:[#allocation2 + $0xe8] sm:$0xff]  ;;  %2440 = vmatpush1.bf16.msra.mxu0 %v3709_v46 }
 0x316   : > { %v1785_v7 = vpack.c.bf16 %v1750_v38, %v1745_v1  ;;  %2441 = vmatprep.subr.bf16.mxu0 %v3714_v41 }
 0x317   : > { %v1703_v8 = vrot.slane %v1679_v26, 2  ;;  %2219 = vmatprep.mubr.bf16.mxu0 %v1784_v59 }
 0x318   : > { %1376 = vrot.lane.b32.xlu1 %v1359_v39, %s3897_s2  ;;  %v1671_v53 = vpop.permute.xlu1 %1670  ;;  %v1743_v14 = vld [vmem:[#allocation2 + $0xb0] sm:$0xff]  ;;  %v1193_v63 = vpop.permute.xlu0 %1192 }
 0x319   : > { %v1704_v21 = vsel %vm1691_vm5, %v1701_v9, %v1703_v8  ;;  %v1706_v23 = vsel %vm1691_vm5, %v1703_v8, %v1705_v5  ;;  %v1681_v52 = vmul.f32 %v1671_v53, %v4744_v17  ;;  %v1783_v42 = vpack.c.bf16 %v1748_v16, %v1743_v14  ;;  %2442 = vmatpush1.bf16.msra.mxu0 %v3712_v56 }
 0x31a   : > { %1726 = vst.msk [vmem:[#allocation2 + $0x110] sm:$0xff] %vm61_vm0, %v1704_v21  ;;  %1727 = vst.msk [vmem:[#allocation2 + $0x138] sm:$0xff] %vm61_vm0, %v1706_v23  ;;  %2443 = vmatprep.subr.bf16.mxu0 %v3717_v6 }
 0x31b   : > { %v1707_v28 = vrot.slane %v1681_v52, 2  ;;  %2220 = vmatmul.mubr.bf16.gmra.mrb[24].mxu0 %v1783_v42  ;;  %3297 = vmatmul.mubr.msk.bf16.vlgmr.msra.gmra.mrb[32].mxu1 %vm61_vm0, %v1780_v33 }
 0x31c   : > { %3300 = vmatprep.mubr.msk.bf16.mxu1 %vm3899_vm9, %v3898_v25  ;;  %2469 = vmatprep.mubr.bf16.mxu0 %v5595_v31 }
 0x31d   : > { %v1708_v18 = vsel %vm1691_vm5, %v1705_v5, %v1707_v28  ;;  %1730 = vst.msk [vmem:[#allocation2 + $0x188] sm:$0x3f] %vm1729_vm10, %v1707_v28  ;;  %v1502_v39 = vpop.permute.xlu1 %1501 }
 0x31e   : > { %1728 = vst.msk [vmem:[#allocation2 + $0x160] sm:$0xff] %vm61_vm0, %v1708_v18  ;;  %v1544_v17 = vmul.f32 %v1502_v39, %v4593_v47 }
 0x320   : > { %v1562_v45 = vrot.slane %v1544_v17, 1 }
 0x321   : > { %v1755_v55 = vld [vmem:[#allocation2 + $0x110] sm:$0xff]  ;;  %v1760_v47 = vld [vmem:[#allocation2 + $0x138] sm:$0xff] }
 0x322   : > { %v820_v54 = vpop.permute.xlu1 %819  ;;  %1579 = vrot.lane.b32.xlu0 %v1562_v45, %s3897_s2  ;;  %v1564_v30 = vsel %vm1358_vm4, %v1562_v45, %v1563_v49  ;;  %v1790_v15 = vpack.c.bf16 %v1760_v47, %v1755_v55 }
 0x323   : > { %3301 = vmatmul.mubr.msk.bf16.gmra.mrb[36].mxu1 %vm61_vm0, %v1785_v7  ;;  %1581 = vrot.lane.b32.xlu1 %v1564_v30, %s3897_s2 }
 0x324   : > { %3304 = vmatprep.mubr.msk.bf16.mxu1 %vm3899_vm9, %v3898_v25  ;;  %v1770_v49 = vld [vmem:[#allocation2 + $0x188] sm:$0xff] }
 0x325   : > { %v1765_v50 = vld [vmem:[#allocation2 + $0x160] sm:$0xff] }
 0x326   : > { %v1795_v10 = vpack.c.bf16 %v1770_v49, %v1765_v50 }
 0x327   : > { %v1065_v11 = vpop.permute.xlu1 %1064 }
 0x32b   : > { %3305 = vmatmul.mubr.msk.bf16.gmra.mrb[40].mxu1 %vm61_vm0, %v1790_v15 }
 0x32c   : > { %v1430_v2 = vpop.permute.xlu1 %1429  ;;  %3308 = vmatprep.mubr.msk.bf16.mxu1 %vm3899_vm9, %v3898_v25 }
 0x333   : > { %3309 = vmatmul.mubr.msk.bf16.gmra.mrb[44].mxu1 %vm61_vm0, %v1795_v10 }
 0x334   : > { %3312 = vmatprep.mubr.msk.bf16.mxu1 %vm3899_vm9, %v3898_v25  ;;  %v3715_v25 = vld [vmem:[%s2373_s29 + $0x30] ss:$8 sps:$4 sm:$0xff]  }
 0x335   : > { %2444 = vmatpush1.bf16.msra.mxu0 %v3715_v25 }
 0x33b   : > { %3313 = vmatmul.mubr.msk.bf16.gmra.mrb[48].mxu1 %vm61_vm0, %v1800_v35 }
 0x386   : > { %v989_v29 = vpop.permute.xlu1 %988 }
 0x387   : > { %v987_v19 = vpop.permute.xlu0 %986 }
 0x38a   : > { %v1377_v9 = vpop.permute.xlu1 %1376  ;;  %v3157_v12 = vpop.f32.mrb[0].mxu1 }
 0x38b   : > { %v3158_v32 = vpop.f32.mrb[1].mxu1 }
 0x38c   : > { %v3159_v37 = vadd.f32 %v3158_v32, %v3157_v12  ;;  %v3160_v48 = vpop.f32.mrb[2].mxu1  ;;  %v5200_v12 = vld [vmem:[%s2323_s18] ss:$0 sm:$0xff] }
 0x38d   : > { %v3161_v60 = vpop.f32.mrb[3].mxu1 }
 0x38e   : > { %v3162_v40 = vadd.f32 %v3161_v60, %v3160_v48  ;;  %v5202_v60 = vld [vmem:[%s2340_s22] ss:$0 sm:$0xff] }
 0x394   : > { %v1580_v4 = vpop.permute.xlu0 %1579 }
 0x395   : > { %v1582_v61 = vpop.permute.xlu1 %1581 }
 0x397   : > { %v3163_v51 = vpop.f32.mrb[4].mxu1 }
 0x398   : > { %v3164_v57 = vpop.f32.mrb[5].mxu1 }
 0x399   : > { %v5178_v34 = vadd.f32 %v3164_v57, %v3163_v51  ;;  %v3166_v3 = vpop.f32.mrb[6].mxu1 }
 0x39a   : > { %v3167_v20 = vpop.f32.mrb[7].mxu1 }
 0x39b   : > { %v5180_v44 = vadd.f32 %v3167_v20, %v3166_v3 }
 0x3a5   : > { %v3169_v36 = vpop.f32.mrb[8].mxu1 }
 0x3a6   : > { %v3170_v27 = vpop.f32.mrb[9].mxu1 }
 0x3a7   : > { %v3171_v58 = vadd.f32 %v3170_v27, %v3169_v36  ;;  %v3172_v26 = vpop.f32.mrb[10].mxu1 }
 0x3a8   : > { %v3173_v59 = vpop.f32.mrb[11].mxu1 }
 0x3a9   : > { %v3174_v43 = vadd.f32 %v3173_v59, %v3172_v26 }
 0x3b2   : > { %v3175_v5 = vpop.f32.mrb[12].mxu1 }
 0x3b3   : > { %v3176_v8 = vpop.f32.mrb[13].mxu1 }
 0x3b4   : > { %v3177_v62 = vadd.f32 %v3176_v8, %v3175_v5  ;;  %v3178_v53 = vpop.f32.mrb[14].mxu1 }
 0x3b5   : > { %v3179_v14 = vpop.f32.mrb[15].mxu1 }
 0x3b6   : > { %v3180_v16 = vadd.f32 %v3179_v14, %v3178_v53 }
 0x3ba   : > { %v3181_v33 = vpop.f32.mrb[16].mxu1 }
 0x3bb   : > { %v3182_v21 = vpop.f32.mrb[17].mxu1 }
 0x3bc   : > { %v3183_v23 = vadd.f32 %v3182_v21, %v3181_v33  ;;  %v3184_v52 = vpop.f32.mrb[18].mxu1 }
 0x3bd   : > { %v3185_v42 = vpop.f32.mrb[19].mxu1 }
 0x3c2   : > { %v3215_v28 = vpop.f32.mrb[20].mxu1 }
 0x3c3   : > { %v3216_v18 = vpop.f32.mrb[21].mxu1 }
 0x3c4   : > { %v3217_v39 = vadd.f32 %v3216_v18, %v3215_v28  ;;  %v3218_v17 = vpop.f32.mrb[22].mxu1 }
 0x3c5   : > { %v3219_v38 = vpop.f32.mrb[23].mxu1 }
 0x3c6   : > { %v3220_v45 = vadd.f32 %v3219_v38, %v3218_v17  ;;  %v5182_v1 = vadd.f32 %v3217_v39, %v3171_v58 }
 0x3c8   : > { %v5184_v7 = vadd.f32 %v3220_v45, %v3174_v43 }
 0x3de   : > { %v3221_v54 = vpop.f32.mrb[24].mxu1 }
 0x3df   : > { %v3222_v30 = vpop.f32.mrb[25].mxu1 }
 0x3e0   : > { %v3223_v55 = vadd.f32 %v3222_v30, %v3221_v54  ;;  %v3224_v47 = vpop.f32.mrb[26].mxu1 }
 0x3e1   : > { %v3225_v11 = vpop.f32.mrb[27].mxu1 }
 0x3e2   : > { %v3226_v15 = vadd.f32 %v3225_v11, %v3224_v47  ;;  %v3203_v63 = vpop.f32.mrb[20].mxu0  ;;  %v5186_v2 = vadd.f32 %v3223_v55, %v3177_v62 }
 0x3e3   : > { %v3204_v50 = vpop.f32.mrb[21].mxu0 }
 0x3e4   : > { %v3205_v49 = vadd.f32 %v3204_v50, %v3203_v63  ;;  %v3206_v10 = vpop.f32.mrb[22].mxu0  ;;  %v5188_v0 = vadd.f32 %v3226_v15, %v3180_v16 }
 0x3e5   : > { %v3207_v35 = vpop.f32.mrb[23].mxu0 }
 0x3e6   : > { %v3208_v24 = vadd.f32 %v3207_v35, %v3206_v10  ;;  %v3227_v22 = vpop.f32.mrb[28].mxu1  ;;  %v2214_v46 = vadd.f32 %v3205_v49, %v3159_v37 }
 0x3e7   : > { %v3228_v13 = vpop.f32.mrb[29].mxu1 }
 0x3e8   : > { %v3229_v56 = vadd.f32 %v3228_v13, %v3227_v22  ;;  %v3230_v41 = vpop.f32.mrb[30].mxu1  ;;  %v2217_v25 = vadd.f32 %v3208_v24, %v3162_v40 }
 0x3e9   : > { %v3231_v6 = vpop.f32.mrb[31].mxu1 }
 0x3ea   : > { %v5190_v29 = vadd.f32 %v3229_v56, %v3183_v23 }
 0x3ee   : > { %v3209_v19 = vpop.f32.mrb[24].mxu0  ;;  %v2285_v9 = vpop.f32.mrb[32].mxu1 }
 0x3ef   : > { %v2286_v32 = vadd.f32 %v2285_v9, %v2214_v46  ;;  %v3210_v37 = vpop.f32.mrb[25].mxu0  ;;  %v3298_v48 = vpop.f32.mrb[33].mxu1 }
 0x3f0   : > { %v3211_v40 = vadd.f32 %v3210_v37, %v3209_v19  ;;  %v3212_v4 = vpop.f32.mrb[26].mxu0  ;;  %v2288_v61 = vpop.f32.mrb[34].mxu1 }
 0x3f1   : > { %v2331_v51 = vmul.f32 %v5200_v12, %v2286_v32  ;;  %v2289_v57 = vadd.f32 %v2288_v61, %v2217_v25  ;;  %v3213_v3 = vpop.f32.mrb[27].mxu0  ;;  %v3299_v20 = vpop.f32.mrb[35].mxu1 }
 0x3f2   : > { %v3214_v36 = vadd.f32 %v3213_v3, %v3212_v4  ;;  %v2222_v27 = vadd.f32 %v3211_v40, %v5178_v34  ;;  %v5598_v3 = vld [vmem:[#allocation20_spill] sm:$0xff] }
 0x3f3   : > { %v2348_v58 = vadd.f32 %v5202_v60, %v2331_v51  ;;  %v2332_v26 = vmul.f32 %v5200_v12, %v2289_v57 }
 0x3f4   : > { %v2225_v59 = vadd.f32 %v3214_v36, %v5180_v44  ;;  %v5600_v36 = vld [vmem:[#allocation19_spill] sm:$0xff] }
 0x3f5   : > { %v2349_v43 = vadd.f32 %v5202_v60, %v2332_v26  ;;  %v2357_v8 = vmax.f32 %v2348_v58, 0.0  ;;  %v5602_v58 = vld [vmem:[#allocation18_spill] sm:$0xff] }
 0x3f6   : > { %v2293_v5 = vpop.f32.mrb[36].mxu1 }
 0x3f7   : > { %v2358_v62 = vmax.f32 %v2349_v43, 0.0  ;;  %v2294_v53 = vadd.f32 %v2293_v5, %v2222_v27  ;;  %v3302_v14 = vpop.f32.mrb[37].mxu1  ;;  %v5606_v5 = vld [vmem:[#allocation16_spill] sm:$0xff] }
 0x3f8   : > { %v2296_v16 = vpop.f32.mrb[38].mxu1 }
 0x3f9   : > { %v2366_v33 = vpack.c.bf16 %v2358_v62, %v2357_v8  ;;  %v2333_v21 = vmul.f32 %v5200_v12, %v2294_v53  ;;  %v2297_v23 = vadd.f32 %v2296_v16, %v2225_v59  ;;  %v3303_v52 = vpop.f32.mrb[39].mxu1  ;;  %v5604_v59 = vld [vmem:[#allocation17_spill] sm:$0xff]  ;;  %v5608_v53 = vld [vmem:[#allocation15_spill] sm:$0xff] }
 0x3fb   : > { %v2350_v34 = vadd.f32 %v5202_v60, %v2333_v21  ;;  %v2334_v42 = vmul.f32 %v5200_v12, %v2297_v23  ;;  %3069 = vmatmul.mubr.msk.bf16.vlgmr.msra.gmra.mrb[28].mxu0 %vm61_vm0, %v2366_v33  ;;  %v5610_v33 = vld [vmem:[#allocation14_spill] sm:$0xff] }
 0x3fc   : > { %2479 = vmatprep.mubr.bf16.mxu0 %v5595_v31 }
 0x3fd   : > { %v2351_v44 = vadd.f32 %v5202_v60, %v2334_v42  ;;  %v2359_v18 = vmax.f32 %v2350_v34, 0.0  ;;  %v5612_v34 = vld [vmem:[#allocation13_spill] sm:$0xff] }
 0x3fe   : > { %v2301_v28 = vpop.f32.mrb[40].mxu1 }
 0x3ff   : > { %v2360_v39 = vmax.f32 %v2351_v44, 0.0  ;;  %v2302_v17 = vadd.f32 %v2301_v28, %v5182_v1  ;;  %v3306_v38 = vpop.f32.mrb[41].mxu1  ;;  %v5614_v28 = vld [vmem:[#allocation12_spill] sm:$0xff] }
 0x400   : > { %v2304_v45 = vpop.f32.mrb[42].mxu1 }
 0x401   : > { %v2335_v54 = vmul.f32 %v5200_v12, %v2302_v17  ;;  %v2305_v30 = vadd.f32 %v2304_v45, %v5184_v7  ;;  %v3307_v55 = vpop.f32.mrb[43].mxu1  ;;  %v2367_v47 = vpack.c.bf16 %v2360_v39, %v2359_v18  ;;  %v5616_v17 = vld [vmem:[#allocation11_spill] sm:$0xff]  ;;  %v5618_v45 = vld [vmem:[#allocation10_spill] sm:$0xff] }
 0x402   : > { %v5620_v55 = vld [vmem:[#allocation9_spill] sm:$0xff] }
 0x403   : > { %v2352_v11 = vadd.f32 %v5202_v60, %v2335_v54  ;;  %v2336_v15 = vmul.f32 %v5200_v12, %v2305_v30  ;;  %3070 = vmatmul.mubr.msk.bf16.gmra.mrb[32].mxu0 %vm61_vm0, %v2367_v47 }
 0x404   : > { %2489 = vmatprep.mubr.bf16.mxu0 %v5595_v31 }
 0x405   : > { %v2353_v63 = vadd.f32 %v5202_v60, %v2336_v15  ;;  %v2361_v1 = vmax.f32 %v2352_v11, 0.0  ;;  %v5622_v15 = vld [vmem:[#allocation8_spill] sm:$0xff] }
 0x406   : > { %v2309_v50 = vpop.f32.mrb[44].mxu1 }
 0x407   : > { %v2362_v49 = vmax.f32 %v2353_v63, 0.0  ;;  %v2310_v10 = vadd.f32 %v2309_v50, %v5186_v2  ;;  %v3310_v35 = vpop.f32.mrb[45].mxu1 }
 0x408   : > { %v2312_v24 = vpop.f32.mrb[46].mxu1 }
 0x409   : > { %v2337_v7 = vmul.f32 %v5200_v12, %v2310_v10  ;;  %v2313_v22 = vadd.f32 %v2312_v24, %v5188_v0  ;;  %v3311_v46 = vpop.f32.mrb[47].mxu1  ;;  %v2368_v13 = vpack.c.bf16 %v2362_v49, %v2361_v1  ;;  %v5624_v49 = vld [vmem:[#allocation7_spill] sm:$0xff]  ;;  %v5626_v24 = vld [vmem:[#allocation6_spill] sm:$0xff] }
 0x40b   : > { %v2354_v56 = vadd.f32 %v5202_v60, %v2337_v7  ;;  %v2338_v41 = vmul.f32 %v5200_v12, %v2313_v22  ;;  %3071 = vmatmul.mubr.msk.bf16.gmra.mrb[36].mxu0 %vm61_vm0, %v2368_v13 }
 0x40c   : > { %2499 = vmatprep.mubr.bf16.mxu0 %v5595_v31 }
 0x40d   : > { %v2355_v25 = vadd.f32 %v5202_v60, %v2338_v41  ;;  %v2363_v2 = vmax.f32 %v2354_v56, 0.0  ;;  %v5630_v41 = vld [vmem:[#allocation4_spill] sm:$0xff] }
 0x40e   : > { %v2317_v6 = vpop.f32.mrb[48].mxu1 }
 0x40f   : > { %v2364_v19 = vmax.f32 %v2355_v25, 0.0  ;;  %v2318_v9 = vadd.f32 %v2317_v6, %v5190_v29  ;;  %v3314_v32 = vpop.f32.mrb[49].mxu1  ;;  %v5632_v6 = vld [vmem:[#allocation3_spill] sm:$0xff] }
 0x410   : > { %v2320_v37 = vpop.f32.mrb[50].mxu1  ;;  %v3719_v32 = vld [vmem:[%s5519_s14 + $0x40] sm:$0xff] (%p5293_p0)  }
 0x411   : > { %v2339_v0 = vmul.f32 %v5200_v12, %v2318_v9  ;;  %v3315_v48 = vpop.f32.mrb[51].mxu1  ;;  %v2369_v40 = vpack.c.bf16 %v2364_v19, %v2363_v2  ;;  %v3720_v37 = vld [vmem:[%s5519_s14] sm:$0xff] (%p5293_p0)   ;;  %3242 = vmatprep.subr.bf16.mxu0 (%p5293_p0), %v3719_v32  ;;  %3364 = vmatprep.subr.bf16.mxu1 (%p5293_p0), %v3719_v32 }
 0x412   :  { %3243 = vmatpush3.bf16.msra.mxu0 (%p5293_p0), %v3720_v37  ;;  %3372 = vmatpush3.bf16.msra.mxu1 (%p5293_p0), %v3720_v37 }
 0x413   : > { %v2356_v4 = vadd.f32 %v5202_v60, %v2339_v0  ;;  %3072 = vmatmul.mubr.msk.bf16.gmra.mrb[40].mxu0 %vm61_vm0, %v2369_v40  ;;  %v3721_v0 = vld [vmem:[%s5519_s14 + $0x48] sm:$0xff] (%p5293_p0)  }
 0x414   : > { %2509 = vmatprep.mubr.bf16.mxu0 %v5595_v31  ;;  %v3722_v40 = vld [vmem:[%s5519_s14 + $0x8] sm:$0xff] (%p5293_p0)   ;;  %3244 = vmatprep.subr.bf16.mxu0 (%p5293_p0), %v3721_v0 }
 0x415   : > { %v2365_v61 = vmax.f32 %v2356_v4, 0.0  ;;  %3365 = vmatprep.subr.bf16.mxu1 (%p5293_p0), %v3721_v0  ;;  %v3724_v4 = vld [vmem:[%s5519_s14 + $0x10] sm:$0xff] (%p5293_p0)  }
 0x416   :  { %3245 = vmatpush3.bf16.msra.mxu0 (%p5293_p0), %v3722_v40  ;;  %3373 = vmatpush3.bf16.msra.mxu1 (%p5293_p0), %v3722_v40 }
 0x417   : > { %v2370_v51 = vpack.c.bf16 %v2365_v61, %v2365_v61 }
 0x41b   : > { %3073 = vmatmul.mubr.msk.bf16.gmra.mrb[44].mxu0 %vm61_vm0, %v2370_v51 }
 0x4ce   : > { %v2471_v57 = vpop.f32.mrb[28].mxu0 }
 0x4cf   : > { %v5239_v44 = vadd.f32 %v5598_v3, %v2471_v57   ;;  %v2473_v20 = vpop.f32.mrb[29].mxu0  ;;  %v3727_v57 = vld [vmem:[%s5519_s14 + $0x60] sm:$0xff] (%p5293_p0)  }
 0x4d0   : > { %v5242_v46 = vadd.f32 %v5600_v36, %v2473_v20   ;;  %v2475_v27 = vpop.f32.mrb[30].mxu0  ;;  %v3728_v3 = vld [vmem:[%s5519_s14 + $0x20] sm:$0xff] (%p5293_p0)   ;;  %v3729_v20 = vld [vmem:[%s5519_s14 + $0x68] sm:$0xff] (%p5293_p0)  }
 0x4d1   : > { %v5599_v29 = vmov %v5239_v44  ;;  %v5245_v48 = vadd.f32 %v5602_v58, %v2475_v27   ;;  %v2477_v60 = vpop.f32.mrb[31].mxu0  ;;  %v2536_v36 = vld [vmem:[%s5517_s12] sm:$0x3] (%p5293_p0) }
 0x4d2   : > { %v5601_v12 = vmov %v5242_v46  ;;  %v5248_v50 = vadd.f32 %v5604_v59, %v2477_v60   ;;  %v5628_v46 = vld [vmem:[#allocation5_spill] sm:$0xff]  ;;  %v2566_v27 = vld [vmem:[%s5518_s13] sm:$0x3] (%p5293_p0)  ;;  %v5654_v59 = vld [vmem:[#allocation22_spill] sm:$0xff] (%p5293_p0) }
 0x4d3   : > { %v5603_v26 = vmov %v5245_v48 }
 0x4d4   : > { %v5605_v31 = vmov %v5248_v50  ;;  %v5650_v48 = vmov %v5603_v26 }
 0x4d5   :  { %v3723_v48 = vld [vmem:[%s5519_s14 + $0x50] sm:$0xff] (%p5293_p0)  }
 0x4d6   : > { %v2481_v43 = vpop.f32.mrb[32].mxu0  ;;  %3246 = vmatprep.subr.bf16.mxu0 (%p5293_p0), %v3723_v48  ;;  %3366 = vmatprep.subr.bf16.mxu1 (%p5293_p0), %v3723_v48 }
 0x4d7   : > { %v5251_v52 = vadd.f32 %v5606_v5, %v2481_v43   ;;  %v2483_v62 = vpop.f32.mrb[33].mxu0  ;;  %3247 = vmatpush3.bf16.msra.mxu0 (%p5293_p0), %v3724_v4  ;;  %3374 = vmatpush3.bf16.msra.mxu1 (%p5293_p0), %v3724_v4  ;;  %v2545_v43 = vrot.slane (%p5293_p0), %v2536_v36, %v5654_v59 }
 0x4d8   : > { %v5254_v54 = vadd.f32 %v5608_v53, %v2483_v62   ;;  %v2485_v16 = vpop.f32.mrb[34].mxu0 }
 0x4d9   : > { %v5607_v8 = vmov %v5251_v52  ;;  %v5257_v56 = vadd.f32 %v5610_v33, %v2485_v16   ;;  %v2487_v23 = vpop.f32.mrb[35].mxu0  ;;  %v2549_v16 = vmul.f32 (%p5293_p0), %v2545_v43, %v5601_v12  ;;  %v2551_v33 = vmul.f32 (%p5293_p0), %v2545_v43, %v5605_v31 }
 0x4da   : > { %v5609_v14 = vmov %v5254_v54  ;;  %v5260_v58 = vadd.f32 %v5612_v34, %v2487_v23   ;;  %v3731_v34 = vld [vmem:[%s5519_s14 + $0x70] sm:$0xff] (%p5293_p0)  }
 0x4db   : > { %v5611_v21 = vmov %v5257_v56 }
 0x4dc   : > { %v5613_v42 = vmov %v5260_v58 }
 0x4dd   : > { %v5645_v58 = vmov %v5613_v42 }
 0x4de   : > { %v2491_v44 = vpop.f32.mrb[36].mxu0  ;;  %v5653_v58 = vld [vmem:[#allocation21_spill] sm:$0xff] (%p5293_p0) }
 0x4df   : > { %v5263_v60 = vadd.f32 %v5614_v28, %v2491_v44   ;;  %v2493_v39 = vpop.f32.mrb[37].mxu0  ;;  %v5652_v44 = vmov %v5599_v29  ;;  %v5399_v5 = vrot.slane (%p5293_p0), %v2566_v27, %v5653_v58 }
 0x4e0   : > { %v5266_v61 = vadd.f32 %v5616_v17, %v2493_v39   ;;  %v2495_v52 = vpop.f32.mrb[38].mxu0 }
 0x4e1   : > { %v5615_v18 = vmov %v5263_v60  ;;  %v5269_v62 = vadd.f32 %v5618_v45, %v2495_v52   ;;  %v2497_v54 = vpop.f32.mrb[39].mxu0  ;;  %v5648_v52 = vmov %v5607_v8 }
 0x4e2   : > { %v5617_v38 = vmov %v5266_v61  ;;  %v5272_v63 = vadd.f32 %v5620_v55, %v2497_v54   ;;  %v5644_v60 = vmov %v5615_v18  ;;  %v5647_v54 = vmov %v5609_v14 }
 0x4e3   : > { %v5619_v30 = vmov %v5269_v62  ;;  %v5643_v61 = vmov %v5617_v38  ;;  %v5395_v60 = vrot.slane (%p5293_p0), %v2536_v36, %v5653_v58  ;;  %v2557_v48 = vmul.f32 (%p5293_p0), %v2545_v43, %v5617_v38 }
 0x4e4   : > { %v5621_v11 = vmov %v5272_v63  ;;  %v5642_v62 = vmov %v5619_v30  ;;  %v3725_v61 = vld [vmem:[%s5519_s14 + $0x58] sm:$0xff] (%p5293_p0)  }
 0x4e5   :  { %3248 = vmatprep.subr.bf16.mxu0 (%p5293_p0), %v3725_v61  ;;  %3367 = vmatprep.subr.bf16.mxu1 (%p5293_p0), %v3725_v61  ;;  %v5402_v62 = vrot.slane (%p5293_p0), %v2566_v27, %v5654_v59  ;;  %v2548_v23 = vmul.f32 (%p5293_p0), %v5395_v60, %v5599_v29  ;;  %v2550_v44 = vmul.f32 (%p5293_p0), %v5395_v60, %v5603_v26 }
 0x4e6   : > { %v2501_v47 = vpop.f32.mrb[40].mxu0  ;;  %v2553_v29 = vmul.f32 (%p5293_p0), %v2545_v43, %v5609_v14  ;;  %v2555_v26 = vmul.f32 (%p5293_p0), %v2545_v43, %v5613_v42  ;;  %v3733_v14 = vld [vmem:[%s5519_s14 + $0x78] sm:$0xff] (%p5293_p0)  }
 0x4e7   : > { %v5275_v45 = vadd.f32 %v5622_v15, %v2501_v47   ;;  %v2503_v50 = vpop.f32.mrb[41].mxu0  ;;  %v2578_v17 = vadd.f32 (%p5293_p0), %v5399_v5, %v2548_v23  ;;  %v2580_v52 = vadd.f32 (%p5293_p0), %v5399_v5, %v2550_v44 }
 0x4e8   : > { %v5278_v47 = vadd.f32 %v5624_v49, %v2503_v50   ;;  %v2505_v35 = vpop.f32.mrb[42].mxu0  ;;  %v5649_v50 = vmov %v5605_v31  ;;  %v2581_v31 = vadd.f32 (%p5293_p0), %v5402_v62, %v2551_v33 }
 0x4e9   : > { %v5623_v1 = vmov %v5275_v45  ;;  %v5281_v49 = vadd.f32 %v5626_v24, %v2505_v35   ;;  %v2507_v22 = vpop.f32.mrb[43].mxu0  ;;  %v2596_v50 = vmax.f32 (%p5293_p0), %v2578_v17, 0.0  ;;  %v2585_v24 = vadd.f32 (%p5293_p0), %v5402_v62, %v2555_v26 }
 0x4ea   : > { %v5625_v10 = vmov %v5278_v47  ;;  %v5284_v51 = vadd.f32 %v5628_v46, %v2507_v22   ;;  %v5640_v45 = vmov %v5623_v1  ;;  %v5651_v46 = vmov %v5601_v12 }
 0x4eb   : > { %v5627_v7 = vmov %v5281_v49  ;;  %v5639_v47 = vmov %v5625_v10  ;;  %v2561_v28 = vmul.f32 (%p5293_p0), %v2545_v43, %v5625_v10  ;;  %v2579_v12 = vadd.f32 (%p5293_p0), %v5402_v62, %v2549_v16 }
 0x4ec   : > { %v5629_v13 = vmov %v5284_v51  ;;  %v5638_v49 = vmov %v5627_v7  ;;  %v2599_v15 = vmax.f32 (%p5293_p0), %v2581_v31, 0.0  ;;  %v2598_v10 = vmax.f32 (%p5293_p0), %v2580_v52, 0.0 }
 0x4ed   : > { %v5637_v51 = vmov %v5629_v13  ;;  %411 = sbr.rel (!%p5293_p0) target bundleno = 305 (0x131), region = 104  ;;  %v2563_v39 = vmul.f32 (%p5293_p0), %v2545_v43, %v5629_v13  ;;  %v2591_v45 = vadd.f32 (%p5293_p0), %v5402_v62, %v2561_v28  ;;  %v2597_v47 = vmax.f32 (%p5293_p0), %v2579_v12, 0.0  ;;  %v3090_v12 = vld [vmem:[%s5520_s15] ss:$0 sm:$0xff] (%p5293_p0) }
 0x4ee   : > { %v2511_v56 = vpop.f32.mrb[44].mxu0  ;;  %v3726_v51 = vld [vmem:[%s5519_s14 + $0x18] sm:$0xff] (%p5293_p0)   ;;  %v2583_v49 = vadd.f32 (%p5293_p0), %v5402_v62, %v2553_v29  ;;  %v2560_v46 = vmul.f32 (%p5293_p0), %v5395_v60, %v5623_v1  ;;  %v2562_v13 = vmul.f32 (%p5293_p0), %v5395_v60, %v5627_v7  ;;  %v2554_v1 = vmul.f32 (%p5293_p0), %v5395_v60, %v5611_v21 }
 0x4ef   : > { %v5287_v53 = vadd.f32 %v5630_v41, %v2511_v56   ;;  %v2513_v63 = vpop.f32.mrb[45].mxu0  ;;  %v5646_v56 = vmov %v5611_v21  ;;  %3249 = vmatpush3.bf16.msra.mxu0 (%p5293_p0), %v3726_v51  ;;  %3375 = vmatpush3.bf16.msra.mxu1 (%p5293_p0), %v3726_v51  ;;  %v2593_v54 = vadd.f32 (%p5293_p0), %v5402_v62, %v2563_v39  ;;  %v2609_v35 = vmax.f32 (%p5293_p0), %v2591_v45, 0.0 }
 0x4f0   : > { %v5290_v55 = vadd.f32 %v5632_v6, %v2513_v63   ;;  %v2515_v19 = vpop.f32.mrb[46].mxu0  ;;  %v5641_v63 = vmov %v5621_v11  ;;  %3250 = vmatprep.subr.bf16.mxu0 (%p5293_p0), %v3727_v57  ;;  %3368 = vmatprep.subr.bf16.mxu1 (%p5293_p0), %v3727_v57  ;;  %v2615_v22 = vpack.c.bf16 (%p5293_p0), %v2599_v15, %v2597_v47  ;;  %v2601_v41 = vmax.f32 (%p5293_p0), %v2583_v49, 0.0  ;;  %v3734_v6 = vld [vmem:[%s5519_s14 + $0x38] sm:$0xff] (%p5293_p0)  }
 0x4f1   : > { %v5631_v25 = vmov %v5287_v53  ;;  %v2516_v9 = vpop.f32.mrb[47].mxu0  ;;  %v2611_v42 = vmax.f32 (%p5293_p0), %v2593_v54, 0.0  ;;  %v2552_v63 = vmul.f32 (%p5293_p0), %v5395_v60, %v5607_v8  ;;  %v2603_v19 = vmax.f32 (%p5293_p0), %v2585_v24, 0.0 }
 0x4f2   : > { %v5633_v2 = vmov %v5290_v55  ;;  %v5636_v53 = vmov %v5631_v25  ;;  %2784 = vmatprep.mubr.bf16.mxu0 (%p5293_p0), %v2615_v22  ;;  %v2590_v9 = vadd.f32 (%p5293_p0), %v5399_v5, %v2560_v46  ;;  %v2592_v32 = vadd.f32 (%p5293_p0), %v5399_v5, %v2562_v13 }
 0x4f3   : > { %v5635_v55 = vmov %v5633_v2  ;;  %3251 = vmatpush3.bf16.msra.mxu0 (%p5293_p0), %v3728_v3  ;;  %v3730_v53 = vld [vmem:[%s5519_s14 + $0x28] sm:$0xff] (%p5293_p0)   ;;  %3376 = vmatpush3.bf16.msra.mxu1 (%p5293_p0), %v3728_v3  ;;  %v2621_v56 = vpack.c.bf16 (%p5293_p0), %v2611_v42, %v2609_v35  ;;  %v2614_v7 = vpack.c.bf16 (%p5293_p0), %v2598_v10, %v2596_v50  ;;  %v2565_v37 = vmul.f32 (%p5293_p0), %v2545_v43, %v5633_v2 }
 0x4f4   :  { %3252 = vmatprep.subr.bf16.mxu0 %v3729_v20  ;;  %3369 = vmatprep.subr.bf16.mxu1 %v3729_v20  ;;  %v3732_v55 = vld [vmem:[%s5519_s14 + $0x30] sm:$0xff]   ;;  %v2608_v8 = vmax.f32 %v2590_v9, 0.0  ;;  %v2610_v0 = vmax.f32 %v2592_v32, 0.0  ;;  %v2582_v40 = vadd.f32 %v5399_v5, %v2552_v63  ;;  %v2584_v4 = vadd.f32 %v5399_v5, %v2554_v1 }
 0x4f5   :  { %2808 = vmatprep.mubr.bf16.mxu1 %v2621_v56  ;;  %v2595_v61 = vadd.f32 %v5402_v62, %v2565_v37  ;;  %v2559_v51 = vmul.f32 %v2545_v43, %v5621_v11  ;;  %v2564_v21 = vmul.f32 %v5395_v60, %v5631_v25  ;;  %v2617_v57 = vpack.c.bf16 %v2603_v19, %v2601_v41 }
 0x4f6   :  { %v2620_v2 = vpack.c.bf16 %v2610_v0, %v2608_v8  ;;  %v2587_v3 = vadd.f32 %v5402_v62, %v2557_v48  ;;  %v2600_v27 = vmax.f32 %v2582_v40, 0.0  ;;  %v2602_v58 = vmax.f32 %v2584_v4, 0.0 }
 0x4f7   :  { %3253 = vmatpush3.bf16.msra.mxu0 %v3730_v53  ;;  %3377 = vmatpush3.bf16.msra.mxu1 %v3730_v53  ;;  %v2613_v20 = vmax.f32 %v2595_v61, 0.0  ;;  %v2589_v36 = vadd.f32 %v5402_v62, %v2559_v51  ;;  %v2594_v38 = vadd.f32 %v5399_v5, %v2564_v21  ;;  %v2556_v11 = vmul.f32 %v5395_v60, %v5615_v18 }
 0x4f8   :  { %3254 = vmatprep.subr.bf16.mxu0 %v3731_v34  ;;  %3370 = vmatprep.subr.bf16.mxu1 %v3731_v34  ;;  %v2558_v25 = vmul.f32 %v5395_v60, %v5619_v30  ;;  %v2605_v43 = vmax.f32 %v2587_v3, 0.0  ;;  %v2616_v33 = vpack.c.bf16 %v2602_v58, %v2600_v27 }
 0x4f9   :  { %v2623_v59 = vpack.c.bf16 %v2613_v20, %v2613_v20  ;;  %v2607_v53 = vmax.f32 %v2589_v36, 0.0  ;;  %v2612_v16 = vmax.f32 %v2594_v38, 0.0  ;;  %v2586_v62 = vadd.f32 %v5399_v5, %v2556_v11 }
 0x4fa   :  { %v2588_v23 = vadd.f32 %v5399_v5, %v2558_v25  ;;  %v3091_v5 = vld [vmem:[%s5521_s16] ss:$0 sm:$0xff] }
 0x4fb   :  { %3255 = vmatpush3.bf16.msra.mxu0 %v3732_v55  ;;  %3378 = vmatpush3.bf16.msra.mxu1 %v3732_v55  ;;  %v2619_v34 = vpack.c.bf16 %v2607_v53, %v2605_v43  ;;  %v2622_v44 = vpack.c.bf16 %v2612_v16, %v2612_v16  ;;  %v2604_v28 = vmax.f32 %v2586_v62, 0.0 }
 0x4fc   :  { %3256 = vmatprep.subr.bf16.mxu0 %v3733_v14  ;;  %3371 = vmatprep.subr.bf16.mxu1 %v3733_v14  ;;  %v2606_v39 = vmax.f32 %v2588_v23, 0.0 }
 0x4fe   :  { %v2618_v18 = vpack.c.bf16 %v2606_v39, %v2604_v28 }
 0x4ff   :  { %3257 = vmatpush3.bf16.msra.mxu0 %v3734_v6  ;;  %3379 = vmatpush3.bf16.msra.mxu1 %v3734_v6 }
 0x502   :  { %2785 = vmatmul.mubr.bf16.vlgmr.msra.gmra.mrb[0].mxu0 %v2614_v7  ;;  %2809 = vmatmul.mubr.bf16.vlgmr.msra.gmra.mrb[0].mxu1 %v2620_v2 }
 0x503   :  { %2792 = vmatprep.mubr.bf16.mxu0 %v2617_v57  ;;  %2816 = vmatprep.mubr.bf16.mxu1 %v2623_v59 }
 0x50a   :  { %2793 = vmatmul.mubr.bf16.gmra.mrb[4].mxu0 %v2616_v33  ;;  %2817 = vmatmul.mubr.bf16.gmra.mrb[4].mxu1 %v2622_v44 }
 0x50b   :  { %2800 = vmatprep.mubr.bf16.mxu0 %v2619_v34 }
 0x512   :  { %2801 = vmatmul.mubr.bf16.gmra.mrb[8].mxu0 %v2618_v18 }
 0x5d5   :  { %v3258_v30 = vpop.f32.mrb[0].mxu0  ;;  %v3276_v31 = vpop.f32.mrb[0].mxu1 }
 0x5d6   :  { %v3259_v60 = vpop.f32.mrb[1].mxu0  ;;  %v3277_v52 = vpop.f32.mrb[1].mxu1 }
 0x5d7   :  { %v3260_v17 = vadd.f32 %v3259_v60, %v3258_v30  ;;  %v3261_v29 = vpop.f32.mrb[2].mxu0  ;;  %v3278_v54 = vadd.f32 %v3277_v52, %v3276_v31  ;;  %v3279_v26 = vpop.f32.mrb[2].mxu1 }
 0x5d8   :  { %v3262_v45 = vpop.f32.mrb[3].mxu0  ;;  %v3280_v15 = vpop.f32.mrb[3].mxu1 }
 0x5d9   :  { %v2831_v55 = vmul.f32 %v3260_v17, %v3090_v12  ;;  %v3263_v47 = vadd.f32 %v3262_v45, %v3261_v29  ;;  %v2837_v50 = vmul.f32 %v3278_v54, %v3090_v12  ;;  %v3281_v49 = vadd.f32 %v3280_v15, %v3279_v26 }
 0x5db   :  { %v2847_v14 = vadd.f32 %v3091_v5, %v2831_v55  ;;  %v2832_v10 = vmul.f32 %v3263_v47, %v3090_v12  ;;  %v2853_v35 = vadd.f32 %v3091_v5, %v2837_v50  ;;  %v2838_v42 = vmul.f32 %v3281_v49, %v3090_v12 }
 0x5dd   :  { %v2856_v24 = vmax.f32 %v2847_v14, 0.0  ;;  %v2848_v22 = vadd.f32 %v3091_v5, %v2832_v10  ;;  %v3264_v46 = vpop.f32.mrb[4].mxu0  ;;  %v2862_v13 = vmax.f32 %v2853_v35, 0.0  ;;  %v2854_v41 = vadd.f32 %v3091_v5, %v2838_v42  ;;  %v3282_v63 = vpop.f32.mrb[4].mxu1 }
 0x5de   :  { %v3265_v56 = vpop.f32.mrb[5].mxu0  ;;  %v3283_v32 = vpop.f32.mrb[5].mxu1 }
 0x5df   :  { %2866 = vst.msk [vmem:[%s5522_s17] sm:$0xff] %vm2865_vm11, %v2856_v24  ;;  %v2857_v6 = vmax.f32 %v2848_v22, 0.0  ;;  %v3266_v19 = vadd.f32 %v3265_v56, %v3264_v46  ;;  %v3267_v9 = vpop.f32.mrb[6].mxu0  ;;  %2872 = vst.msk [vmem:[%s5522_s17 + $0x30] sm:$0xff] %vm2865_vm11, %v2862_v13  ;;  %v2863_v1 = vmax.f32 %v2854_v41, 0.0  ;;  %v3284_v37 = vadd.f32 %v3283_v32, %v3282_v63  ;;  %v3285_v8 = vpop.f32.mrb[6].mxu1 }
 0x5e0   :  { %v3268_v7 = vpop.f32.mrb[7].mxu0  ;;  %v3286_v48 = vpop.f32.mrb[7].mxu1 }
 0x5e1   :  { %2867 = vst.msk [vmem:[%s5522_s17 + $0x8] sm:$0xff] %vm2865_vm11, %v2857_v6  ;;  %v2833_v0 = vmul.f32 %v3266_v19, %v3090_v12  ;;  %v3269_v40 = vadd.f32 %v3268_v7, %v3267_v9  ;;  %2873 = vst.msk [vmem:[%s5522_s17 + $0x38] sm:$0xff] %vm2865_vm11, %v2863_v1  ;;  %v2839_v4 = vmul.f32 %v3284_v37, %v3090_v12 }
 0x5e3   :  { %v2849_v61 = vadd.f32 %v3091_v5, %v2833_v0  ;;  %v2834_v51 = vmul.f32 %v3269_v40, %v3090_v12  ;;  %v2855_v21 = vadd.f32 %v3091_v5, %v2839_v4 }
 0x5e5   :  { %v2858_v57 = vmax.f32 %v2849_v61, 0.0  ;;  %v2850_v2 = vadd.f32 %v3091_v5, %v2834_v51  ;;  %v3270_v3 = vpop.f32.mrb[8].mxu0  ;;  %v2864_v20 = vmax.f32 %v2855_v21, 0.0 }
 0x5e6   :  { %v3271_v36 = vpop.f32.mrb[9].mxu0 }
 0x5e7   :  { %2868 = vst.msk [vmem:[%s5522_s17 + $0x10] sm:$0xff] %vm2865_vm11, %v2858_v57  ;;  %v2859_v38 = vmax.f32 %v2850_v2, 0.0  ;;  %v3272_v27 = vadd.f32 %v3271_v36, %v3270_v3  ;;  %v3273_v58 = vpop.f32.mrb[10].mxu0  ;;  %2874 = vst.msk [vmem:[%s5522_s17 + $0x40] sm:$0xff] %vm2865_vm11, %v2864_v20 }
 0x5e8   :  { %v3274_v59 = vpop.f32.mrb[11].mxu0 }
 0x5e9   :  { %2869 = vst.msk [vmem:[%s5522_s17 + $0x18] sm:$0xff] %vm2865_vm11, %v2859_v38  ;;  %v2835_v11 = vmul.f32 %v3272_v27, %v3090_v12  ;;  %v3275_v25 = vadd.f32 %v3274_v59, %v3273_v58 }
 0x5eb   :  { %v2851_v43 = vadd.f32 %v3091_v5, %v2835_v11  ;;  %v2836_v53 = vmul.f32 %v3275_v25, %v3090_v12 }
 0x5ed   :  { %v2860_v16 = vmax.f32 %v2851_v43, 0.0  ;;  %v2852_v33 = vadd.f32 %v3091_v5, %v2836_v53 }
 0x5ef   :  { %2870 = vst.msk [vmem:[%s5522_s17 + $0x20] sm:$0xff] %vm2865_vm11, %v2860_v16  ;;  %v2861_v62 = vmax.f32 %v2852_v33, 0.0 }
 0x5f1   :  { %2871 = vst.msk [vmem:[%s5522_s17 + $0x28] sm:$0xff] %vm2865_vm11, %v2861_v62 }

// kernel: forward.3
= control target key start
LH: loop header
LB: loop body
LE: loop exit
PB: predicated region body
PF: predicated region fallthrough
CT: control target
= control target key end

     0   :  { %v3739_v36 = vmov 1983009808   ;;  %v37_v38 = vlaneseq  ;;  %s4909_s0 = inlined_call_operand.vmem [shape: f32[2,1152], index: 0, kind: input, shape index: {}]   ;;  %s4910_s1 = inlined_call_operand.vmem [shape: bf16[1152,512], index: 1, kind: input, shape index: {}]   ;;  %s4911_s2 = inlined_call_operand.vmem [shape: f32[1,512], index: 2, kind: input, shape index: {}]   ;;  %s4912_s3 = inlined_call_operand.vmem [shape: bf16[512,236], index: 3, kind: input, shape index: {}]   ;;  %s4913_s4 = inlined_call_operand.vmem [shape: f32[1,236], index: 4, kind: input, shape index: {}]   ;;  %s4914_s5 = inlined_call_operand.vmem [shape: f32[2,235], index: 5, kind: input, shape index: {}]   ;;  %s4915_s6 = inlined_call_operand.hbm [shape: f32[2,235], index: 6, kind: output, shape index: {0}]   ;;  %s4916_s7 = inlined_call_operand.vmem [shape: f32[2,1], index: 7, kind: output, shape index: {1}]  }
   0x1   :  { %v3185_v0 = vld [vmem:[%s4910_s1 + $0x4] ss:$16 sps:$4 sm:$0xff]   ;;  %v3187_v1 = vld [vmem:[%s4910_s1 + $0xc] ss:$16 sps:$4 sm:$0xff]   ;;  %v3189_v2 = vld [vmem:[%s4910_s1] ss:$16 sps:$4 sm:$0xff]   ;;  %v35_v37 = vunpack.c.l.s4 %v3739_v36 }
   0x2   :  { %1842 = vmatprep.subr.bf16.mxu0 %v3185_v0  ;;  %v3190_v3 = vld [vmem:[%s4910_s1 + $0x8] ss:$16 sps:$4 sm:$0xff]   ;;  %2047 = vmatprep.subr.bf16.mxu1 %v3187_v1  ;;  %v3191_v4 = vld [vmem:[%s4910_s1 + $0x24] ss:$16 sps:$4 sm:$0xff]   ;;  %v3193_v5 = vld [vmem:[%s4910_s1 + $0x2c] ss:$16 sps:$4 sm:$0xff]  }
   0x3   :  { %1843 = vmatpush1.bf16.msra.mxu0 %v3189_v2  ;;  %2048 = vmatpush1.bf16.msra.mxu1 %v3190_v3  ;;  %v3195_v6 = vld [vmem:[%s4910_s1 + $0x20] ss:$16 sps:$4 sm:$0xff]   ;;  %v3196_v7 = vld [vmem:[%s4910_s1 + $0x28] ss:$16 sps:$4 sm:$0xff]   ;;  %v3197_v8 = vld [vmem:[%s4910_s1 + $0x44] ss:$16 sps:$4 sm:$0xff]   ;;  %v36_v42 = vunpack.c.0.s8 %v35_v37 }
   0x4   :  { %1844 = vmatprep.subr.bf16.mxu0 %v3191_v4  ;;  %2049 = vmatprep.subr.bf16.mxu1 %v3193_v5  ;;  %v3199_v9 = vld [vmem:[%s4910_s1 + $0x4c] ss:$16 sps:$4 sm:$0xff]   ;;  %v3201_v10 = vld [vmem:[%s4910_s1 + $0x40] ss:$16 sps:$4 sm:$0xff]   ;;  %v3202_v11 = vld [vmem:[%s4910_s1 + $0x48] ss:$16 sps:$4 sm:$0xff]  }
   0x5   :  { %v3203_v12 = vld [vmem:[%s4910_s1 + $0x64] ss:$16 sps:$4 sm:$0xff]   ;;  %v3205_v13 = vld [vmem:[%s4910_s1 + $0x6c] ss:$16 sps:$4 sm:$0xff]   ;;  %v3207_v14 = vld [vmem:[%s4910_s1 + $0x60] ss:$16 sps:$4 sm:$0xff]  }
   0x6   :  { %v3208_v15 = vld [vmem:[%s4910_s1 + $0x68] ss:$16 sps:$4 sm:$0xff]   ;;  %v3209_v16 = vld [vmem:[%s4910_s1 + $0x84] ss:$16 sps:$4 sm:$0xff]   ;;  %v3211_v17 = vld [vmem:[%s4910_s1 + $0x8c] ss:$16 sps:$4 sm:$0xff]  }
   0x7   :  { %1845 = vmatpush1.bf16.msra.mxu0 %v3195_v6  ;;  %2050 = vmatpush1.bf16.msra.mxu1 %v3196_v7  ;;  %v3213_v18 = vld [vmem:[%s4910_s1 + $0x80] ss:$16 sps:$4 sm:$0xff]   ;;  %v3214_v19 = vld [vmem:[%s4910_s1 + $0x88] ss:$16 sps:$4 sm:$0xff]   ;;  %v3215_v20 = vld [vmem:[%s4910_s1 + $0xa4] ss:$16 sps:$4 sm:$0xff]  }
   0x8   :  { %1846 = vmatprep.subr.bf16.mxu0 %v3197_v8  ;;  %2051 = vmatprep.subr.bf16.mxu1 %v3199_v9  ;;  %v3217_v21 = vld [vmem:[%s4910_s1 + $0xac] ss:$16 sps:$4 sm:$0xff]   ;;  %v3219_v22 = vld [vmem:[%s4910_s1 + $0xa0] ss:$16 sps:$4 sm:$0xff]   ;;  %v3220_v23 = vld [vmem:[%s4910_s1 + $0xa8] ss:$16 sps:$4 sm:$0xff]  }
   0x9   :  { %v3221_v24 = vld [vmem:[%s4910_s1 + $0xc4] ss:$16 sps:$4 sm:$0xff]   ;;  %v3223_v25 = vld [vmem:[%s4910_s1 + $0xcc] ss:$16 sps:$4 sm:$0xff]   ;;  %v3225_v26 = vld [vmem:[%s4910_s1 + $0xc0] ss:$16 sps:$4 sm:$0xff]  }
   0xa   :  { %v3226_v27 = vld [vmem:[%s4910_s1 + $0xc8] ss:$16 sps:$4 sm:$0xff]   ;;  %v3227_v28 = vld [vmem:[%s4910_s1 + $0xe4] ss:$16 sps:$4 sm:$0xff]   ;;  %v3229_v29 = vld [vmem:[%s4910_s1 + $0xec] ss:$16 sps:$4 sm:$0xff]  }
   0xb   :  { %1847 = vmatpush1.bf16.msra.mxu0 %v3201_v10  ;;  %2052 = vmatpush1.bf16.msra.mxu1 %v3202_v11  ;;  %v3231_v30 = vld [vmem:[%s4910_s1 + $0xe0] ss:$16 sps:$4 sm:$0xff]   ;;  %v3232_v31 = vld [vmem:[%s4910_s1 + $0xe8] ss:$16 sps:$4 sm:$0xff]   ;;  %v3233_v32 = vld [vmem:[%s4910_s1 + $0x104] ss:$16 sps:$4 sm:$0xff]  }
   0xc   :  { %1848 = vmatprep.subr.bf16.mxu0 %v3203_v12  ;;  %2053 = vmatprep.subr.bf16.mxu1 %v3205_v13  ;;  %v3235_v33 = vld [vmem:[%s4910_s1 + $0x10c] ss:$16 sps:$4 sm:$0xff]   ;;  %v3237_v34 = vld [vmem:[%s4910_s1 + $0x100] ss:$16 sps:$4 sm:$0xff]   ;;  %v3238_v35 = vld [vmem:[%s4910_s1 + $0x108] ss:$16 sps:$4 sm:$0xff]  }
   0xd   :  { %v3239_v39 = vld [vmem:[%s4910_s1 + $0x124] ss:$16 sps:$4 sm:$0xff]   ;;  %v3241_v40 = vld [vmem:[%s4910_s1 + $0x12c] ss:$16 sps:$4 sm:$0xff]   ;;  %v3243_v41 = vld [vmem:[%s4910_s1 + $0x120] ss:$16 sps:$4 sm:$0xff]  }
   0xe   :  { %v3900_v43 = vshrl.u32 %v37_v38, 7  ;;  %v3244_v44 = vld [vmem:[%s4910_s1 + $0x128] ss:$16 sps:$4 sm:$0xff]   ;;  %v3245_v45 = vld [vmem:[%s4910_s1 + $0x144] ss:$16 sps:$4 sm:$0xff]  }
   0xf   :  { %1849 = vmatpush1.bf16.msra.mxu0 %v3207_v14  ;;  %2054 = vmatpush1.bf16.msra.mxu1 %v3208_v15  ;;  %v3247_v46 = vld [vmem:[%s4910_s1 + $0x14c] ss:$16 sps:$4 sm:$0xff]   ;;  %v3249_v47 = vld [vmem:[%s4910_s1 + $0x140] ss:$16 sps:$4 sm:$0xff]   ;;  %v3250_v48 = vld [vmem:[%s4910_s1 + $0x148] ss:$16 sps:$4 sm:$0xff]  }
  0x10   :  { %1850 = vmatprep.subr.bf16.mxu0 %v3209_v16  ;;  %2055 = vmatprep.subr.bf16.mxu1 %v3211_v17  ;;  %v3918_v49 = vsub.s32 %v36_v42, %v3900_v43  ;;  %v3251_v50 = vld [vmem:[%s4910_s1 + $0x164] ss:$16 sps:$4 sm:$0xff]   ;;  %v3253_v51 = vld [vmem:[%s4910_s1 + $0x16c] ss:$16 sps:$4 sm:$0xff]   ;;  %v3255_v53 = vld [vmem:[%s4910_s1 + $0x160] ss:$16 sps:$4 sm:$0xff]  }
  0x11   :  { %v27_v52 = vld [vmem:[%s4909_s0] sm:$0xff]  ;;  %v3256_v55 = vld [vmem:[%s4910_s1 + $0x168] ss:$16 sps:$4 sm:$0xff]   ;;  %v3259_v57 = vld [vmem:[%s4910_s1 + $0x18c] ss:$16 sps:$4 sm:$0xff]  }
  0x12   :  { %v40_v54 = vrot.slane %v27_v52, %v3918_v49  ;;  %v3257_v56 = vld [vmem:[%s4910_s1 + $0x184] ss:$16 sps:$4 sm:$0xff]   ;;  %v3261_v59 = vld [vmem:[%s4910_s1 + $0x180] ss:$16 sps:$4 sm:$0xff]   ;;  %v3262_v61 = vld [vmem:[%s4910_s1 + $0x188] ss:$16 sps:$4 sm:$0xff]   ;;  %v33_v4 = vcombine.high %v27_v52, %v27_v52 }
  0x13   :  { %1851 = vmatpush1.bf16.msra.mxu0 %v3213_v18  ;;  %2056 = vmatpush1.bf16.msra.mxu1 %v3214_v19  ;;  %v3263_v62 = vld [vmem:[%s4910_s1 + $0x1a4] ss:$16 sps:$4 sm:$0xff]   ;;  %v3265_v63 = vld [vmem:[%s4910_s1 + $0x1ac] ss:$16 sps:$4 sm:$0xff]   ;;  %v3267_v0 = vld [vmem:[%s4910_s1 + $0x1a0] ss:$16 sps:$4 sm:$0xff]  }
  0x14   :  { %1852 = vmatprep.subr.bf16.mxu0 %v3215_v20  ;;  %2057 = vmatprep.subr.bf16.mxu1 %v3217_v21  ;;  %v48_v58 = vcombine.high %v40_v54, %v40_v54  ;;  %v3268_v1 = vld [vmem:[%s4910_s1 + $0x1a8] ss:$16 sps:$4 sm:$0xff]   ;;  %v3269_v2 = vld [vmem:[%s4910_s1 + $0x1c4] ss:$16 sps:$4 sm:$0xff]   ;;  %v3271_v3 = vld [vmem:[%s4910_s1 + $0x1cc] ss:$16 sps:$4 sm:$0xff]   ;;  %v3979_v9 = vrot.slane %v33_v4, %v3918_v49  ;;  %v83_v16 = vpack.c.bf16 %v40_v54, %v40_v54 }
  0x15   :  { %v3273_v5 = vld [vmem:[%s4910_s1 + $0x1c0] ss:$16 sps:$4 sm:$0xff]   ;;  %v3274_v6 = vld [vmem:[%s4910_s1 + $0x1c8] ss:$16 sps:$4 sm:$0xff]   ;;  %v3275_v7 = vld [vmem:[%s4910_s1 + $0x1e4] ss:$16 sps:$4 sm:$0xff]  }
  0x16   :  { %v84_v60 = vpack.c.bf16 %v48_v58, %v48_v58  ;;  %v3277_v8 = vld [vmem:[%s4910_s1 + $0x1ec] ss:$16 sps:$4 sm:$0xff]   ;;  %v3279_v10 = vld [vmem:[%s4910_s1 + $0x1e0] ss:$16 sps:$4 sm:$0xff]   ;;  %v3280_v11 = vld [vmem:[%s4910_s1 + $0x1e8] ss:$16 sps:$4 sm:$0xff]   ;;  %v49_v14 = vcombine.high %v3979_v9, %v3979_v9 }
  0x17   :  { %1853 = vmatpush1.bf16.msra.mxu0 %v3219_v22  ;;  %2058 = vmatpush1.bf16.msra.mxu1 %v3220_v23  ;;  %v3284_v12 = vld [vmem:[%s4910_s1 + $0x204] ss:$16 sps:$4 sm:$0xff]   ;;  %v3287_v13 = vld [vmem:[%s4910_s1 + $0x20c] ss:$16 sps:$4 sm:$0xff]   ;;  %v3282_v15 = vld [vmem:[%s4910_s1 + $0x200] ss:$16 sps:$4 sm:$0xff]  }
  0x18   :  { %1854 = vmatprep.subr.bf16.mxu0 %v3221_v24  ;;  %2059 = vmatprep.subr.bf16.mxu1 %v3223_v25  ;;  %v3285_v17 = vld [vmem:[%s4910_s1 + $0x208] ss:$16 sps:$4 sm:$0xff]   ;;  %v3290_v18 = vld [vmem:[%s4910_s1 + $0x224] ss:$16 sps:$4 sm:$0xff]   ;;  %v3293_v19 = vld [vmem:[%s4910_s1 + $0x22c] ss:$16 sps:$4 sm:$0xff]   ;;  %v86_v20 = vpack.c.bf16 %v49_v14, %v49_v14 }
  0x19   :  { %1874 = vmatprep.mubr.bf16.mxu0 %v84_v60  ;;  %2079 = vmatprep.mubr.bf16.mxu1 %v84_v60  ;;  %v3288_v21 = vld [vmem:[%s4910_s1 + $0x220] ss:$16 sps:$4 sm:$0xff]   ;;  %v3291_v22 = vld [vmem:[%s4910_s1 + $0x228] ss:$16 sps:$4 sm:$0xff]   ;;  %v3296_v23 = vld [vmem:[%s4910_s1 + $0x244] ss:$16 sps:$4 sm:$0xff]  }
  0x1a   :  { %v3299_v24 = vld [vmem:[%s4910_s1 + $0x24c] ss:$16 sps:$4 sm:$0xff]   ;;  %v3294_v25 = vld [vmem:[%s4910_s1 + $0x240] ss:$16 sps:$4 sm:$0xff]   ;;  %v3315_v38 = vld [vmem:[%s4910_s1 + $0x2a8] ss:$16 sps:$4 sm:$0xff]  }
  0x1b   :  { %1855 = vmatpush1.bf16.msra.mxu0 %v3225_v26  ;;  %2060 = vmatpush1.bf16.msra.mxu1 %v3226_v27  ;;  %v3297_v26 = vld [vmem:[%s4910_s1 + $0x248] ss:$16 sps:$4 sm:$0xff]   ;;  %v3302_v27 = vld [vmem:[%s4910_s1 + $0x264] ss:$16 sps:$4 sm:$0xff]   ;;  %v3317_v36 = vld [vmem:[%s4910_s1 + $0x2ac] ss:$16 sps:$4 sm:$0xff]  }
  0x1c   :  { %1856 = vmatprep.subr.bf16.mxu0 %v3227_v28  ;;  %2061 = vmatprep.subr.bf16.mxu1 %v3229_v29  ;;  %v3305_v28 = vld [vmem:[%s4910_s1 + $0x26c] ss:$16 sps:$4 sm:$0xff]   ;;  %v3300_v29 = vld [vmem:[%s4910_s1 + $0x260] ss:$16 sps:$4 sm:$0xff]   ;;  %v3321_v42 = vld [vmem:[%s4910_s1 + $0x2c8] ss:$16 sps:$4 sm:$0xff]  }
  0x1d   :  { %v3312_v37 = vld [vmem:[%s4910_s1 + $0x2a0] ss:$16 sps:$4 sm:$0xff]   ;;  %v3333_v52 = vld [vmem:[%s4910_s1 + $0x308] ss:$16 sps:$4 sm:$0xff]   ;;  %v3341_v54 = vld [vmem:[%s4910_s1 + $0x32c] ss:$16 sps:$4 sm:$0xff]  }
  0x1e   :  { %v3347_v58 = vld [vmem:[%s4910_s1 + $0x34c] ss:$16 sps:$4 sm:$0xff]   ;;  %v3345_v60 = vld [vmem:[%s4910_s1 + $0x348] ss:$16 sps:$4 sm:$0xff]   ;;  %v3374_v14 = vld [vmem:[%s4910_s1 + $0x3e4] ss:$16 sps:$4 sm:$0xff]  }
  0x1f   :  { %1857 = vmatpush1.bf16.msra.mxu0 %v3231_v30  ;;  %2062 = vmatpush1.bf16.msra.mxu1 %v3232_v31  ;;  %v3303_v30 = vld [vmem:[%s4910_s1 + $0x268] ss:$16 sps:$4 sm:$0xff]   ;;  %v3308_v31 = vld [vmem:[%s4910_s1 + $0x284] ss:$16 sps:$4 sm:$0xff]  }
  0x20   :  { %1858 = vmatprep.subr.bf16.mxu0 %v3233_v32  ;;  %2063 = vmatprep.subr.bf16.mxu1 %v3235_v33  ;;  %v3311_v32 = vld [vmem:[%s4910_s1 + $0x28c] ss:$16 sps:$4 sm:$0xff]   ;;  %v3306_v33 = vld [vmem:[%s4910_s1 + $0x280] ss:$16 sps:$4 sm:$0xff]   ;;  %v3357_v4 = vld [vmem:[%s4910_s1 + $0x388] ss:$16 sps:$4 sm:$0xff]  }
  0x23   :  { %1859 = vmatpush1.bf16.msra.mxu0 %v3237_v34  ;;  %2064 = vmatpush1.bf16.msra.mxu1 %v3238_v35  ;;  %v3309_v34 = vld [vmem:[%s4910_s1 + $0x288] ss:$16 sps:$4 sm:$0xff]   ;;  %v3314_v35 = vld [vmem:[%s4910_s1 + $0x2a4] ss:$16 sps:$4 sm:$0xff]  }
  0x24   :  { %1860 = vmatprep.subr.bf16.mxu0 %v3239_v39  ;;  %2065 = vmatprep.subr.bf16.mxu1 %v3241_v40  ;;  %v3320_v39 = vld [vmem:[%s4910_s1 + $0x2c4] ss:$16 sps:$4 sm:$0xff]   ;;  %v3323_v40 = vld [vmem:[%s4910_s1 + $0x2cc] ss:$16 sps:$4 sm:$0xff]  }
  0x27   :  { %1861 = vmatpush1.bf16.msra.mxu0 %v3243_v41  ;;  %2066 = vmatpush1.bf16.msra.mxu1 %v3244_v44  ;;  %v3318_v41 = vld [vmem:[%s4910_s1 + $0x2c0] ss:$16 sps:$4 sm:$0xff]   ;;  %v3326_v44 = vld [vmem:[%s4910_s1 + $0x2e4] ss:$16 sps:$4 sm:$0xff]  }
  0x28   :  { %1862 = vmatprep.subr.bf16.mxu0 %v3245_v45  ;;  %2067 = vmatprep.subr.bf16.mxu1 %v3247_v46  ;;  %v3329_v45 = vld [vmem:[%s4910_s1 + $0x2ec] ss:$16 sps:$4 sm:$0xff]   ;;  %v3324_v46 = vld [vmem:[%s4910_s1 + $0x2e0] ss:$16 sps:$4 sm:$0xff]  }
  0x2b   :  { %1863 = vmatpush1.bf16.msra.mxu0 %v3249_v47  ;;  %2068 = vmatpush1.bf16.msra.mxu1 %v3250_v48  ;;  %v3327_v47 = vld [vmem:[%s4910_s1 + $0x2e8] ss:$16 sps:$4 sm:$0xff]   ;;  %v3332_v48 = vld [vmem:[%s4910_s1 + $0x304] ss:$16 sps:$4 sm:$0xff]  }
  0x2c   :  { %1864 = vmatprep.subr.bf16.mxu0 %v3251_v50  ;;  %2069 = vmatprep.subr.bf16.mxu1 %v3253_v51  ;;  %v3335_v50 = vld [vmem:[%s4910_s1 + $0x30c] ss:$16 sps:$4 sm:$0xff]   ;;  %v3330_v51 = vld [vmem:[%s4910_s1 + $0x300] ss:$16 sps:$4 sm:$0xff]  }
  0x2f   :  { %1865 = vmatpush1.bf16.msra.mxu0 %v3255_v53  ;;  %2070 = vmatpush1.bf16.msra.mxu1 %v3256_v55  ;;  %v3338_v53 = vld [vmem:[%s4910_s1 + $0x324] ss:$16 sps:$4 sm:$0xff]   ;;  %v3336_v55 = vld [vmem:[%s4910_s1 + $0x320] ss:$16 sps:$4 sm:$0xff]  }
  0x30   :  { %1866 = vmatprep.subr.bf16.mxu0 %v3257_v56  ;;  %2071 = vmatprep.subr.bf16.mxu1 %v3259_v57  ;;  %v3339_v56 = vld [vmem:[%s4910_s1 + $0x328] ss:$16 sps:$4 sm:$0xff]   ;;  %v3344_v57 = vld [vmem:[%s4910_s1 + $0x344] ss:$16 sps:$4 sm:$0xff]  }
  0x33   :  { %1867 = vmatpush1.bf16.msra.mxu0 %v3261_v59  ;;  %2072 = vmatpush1.bf16.msra.mxu1 %v3262_v61  ;;  %v3342_v59 = vld [vmem:[%s4910_s1 + $0x340] ss:$16 sps:$4 sm:$0xff]   ;;  %v3350_v61 = vld [vmem:[%s4910_s1 + $0x364] ss:$16 sps:$4 sm:$0xff]  }
  0x34   :  { %1868 = vmatprep.subr.bf16.mxu0 %v3263_v62  ;;  %2073 = vmatprep.subr.bf16.mxu1 %v3265_v63  ;;  %v3353_v62 = vld [vmem:[%s4910_s1 + $0x36c] ss:$16 sps:$4 sm:$0xff]   ;;  %v3348_v63 = vld [vmem:[%s4910_s1 + $0x360] ss:$16 sps:$4 sm:$0xff]  }
  0x37   :  { %1869 = vmatpush1.bf16.msra.mxu0 %v3267_v0  ;;  %2074 = vmatpush1.bf16.msra.mxu1 %v3268_v1  ;;  %v3351_v0 = vld [vmem:[%s4910_s1 + $0x368] ss:$16 sps:$4 sm:$0xff]   ;;  %v3356_v1 = vld [vmem:[%s4910_s1 + $0x384] ss:$16 sps:$4 sm:$0xff]  }
  0x38   :  { %1870 = vmatprep.subr.bf16.mxu0 %v3269_v2  ;;  %2075 = vmatprep.subr.bf16.mxu1 %v3271_v3  ;;  %v3359_v2 = vld [vmem:[%s4910_s1 + $0x38c] ss:$16 sps:$4 sm:$0xff]   ;;  %v3354_v3 = vld [vmem:[%s4910_s1 + $0x380] ss:$16 sps:$4 sm:$0xff]  }
  0x3b   :  { %1871 = vmatpush1.bf16.msra.mxu0 %v3273_v5  ;;  %2076 = vmatpush1.bf16.msra.mxu1 %v3274_v6  ;;  %v3362_v5 = vld [vmem:[%s4910_s1 + $0x3a4] ss:$16 sps:$4 sm:$0xff]   ;;  %v3365_v6 = vld [vmem:[%s4910_s1 + $0x3ac] ss:$16 sps:$4 sm:$0xff]  }
  0x3c   :  { %1872 = vmatprep.subr.bf16.mxu0 %v3275_v7  ;;  %2077 = vmatprep.subr.bf16.mxu1 %v3277_v8  ;;  %v3360_v7 = vld [vmem:[%s4910_s1 + $0x3a0] ss:$16 sps:$4 sm:$0xff]   ;;  %v3363_v8 = vld [vmem:[%s4910_s1 + $0x3a8] ss:$16 sps:$4 sm:$0xff]  }
  0x3f   :  { %1873 = vmatpush1.bf16.msra.mxu0 %v3279_v10  ;;  %2078 = vmatpush1.bf16.msra.mxu1 %v3280_v11  ;;  %v3368_v10 = vld [vmem:[%s4910_s1 + $0x3c4] ss:$16 sps:$4 sm:$0xff]   ;;  %v3371_v11 = vld [vmem:[%s4910_s1 + $0x3cc] ss:$16 sps:$4 sm:$0xff]  }
  0x40   :  { %1883 = vmatprep.subr.bf16.mxu0 %v3284_v12  ;;  %2088 = vmatprep.subr.bf16.mxu1 %v3287_v13  ;;  %v3366_v12 = vld [vmem:[%s4910_s1 + $0x3c0] ss:$16 sps:$4 sm:$0xff]   ;;  %v3369_v13 = vld [vmem:[%s4910_s1 + $0x3c8] ss:$16 sps:$4 sm:$0xff]  }
  0x42   :  { %1875 = vmatmul.mubr.bf16.vlgmr.msra.gmra.mrb[0].mxu0 %v83_v16  ;;  %2080 = vmatmul.mubr.bf16.vlgmr.msra.gmra.mrb[0].mxu1 %v83_v16  ;;  %v3372_v16 = vld [vmem:[%s4910_s1 + $0x3e0] ss:$16 sps:$4 sm:$0xff]  }
  0x43   :  { %1884 = vmatpush1.bf16.msra.mxu0 %v3282_v15  ;;  %2089 = vmatpush1.bf16.msra.mxu1 %v3285_v17  ;;  %v3377_v15 = vld [vmem:[%s4910_s1 + $0x3ec] ss:$16 sps:$4 sm:$0xff]   ;;  %v3375_v17 = vld [vmem:[%s4910_s1 + $0x3e8] ss:$16 sps:$4 sm:$0xff]  }
  0x44   :  { %1885 = vmatprep.subr.bf16.mxu0 %v3290_v18  ;;  %2090 = vmatprep.subr.bf16.mxu1 %v3293_v19  ;;  %v3380_v18 = vld [vmem:[%s4910_s1 + $0x404] ss:$16 sps:$4 sm:$0xff]   ;;  %v3383_v19 = vld [vmem:[%s4910_s1 + $0x40c] ss:$16 sps:$4 sm:$0xff]  }
  0x45   :  { %1915 = vmatprep.mubr.bf16.mxu0 %v86_v20  ;;  %2120 = vmatprep.mubr.bf16.mxu1 %v86_v20  ;;  %v3378_v20 = vld [vmem:[%s4910_s1 + $0x400] ss:$16 sps:$4 sm:$0xff]  }
  0x47   :  { %1886 = vmatpush1.bf16.msra.mxu0 %v3288_v21  ;;  %2091 = vmatpush1.bf16.msra.mxu1 %v3291_v22  ;;  %v85_v21 = vpack.c.bf16 %v3979_v9, %v3979_v9  ;;  %v3381_v22 = vld [vmem:[%s4910_s1 + $0x408] ss:$16 sps:$4 sm:$0xff]   ;;  %v3389_v9 = vld [vmem:[%s4910_s1 + $0x42c] ss:$16 sps:$4 sm:$0xff]  }
  0x48   :  { %1887 = vmatprep.subr.bf16.mxu0 %v3296_v23  ;;  %2092 = vmatprep.subr.bf16.mxu1 %v3299_v24  ;;  %v4198_v23 = vld [vmem:[%s4909_s0 + $0x8] sm:$0xff]  ;;  %v3386_v24 = vld [vmem:[%s4910_s1 + $0x424] ss:$16 sps:$4 sm:$0xff]  }
  0x4b   :  { %1888 = vmatpush1.bf16.msra.mxu0 %v3294_v25  ;;  %2093 = vmatpush1.bf16.msra.mxu1 %v3297_v26  ;;  %v4208_v25 = vrot.slane %v4198_v23, %v3918_v49 }
  0x4c   :  { %1889 = vmatprep.subr.bf16.mxu0 %v3302_v27  ;;  %2094 = vmatprep.subr.bf16.mxu1 %v3305_v28  ;;  %v3384_v27 = vld [vmem:[%s4910_s1 + $0x420] ss:$16 sps:$4 sm:$0xff]   ;;  %v3387_v28 = vld [vmem:[%s4910_s1 + $0x428] ss:$16 sps:$4 sm:$0xff]  }
  0x4d   :  { %v65_v26 = vcombine.high %v4208_v25, %v4208_v25 }
  0x4f   :  { %1890 = vmatpush1.bf16.msra.mxu0 %v3300_v29  ;;  %2095 = vmatpush1.bf16.msra.mxu1 %v3303_v30  ;;  %v3392_v29 = vld [vmem:[%s4910_s1 + $0x444] ss:$16 sps:$4 sm:$0xff]   ;;  %v3395_v30 = vld [vmem:[%s4910_s1 + $0x44c] ss:$16 sps:$4 sm:$0xff]  }
  0x50   :  { %1891 = vmatprep.subr.bf16.mxu0 %v3308_v31  ;;  %2096 = vmatprep.subr.bf16.mxu1 %v3311_v32  ;;  %v88_v31 = vpack.c.bf16 %v65_v26, %v65_v26  ;;  %v3390_v32 = vld [vmem:[%s4910_s1 + $0x440] ss:$16 sps:$4 sm:$0xff]   ;;  %v3471_v26 = vld [vmem:[%s4910_s1 + $0x5e8] ss:$16 sps:$4 sm:$0xff]  }
  0x53   :  { %1892 = vmatpush1.bf16.msra.mxu0 %v3306_v33  ;;  %2097 = vmatpush1.bf16.msra.mxu1 %v3309_v34  ;;  %v3393_v33 = vld [vmem:[%s4910_s1 + $0x448] ss:$16 sps:$4 sm:$0xff]   ;;  %v3398_v34 = vld [vmem:[%s4910_s1 + $0x464] ss:$16 sps:$4 sm:$0xff]  }
  0x54   :  { %1893 = vmatprep.subr.bf16.mxu0 %v3314_v35  ;;  %2098 = vmatprep.subr.bf16.mxu1 %v3317_v36  ;;  %v3401_v35 = vld [vmem:[%s4910_s1 + $0x46c] ss:$16 sps:$4 sm:$0xff]   ;;  %v3396_v36 = vld [vmem:[%s4910_s1 + $0x460] ss:$16 sps:$4 sm:$0xff]  }
  0x57   :  { %1894 = vmatpush1.bf16.msra.mxu0 %v3312_v37  ;;  %2099 = vmatpush1.bf16.msra.mxu1 %v3315_v38  ;;  %v3399_v37 = vld [vmem:[%s4910_s1 + $0x468] ss:$16 sps:$4 sm:$0xff]   ;;  %v3404_v38 = vld [vmem:[%s4910_s1 + $0x484] ss:$16 sps:$4 sm:$0xff]  }
  0x58   :  { %1895 = vmatprep.subr.bf16.mxu0 %v3320_v39  ;;  %2100 = vmatprep.subr.bf16.mxu1 %v3323_v40  ;;  %v3407_v39 = vld [vmem:[%s4910_s1 + $0x48c] ss:$16 sps:$4 sm:$0xff]   ;;  %v3402_v40 = vld [vmem:[%s4910_s1 + $0x480] ss:$16 sps:$4 sm:$0xff]  }
  0x5b   :  { %1896 = vmatpush1.bf16.msra.mxu0 %v3318_v41  ;;  %2101 = vmatpush1.bf16.msra.mxu1 %v3321_v42  ;;  %v3405_v41 = vld [vmem:[%s4910_s1 + $0x488] ss:$16 sps:$4 sm:$0xff]   ;;  %v3410_v42 = vld [vmem:[%s4910_s1 + $0x4a4] ss:$16 sps:$4 sm:$0xff]  }
  0x5c   :  { %1897 = vmatprep.subr.bf16.mxu0 %v3326_v44  ;;  %2102 = vmatprep.subr.bf16.mxu1 %v3329_v45  ;;  %v3413_v44 = vld [vmem:[%s4910_s1 + $0x4ac] ss:$16 sps:$4 sm:$0xff]   ;;  %v3408_v45 = vld [vmem:[%s4910_s1 + $0x4a0] ss:$16 sps:$4 sm:$0xff]  }
  0x5f   :  { %1898 = vmatpush1.bf16.msra.mxu0 %v3324_v46  ;;  %2103 = vmatpush1.bf16.msra.mxu1 %v3327_v47  ;;  %v3411_v46 = vld [vmem:[%s4910_s1 + $0x4a8] ss:$16 sps:$4 sm:$0xff]   ;;  %v3416_v47 = vld [vmem:[%s4910_s1 + $0x4c4] ss:$16 sps:$4 sm:$0xff]  }
  0x60   :  { %1899 = vmatprep.subr.bf16.mxu0 %v3332_v48  ;;  %2104 = vmatprep.subr.bf16.mxu1 %v3335_v50  ;;  %v3419_v48 = vld [vmem:[%s4910_s1 + $0x4cc] ss:$16 sps:$4 sm:$0xff]   ;;  %v3414_v50 = vld [vmem:[%s4910_s1 + $0x4c0] ss:$16 sps:$4 sm:$0xff]  }
  0x63   :  { %1900 = vmatpush1.bf16.msra.mxu0 %v3330_v51  ;;  %2105 = vmatpush1.bf16.msra.mxu1 %v3333_v52  ;;  %v3417_v51 = vld [vmem:[%s4910_s1 + $0x4c8] ss:$16 sps:$4 sm:$0xff]   ;;  %v3422_v52 = vld [vmem:[%s4910_s1 + $0x4e4] ss:$16 sps:$4 sm:$0xff]  }
  0x64   :  { %1901 = vmatprep.subr.bf16.mxu0 %v3338_v53  ;;  %2106 = vmatprep.subr.bf16.mxu1 %v3341_v54  ;;  %v3425_v53 = vld [vmem:[%s4910_s1 + $0x4ec] ss:$16 sps:$4 sm:$0xff]   ;;  %v3420_v54 = vld [vmem:[%s4910_s1 + $0x4e0] ss:$16 sps:$4 sm:$0xff]  }
  0x67   :  { %1902 = vmatpush1.bf16.msra.mxu0 %v3336_v55  ;;  %2107 = vmatpush1.bf16.msra.mxu1 %v3339_v56  ;;  %v3423_v55 = vld [vmem:[%s4910_s1 + $0x4e8] ss:$16 sps:$4 sm:$0xff]   ;;  %v3428_v56 = vld [vmem:[%s4910_s1 + $0x504] ss:$16 sps:$4 sm:$0xff]  }
  0x68   :  { %1903 = vmatprep.subr.bf16.mxu0 %v3344_v57  ;;  %2108 = vmatprep.subr.bf16.mxu1 %v3347_v58  ;;  %v3431_v57 = vld [vmem:[%s4910_s1 + $0x50c] ss:$16 sps:$4 sm:$0xff]   ;;  %v3426_v58 = vld [vmem:[%s4910_s1 + $0x500] ss:$16 sps:$4 sm:$0xff]  }
  0x6b   :  { %1904 = vmatpush1.bf16.msra.mxu0 %v3342_v59  ;;  %2109 = vmatpush1.bf16.msra.mxu1 %v3345_v60  ;;  %v3429_v59 = vld [vmem:[%s4910_s1 + $0x508] ss:$16 sps:$4 sm:$0xff]   ;;  %v3434_v60 = vld [vmem:[%s4910_s1 + $0x524] ss:$16 sps:$4 sm:$0xff]  }
  0x6c   :  { %1905 = vmatprep.subr.bf16.mxu0 %v3350_v61  ;;  %2110 = vmatprep.subr.bf16.mxu1 %v3353_v62  ;;  %v3437_v61 = vld [vmem:[%s4910_s1 + $0x52c] ss:$16 sps:$4 sm:$0xff]   ;;  %v3432_v62 = vld [vmem:[%s4910_s1 + $0x520] ss:$16 sps:$4 sm:$0xff]  }
  0x6f   :  { %1906 = vmatpush1.bf16.msra.mxu0 %v3348_v63  ;;  %2111 = vmatpush1.bf16.msra.mxu1 %v3351_v0  ;;  %v3435_v63 = vld [vmem:[%s4910_s1 + $0x528] ss:$16 sps:$4 sm:$0xff]   ;;  %v3440_v0 = vld [vmem:[%s4910_s1 + $0x544] ss:$16 sps:$4 sm:$0xff]  }
  0x70   :  { %1907 = vmatprep.subr.bf16.mxu0 %v3356_v1  ;;  %2112 = vmatprep.subr.bf16.mxu1 %v3359_v2  ;;  %v3443_v1 = vld [vmem:[%s4910_s1 + $0x54c] ss:$16 sps:$4 sm:$0xff]   ;;  %v3438_v2 = vld [vmem:[%s4910_s1 + $0x540] ss:$16 sps:$4 sm:$0xff]  }
  0x73   :  { %1908 = vmatpush1.bf16.msra.mxu0 %v3354_v3  ;;  %2113 = vmatpush1.bf16.msra.mxu1 %v3357_v4  ;;  %v3441_v3 = vld [vmem:[%s4910_s1 + $0x548] ss:$16 sps:$4 sm:$0xff]   ;;  %v3446_v4 = vld [vmem:[%s4910_s1 + $0x564] ss:$16 sps:$4 sm:$0xff]  }
  0x74   :  { %1909 = vmatprep.subr.bf16.mxu0 %v3362_v5  ;;  %2114 = vmatprep.subr.bf16.mxu1 %v3365_v6  ;;  %v3449_v5 = vld [vmem:[%s4910_s1 + $0x56c] ss:$16 sps:$4 sm:$0xff]   ;;  %v3444_v6 = vld [vmem:[%s4910_s1 + $0x560] ss:$16 sps:$4 sm:$0xff]  }
  0x77   :  { %1910 = vmatpush1.bf16.msra.mxu0 %v3360_v7  ;;  %2115 = vmatpush1.bf16.msra.mxu1 %v3363_v8  ;;  %v3447_v7 = vld [vmem:[%s4910_s1 + $0x568] ss:$16 sps:$4 sm:$0xff]   ;;  %v3452_v8 = vld [vmem:[%s4910_s1 + $0x584] ss:$16 sps:$4 sm:$0xff]  }
  0x78   :  { %1911 = vmatprep.subr.bf16.mxu0 %v3368_v10  ;;  %2116 = vmatprep.subr.bf16.mxu1 %v3371_v11  ;;  %v3455_v10 = vld [vmem:[%s4910_s1 + $0x58c] ss:$16 sps:$4 sm:$0xff]   ;;  %v3450_v11 = vld [vmem:[%s4910_s1 + $0x580] ss:$16 sps:$4 sm:$0xff]  }
  0x7b   :  { %1912 = vmatpush1.bf16.msra.mxu0 %v3366_v12  ;;  %2117 = vmatpush1.bf16.msra.mxu1 %v3369_v13  ;;  %v3453_v12 = vld [vmem:[%s4910_s1 + $0x588] ss:$16 sps:$4 sm:$0xff]   ;;  %v3458_v13 = vld [vmem:[%s4910_s1 + $0x5a4] ss:$16 sps:$4 sm:$0xff]  }
  0x7c   :  { %1913 = vmatprep.subr.bf16.mxu0 %v3374_v14  ;;  %2118 = vmatprep.subr.bf16.mxu1 %v3377_v15  ;;  %v3461_v14 = vld [vmem:[%s4910_s1 + $0x5ac] ss:$16 sps:$4 sm:$0xff]   ;;  %v3456_v15 = vld [vmem:[%s4910_s1 + $0x5a0] ss:$16 sps:$4 sm:$0xff]  }
  0x7f   :  { %1914 = vmatpush1.bf16.msra.mxu0 %v3372_v16  ;;  %2119 = vmatpush1.bf16.msra.mxu1 %v3375_v17  ;;  %v3459_v16 = vld [vmem:[%s4910_s1 + $0x5a8] ss:$16 sps:$4 sm:$0xff]   ;;  %v3464_v17 = vld [vmem:[%s4910_s1 + $0x5c4] ss:$16 sps:$4 sm:$0xff]  }
  0x80   :  { %1924 = vmatprep.subr.bf16.mxu0 %v3380_v18  ;;  %2129 = vmatprep.subr.bf16.mxu1 %v3383_v19  ;;  %v3467_v18 = vld [vmem:[%s4910_s1 + $0x5cc] ss:$16 sps:$4 sm:$0xff]   ;;  %v50_v19 = vcombine.high %v4198_v23, %v4198_v23 }
  0x81   :  { %v3473_v23 = vld [vmem:[%s4910_s1 + $0x5ec] ss:$16 sps:$4 sm:$0xff]  }
  0x82   :  { %1916 = vmatmul.mubr.bf16.vlgmr.msra.gmra.mrb[0].mxu0 %v85_v21  ;;  %2121 = vmatmul.mubr.bf16.vlgmr.msra.gmra.mrb[0].mxu1 %v85_v21  ;;  %v3465_v21 = vld [vmem:[%s4910_s1 + $0x5c8] ss:$16 sps:$4 sm:$0xff]  }
  0x83   :  { %1925 = vmatpush1.bf16.msra.mxu0 %v3378_v20  ;;  %2130 = vmatpush1.bf16.msra.mxu1 %v3381_v22  ;;  %v3462_v20 = vld [vmem:[%s4910_s1 + $0x5c0] ss:$16 sps:$4 sm:$0xff]   ;;  %v3470_v22 = vld [vmem:[%s4910_s1 + $0x5e4] ss:$16 sps:$4 sm:$0xff]  }
  0x84   :  { %1926 = vmatprep.subr.bf16.mxu0 %v3386_v24  ;;  %2131 = vmatprep.subr.bf16.mxu1 %v3389_v9  ;;  %v4383_v24 = vrot.slane %v50_v19, %v3918_v49  ;;  %v3468_v9 = vld [vmem:[%s4910_s1 + $0x5e0] ss:$16 sps:$4 sm:$0xff]  }
  0x85   :  { %1956 = vmatprep.mubr.bf16.mxu0 %v88_v31  ;;  %2161 = vmatprep.mubr.bf16.mxu1 %v88_v31  ;;  %v87_v31 = vpack.c.bf16 %v4208_v25, %v4208_v25  ;;  %v3480_v25 = vld [vmem:[%s4910_s1 + $0x620] ss:$16 sps:$4 sm:$0xff]  }
  0x87   :  { %1927 = vmatpush1.bf16.msra.mxu0 %v3384_v27  ;;  %2132 = vmatpush1.bf16.msra.mxu1 %v3387_v28  ;;  %v3476_v27 = vld [vmem:[%s4910_s1 + $0x604] ss:$16 sps:$4 sm:$0xff]   ;;  %v3479_v28 = vld [vmem:[%s4910_s1 + $0x60c] ss:$16 sps:$4 sm:$0xff]  }
  0x88   :  { %1928 = vmatprep.subr.bf16.mxu0 %v3392_v29  ;;  %2133 = vmatprep.subr.bf16.mxu1 %v3395_v30  ;;  %v66_v29 = vcombine.high %v4383_v24, %v4383_v24  ;;  %v3474_v30 = vld [vmem:[%s4910_s1 + $0x600] ss:$16 sps:$4 sm:$0xff]  }
  0x8b   :  { %1929 = vmatpush1.bf16.msra.mxu0 %v3390_v32  ;;  %2134 = vmatpush1.bf16.msra.mxu1 %v3393_v33  ;;  %v3477_v32 = vld [vmem:[%s4910_s1 + $0x608] ss:$16 sps:$4 sm:$0xff]   ;;  %v3482_v33 = vld [vmem:[%s4910_s1 + $0x624] ss:$16 sps:$4 sm:$0xff]  }
  0x8c   :  { %1930 = vmatprep.subr.bf16.mxu0 %v3398_v34  ;;  %2135 = vmatprep.subr.bf16.mxu1 %v3401_v35  ;;  %v3485_v34 = vld [vmem:[%s4910_s1 + $0x62c] ss:$16 sps:$4 sm:$0xff]   ;;  %v90_v35 = vpack.c.bf16 %v66_v29, %v66_v29 }
  0x8f   :  { %1931 = vmatpush1.bf16.msra.mxu0 %v3396_v36  ;;  %2136 = vmatpush1.bf16.msra.mxu1 %v3399_v37  ;;  %v3483_v36 = vld [vmem:[%s4910_s1 + $0x628] ss:$16 sps:$4 sm:$0xff]   ;;  %v3488_v37 = vld [vmem:[%s4910_s1 + $0x644] ss:$16 sps:$4 sm:$0xff]  }
  0x90   :  { %1932 = vmatprep.subr.bf16.mxu0 %v3404_v38  ;;  %2137 = vmatprep.subr.bf16.mxu1 %v3407_v39  ;;  %v3491_v38 = vld [vmem:[%s4910_s1 + $0x64c] ss:$16 sps:$4 sm:$0xff]   ;;  %v3486_v39 = vld [vmem:[%s4910_s1 + $0x640] ss:$16 sps:$4 sm:$0xff]  }
  0x93   :  { %1933 = vmatpush1.bf16.msra.mxu0 %v3402_v40  ;;  %2138 = vmatpush1.bf16.msra.mxu1 %v3405_v41  ;;  %v3489_v40 = vld [vmem:[%s4910_s1 + $0x648] ss:$16 sps:$4 sm:$0xff]   ;;  %v3494_v41 = vld [vmem:[%s4910_s1 + $0x664] ss:$16 sps:$4 sm:$0xff]  }
  0x94   :  { %1934 = vmatprep.subr.bf16.mxu0 %v3410_v42  ;;  %2139 = vmatprep.subr.bf16.mxu1 %v3413_v44  ;;  %v3497_v42 = vld [vmem:[%s4910_s1 + $0x66c] ss:$16 sps:$4 sm:$0xff]   ;;  %v3492_v44 = vld [vmem:[%s4910_s1 + $0x660] ss:$16 sps:$4 sm:$0xff]  }
  0x97   :  { %1935 = vmatpush1.bf16.msra.mxu0 %v3408_v45  ;;  %2140 = vmatpush1.bf16.msra.mxu1 %v3411_v46  ;;  %v3495_v45 = vld [vmem:[%s4910_s1 + $0x668] ss:$16 sps:$4 sm:$0xff]   ;;  %v3500_v46 = vld [vmem:[%s4910_s1 + $0x684] ss:$16 sps:$4 sm:$0xff]  }
  0x98   :  { %1936 = vmatprep.subr.bf16.mxu0 %v3416_v47  ;;  %2141 = vmatprep.subr.bf16.mxu1 %v3419_v48  ;;  %v3503_v47 = vld [vmem:[%s4910_s1 + $0x68c] ss:$16 sps:$4 sm:$0xff]   ;;  %v3498_v48 = vld [vmem:[%s4910_s1 + $0x680] ss:$16 sps:$4 sm:$0xff]  }
  0x9b   :  { %1937 = vmatpush1.bf16.msra.mxu0 %v3414_v50  ;;  %2142 = vmatpush1.bf16.msra.mxu1 %v3417_v51  ;;  %v3501_v50 = vld [vmem:[%s4910_s1 + $0x688] ss:$16 sps:$4 sm:$0xff]   ;;  %v3506_v51 = vld [vmem:[%s4910_s1 + $0x6a4] ss:$16 sps:$4 sm:$0xff]  }
  0x9c   :  { %1938 = vmatprep.subr.bf16.mxu0 %v3422_v52  ;;  %2143 = vmatprep.subr.bf16.mxu1 %v3425_v53  ;;  %v3509_v52 = vld [vmem:[%s4910_s1 + $0x6ac] ss:$16 sps:$4 sm:$0xff]   ;;  %v3504_v53 = vld [vmem:[%s4910_s1 + $0x6a0] ss:$16 sps:$4 sm:$0xff]  }
  0x9f   :  { %1939 = vmatpush1.bf16.msra.mxu0 %v3420_v54  ;;  %2144 = vmatpush1.bf16.msra.mxu1 %v3423_v55  ;;  %v3507_v54 = vld [vmem:[%s4910_s1 + $0x6a8] ss:$16 sps:$4 sm:$0xff]   ;;  %v3512_v55 = vld [vmem:[%s4910_s1 + $0x6c4] ss:$16 sps:$4 sm:$0xff]  }
  0xa0   :  { %1940 = vmatprep.subr.bf16.mxu0 %v3428_v56  ;;  %2145 = vmatprep.subr.bf16.mxu1 %v3431_v57  ;;  %v3515_v56 = vld [vmem:[%s4910_s1 + $0x6cc] ss:$16 sps:$4 sm:$0xff]   ;;  %v3510_v57 = vld [vmem:[%s4910_s1 + $0x6c0] ss:$16 sps:$4 sm:$0xff]  }
  0xa3   :  { %1941 = vmatpush1.bf16.msra.mxu0 %v3426_v58  ;;  %2146 = vmatpush1.bf16.msra.mxu1 %v3429_v59  ;;  %v3513_v58 = vld [vmem:[%s4910_s1 + $0x6c8] ss:$16 sps:$4 sm:$0xff]   ;;  %v3518_v59 = vld [vmem:[%s4910_s1 + $0x6e4] ss:$16 sps:$4 sm:$0xff]  }
  0xa4   :  { %1942 = vmatprep.subr.bf16.mxu0 %v3434_v60  ;;  %2147 = vmatprep.subr.bf16.mxu1 %v3437_v61  ;;  %v3521_v60 = vld [vmem:[%s4910_s1 + $0x6ec] ss:$16 sps:$4 sm:$0xff]   ;;  %v3516_v61 = vld [vmem:[%s4910_s1 + $0x6e0] ss:$16 sps:$4 sm:$0xff]  }
  0xa7   :  { %1943 = vmatpush1.bf16.msra.mxu0 %v3432_v62  ;;  %2148 = vmatpush1.bf16.msra.mxu1 %v3435_v63  ;;  %v3519_v62 = vld [vmem:[%s4910_s1 + $0x6e8] ss:$16 sps:$4 sm:$0xff]   ;;  %v3524_v63 = vld [vmem:[%s4910_s1 + $0x704] ss:$16 sps:$4 sm:$0xff]  }
  0xa8   :  { %1944 = vmatprep.subr.bf16.mxu0 %v3440_v0  ;;  %2149 = vmatprep.subr.bf16.mxu1 %v3443_v1  ;;  %v3527_v0 = vld [vmem:[%s4910_s1 + $0x70c] ss:$16 sps:$4 sm:$0xff]   ;;  %v3522_v1 = vld [vmem:[%s4910_s1 + $0x700] ss:$16 sps:$4 sm:$0xff]  }
  0xab   :  { %1945 = vmatpush1.bf16.msra.mxu0 %v3438_v2  ;;  %2150 = vmatpush1.bf16.msra.mxu1 %v3441_v3  ;;  %v3525_v2 = vld [vmem:[%s4910_s1 + $0x708] ss:$16 sps:$4 sm:$0xff]   ;;  %v3530_v3 = vld [vmem:[%s4910_s1 + $0x724] ss:$16 sps:$4 sm:$0xff]  }
  0xac   :  { %1946 = vmatprep.subr.bf16.mxu0 %v3446_v4  ;;  %2151 = vmatprep.subr.bf16.mxu1 %v3449_v5  ;;  %v3533_v4 = vld [vmem:[%s4910_s1 + $0x72c] ss:$16 sps:$4 sm:$0xff]   ;;  %v3528_v5 = vld [vmem:[%s4910_s1 + $0x720] ss:$16 sps:$4 sm:$0xff]  }
  0xaf   :  { %1947 = vmatpush1.bf16.msra.mxu0 %v3444_v6  ;;  %2152 = vmatpush1.bf16.msra.mxu1 %v3447_v7  ;;  %v3531_v6 = vld [vmem:[%s4910_s1 + $0x728] ss:$16 sps:$4 sm:$0xff]   ;;  %v3536_v7 = vld [vmem:[%s4910_s1 + $0x744] ss:$16 sps:$4 sm:$0xff]  }
  0xb0   :  { %1948 = vmatprep.subr.bf16.mxu0 %v3452_v8  ;;  %2153 = vmatprep.subr.bf16.mxu1 %v3455_v10  ;;  %v3539_v8 = vld [vmem:[%s4910_s1 + $0x74c] ss:$16 sps:$4 sm:$0xff]   ;;  %v3534_v10 = vld [vmem:[%s4910_s1 + $0x740] ss:$16 sps:$4 sm:$0xff]  }
  0xb3   :  { %1949 = vmatpush1.bf16.msra.mxu0 %v3450_v11  ;;  %2154 = vmatpush1.bf16.msra.mxu1 %v3453_v12  ;;  %v3537_v11 = vld [vmem:[%s4910_s1 + $0x748] ss:$16 sps:$4 sm:$0xff]   ;;  %v3542_v12 = vld [vmem:[%s4910_s1 + $0x764] ss:$16 sps:$4 sm:$0xff]  }
  0xb4   :  { %1950 = vmatprep.subr.bf16.mxu0 %v3458_v13  ;;  %2155 = vmatprep.subr.bf16.mxu1 %v3461_v14  ;;  %v3545_v13 = vld [vmem:[%s4910_s1 + $0x76c] ss:$16 sps:$4 sm:$0xff]  }
  0xb7   :  { %1951 = vmatpush1.bf16.msra.mxu0 %v3456_v15  ;;  %2156 = vmatpush1.bf16.msra.mxu1 %v3459_v16 }
  0xb8   :  { %1952 = vmatprep.subr.bf16.mxu0 %v3464_v17  ;;  %2157 = vmatprep.subr.bf16.mxu1 %v3467_v18 }
  0xbb   :  { %1953 = vmatpush1.bf16.msra.mxu0 %v3462_v20  ;;  %2158 = vmatpush1.bf16.msra.mxu1 %v3465_v21 }
  0xbc   :  { %1954 = vmatprep.subr.bf16.mxu0 %v3470_v22  ;;  %2159 = vmatprep.subr.bf16.mxu1 %v3473_v23 }
  0xbf   :  { %1955 = vmatpush1.bf16.msra.mxu0 %v3468_v9  ;;  %2160 = vmatpush1.bf16.msra.mxu1 %v3471_v26 }
  0xc0   :  { %1965 = vmatprep.subr.bf16.mxu0 %v3476_v27  ;;  %2170 = vmatprep.subr.bf16.mxu1 %v3479_v28 }
  0xc2   :  { %1957 = vmatmul.mubr.bf16.vlgmr.msra.gmra.mrb[0].mxu0 %v87_v31  ;;  %2162 = vmatmul.mubr.bf16.vlgmr.msra.gmra.mrb[0].mxu1 %v87_v31 }
  0xc3   :  { %1966 = vmatpush1.bf16.msra.mxu0 %v3474_v30  ;;  %2171 = vmatpush1.bf16.msra.mxu1 %v3477_v32 }
  0xc4   :  { %1967 = vmatprep.subr.bf16.mxu0 %v3482_v33  ;;  %2172 = vmatprep.subr.bf16.mxu1 %v3485_v34 }
  0xc5   :  { %1997 = vmatprep.mubr.bf16.mxu0 %v90_v35  ;;  %2202 = vmatprep.mubr.bf16.mxu1 %v90_v35 }
  0xc7   :  { %1968 = vmatpush1.bf16.msra.mxu0 %v3480_v25  ;;  %2173 = vmatpush1.bf16.msra.mxu1 %v3483_v36 }
  0xc8   :  { %1969 = vmatprep.subr.bf16.mxu0 %v3488_v37  ;;  %2174 = vmatprep.subr.bf16.mxu1 %v3491_v38 }
  0xcb   :  { %1970 = vmatpush1.bf16.msra.mxu0 %v3486_v39  ;;  %2175 = vmatpush1.bf16.msra.mxu1 %v3489_v40 }
  0xcc   :  { %1971 = vmatprep.subr.bf16.mxu0 %v3494_v41  ;;  %2176 = vmatprep.subr.bf16.mxu1 %v3497_v42 }
  0xcf   :  { %1972 = vmatpush1.bf16.msra.mxu0 %v3492_v44  ;;  %2177 = vmatpush1.bf16.msra.mxu1 %v3495_v45 }
  0xd0   :  { %1973 = vmatprep.subr.bf16.mxu0 %v3500_v46  ;;  %2178 = vmatprep.subr.bf16.mxu1 %v3503_v47 }
  0xd3   :  { %1974 = vmatpush1.bf16.msra.mxu0 %v3498_v48  ;;  %2179 = vmatpush1.bf16.msra.mxu1 %v3501_v50 }
  0xd4   :  { %1975 = vmatprep.subr.bf16.mxu0 %v3506_v51  ;;  %2180 = vmatprep.subr.bf16.mxu1 %v3509_v52 }
  0xd7   :  { %1976 = vmatpush1.bf16.msra.mxu0 %v3504_v53  ;;  %2181 = vmatpush1.bf16.msra.mxu1 %v3507_v54 }
  0xd8   :  { %1977 = vmatprep.subr.bf16.mxu0 %v3512_v55  ;;  %2182 = vmatprep.subr.bf16.mxu1 %v3515_v56 }
  0xdb   :  { %1978 = vmatpush1.bf16.msra.mxu0 %v3510_v57  ;;  %2183 = vmatpush1.bf16.msra.mxu1 %v3513_v58 }
  0xdc   :  { %1979 = vmatprep.subr.bf16.mxu0 %v3518_v59  ;;  %2184 = vmatprep.subr.bf16.mxu1 %v3521_v60 }
  0xdf   :  { %1980 = vmatpush1.bf16.msra.mxu0 %v3516_v61  ;;  %2185 = vmatpush1.bf16.msra.mxu1 %v3519_v62 }
  0xe0   :  { %1981 = vmatprep.subr.bf16.mxu0 %v3524_v63  ;;  %2186 = vmatprep.subr.bf16.mxu1 %v3527_v0 }
  0xe3   :  { %1982 = vmatpush1.bf16.msra.mxu0 %v3522_v1  ;;  %2187 = vmatpush1.bf16.msra.mxu1 %v3525_v2 }
  0xe4   :  { %1983 = vmatprep.subr.bf16.mxu0 %v3530_v3  ;;  %2188 = vmatprep.subr.bf16.mxu1 %v3533_v4 }
  0xe7   :  { %1984 = vmatpush1.bf16.msra.mxu0 %v3528_v5  ;;  %2189 = vmatpush1.bf16.msra.mxu1 %v3531_v6 }
  0xe8   :  { %1985 = vmatprep.subr.bf16.mxu0 %v3536_v7  ;;  %2190 = vmatprep.subr.bf16.mxu1 %v3539_v8 }
  0xe9   :  { %13 = vsyncpa [#allocation3], 0  ;;  %v3540_v14 = vld [vmem:[%s4910_s1 + $0x760] ss:$16 sps:$4 sm:$0xff]   ;;  %v3543_v15 = vld [vmem:[%s4910_s1 + $0x768] ss:$16 sps:$4 sm:$0xff]   ;;  %v89_v35 = vpack.c.bf16 %v4383_v24, %v4383_v24 }
  0xea   :  { %v3548_v16 = vld [vmem:[%s4910_s1 + $0x784] ss:$16 sps:$4 sm:$0xff]   ;;  %v3551_v17 = vld [vmem:[%s4910_s1 + $0x78c] ss:$16 sps:$4 sm:$0xff]   ;;  %v3546_v18 = vld [vmem:[%s4910_s1 + $0x780] ss:$16 sps:$4 sm:$0xff]  }
  0xeb   :  { %1986 = vmatpush1.bf16.msra.mxu0 %v3534_v10  ;;  %2191 = vmatpush1.bf16.msra.mxu1 %v3537_v11  ;;  %v3549_v19 = vld [vmem:[%s4910_s1 + $0x788] ss:$16 sps:$4 sm:$0xff]   ;;  %v3554_v20 = vld [vmem:[%s4910_s1 + $0x7a4] ss:$16 sps:$4 sm:$0xff]   ;;  %v3557_v21 = vld [vmem:[%s4910_s1 + $0x7ac] ss:$16 sps:$4 sm:$0xff]  }
  0xec   :  { %1987 = vmatprep.subr.bf16.mxu0 %v3542_v12  ;;  %2192 = vmatprep.subr.bf16.mxu1 %v3545_v13  ;;  %v3552_v22 = vld [vmem:[%s4910_s1 + $0x7a0] ss:$16 sps:$4 sm:$0xff]   ;;  %v3555_v23 = vld [vmem:[%s4910_s1 + $0x7a8] ss:$16 sps:$4 sm:$0xff]   ;;  %v3560_v9 = vld [vmem:[%s4910_s1 + $0x7c4] ss:$16 sps:$4 sm:$0xff]  }
  0xed   :  { %v3563_v26 = vld [vmem:[%s4910_s1 + $0x7cc] ss:$16 sps:$4 sm:$0xff]   ;;  %v3558_v27 = vld [vmem:[%s4910_s1 + $0x7c0] ss:$16 sps:$4 sm:$0xff]   ;;  %v3561_v28 = vld [vmem:[%s4910_s1 + $0x7c8] ss:$16 sps:$4 sm:$0xff]  }
  0xee   :  { %v3566_v29 = vld [vmem:[%s4910_s1 + $0x7e4] ss:$16 sps:$4 sm:$0xff]   ;;  %v3569_v30 = vld [vmem:[%s4910_s1 + $0x7ec] ss:$16 sps:$4 sm:$0xff]   ;;  %v3564_v31 = vld [vmem:[%s4910_s1 + $0x7e0] ss:$16 sps:$4 sm:$0xff]  }
  0xef   :  { %1988 = vmatpush1.bf16.msra.mxu0 %v3540_v14  ;;  %2193 = vmatpush1.bf16.msra.mxu1 %v3543_v15  ;;  %v3567_v32 = vld [vmem:[%s4910_s1 + $0x7e8] ss:$16 sps:$4 sm:$0xff]   ;;  %v3573_v33 = vld [vmem:[%s4910_s1 + $0x804] ss:$16 sps:$4 sm:$0xff]   ;;  %v3576_v34 = vld [vmem:[%s4910_s1 + $0x80c] ss:$16 sps:$4 sm:$0xff]  }
  0xf0   :  { %1989 = vmatprep.subr.bf16.mxu0 %v3548_v16  ;;  %2194 = vmatprep.subr.bf16.mxu1 %v3551_v17  ;;  %v3571_v25 = vld [vmem:[%s4910_s1 + $0x800] ss:$16 sps:$4 sm:$0xff]   ;;  %v3574_v36 = vld [vmem:[%s4910_s1 + $0x808] ss:$16 sps:$4 sm:$0xff]   ;;  %v3579_v37 = vld [vmem:[%s4910_s1 + $0x824] ss:$16 sps:$4 sm:$0xff]  }
  0xf1   :  { %v3582_v24 = vld [vmem:[%s4910_s1 + $0x82c] ss:$16 sps:$4 sm:$0xff]   ;;  %v3577_v38 = vld [vmem:[%s4910_s1 + $0x820] ss:$16 sps:$4 sm:$0xff]   ;;  %v3580_v39 = vld [vmem:[%s4910_s1 + $0x828] ss:$16 sps:$4 sm:$0xff]  }
  0xf2   :  { %v3585_v40 = vld [vmem:[%s4910_s1 + $0x844] ss:$16 sps:$4 sm:$0xff]   ;;  %v3588_v41 = vld [vmem:[%s4910_s1 + $0x84c] ss:$16 sps:$4 sm:$0xff]   ;;  %v3740_v42 = vmov 0   ;;  %vm2763_vm0 = vcmask 1041408  }
  0xf3   :  { %1990 = vmatpush1.bf16.msra.mxu0 %v3546_v18  ;;  %2195 = vmatpush1.bf16.msra.mxu1 %v3549_v19  ;;  %v3583_v44 = vld [vmem:[%s4910_s1 + $0x840] ss:$16 sps:$4 sm:$0xff]   ;;  %v3586_v45 = vld [vmem:[%s4910_s1 + $0x848] ss:$16 sps:$4 sm:$0xff]   ;;  %v3591_v46 = vld [vmem:[%s4910_s1 + $0x864] ss:$16 sps:$4 sm:$0xff]  }
  0xf4   :  { %1991 = vmatprep.subr.bf16.mxu0 %v3554_v20  ;;  %2196 = vmatprep.subr.bf16.mxu1 %v3557_v21  ;;  %v3594_v47 = vld [vmem:[%s4910_s1 + $0x86c] ss:$16 sps:$4 sm:$0xff]   ;;  %v3589_v48 = vld [vmem:[%s4910_s1 + $0x860] ss:$16 sps:$4 sm:$0xff]   ;;  %v3592_v50 = vld [vmem:[%s4910_s1 + $0x868] ss:$16 sps:$4 sm:$0xff]  }
  0xf5   :  { %v3597_v51 = vld [vmem:[%s4910_s1 + $0x884] ss:$16 sps:$4 sm:$0xff]   ;;  %v3600_v52 = vld [vmem:[%s4910_s1 + $0x88c] ss:$16 sps:$4 sm:$0xff]   ;;  %v3595_v53 = vld [vmem:[%s4910_s1 + $0x880] ss:$16 sps:$4 sm:$0xff]  }
  0xf6   :  { %v3598_v54 = vld [vmem:[%s4910_s1 + $0x888] ss:$16 sps:$4 sm:$0xff]   ;;  %v3603_v55 = vld [vmem:[%s4910_s1 + $0x8a4] ss:$16 sps:$4 sm:$0xff]   ;;  %v3606_v56 = vld [vmem:[%s4910_s1 + $0x8ac] ss:$16 sps:$4 sm:$0xff]  }
  0xf7   :  { %1992 = vmatpush1.bf16.msra.mxu0 %v3552_v22  ;;  %2197 = vmatpush1.bf16.msra.mxu1 %v3555_v23  ;;  %v3601_v57 = vld [vmem:[%s4910_s1 + $0x8a0] ss:$16 sps:$4 sm:$0xff]   ;;  %v3604_v58 = vld [vmem:[%s4910_s1 + $0x8a8] ss:$16 sps:$4 sm:$0xff]   ;;  %v3609_v59 = vld [vmem:[%s4910_s1 + $0x8c4] ss:$16 sps:$4 sm:$0xff]  }
  0xf8   :  { %1993 = vmatprep.subr.bf16.mxu0 %v3560_v9  ;;  %2198 = vmatprep.subr.bf16.mxu1 %v3563_v26  ;;  %v3612_v60 = vld [vmem:[%s4910_s1 + $0x8cc] ss:$16 sps:$4 sm:$0xff]   ;;  %v3607_v61 = vld [vmem:[%s4910_s1 + $0x8c0] ss:$16 sps:$4 sm:$0xff]   ;;  %v3610_v62 = vld [vmem:[%s4910_s1 + $0x8c8] ss:$16 sps:$4 sm:$0xff]  }
  0xf9   :  { %v3615_v63 = vld [vmem:[%s4910_s1 + $0x8e4] ss:$16 sps:$4 sm:$0xff]   ;;  %v3618_v0 = vld [vmem:[%s4910_s1 + $0x8ec] ss:$16 sps:$4 sm:$0xff]   ;;  %v3613_v1 = vld [vmem:[%s4910_s1 + $0x8e0] ss:$16 sps:$4 sm:$0xff]  }
  0xfa   :  { %v3616_v2 = vld [vmem:[%s4910_s1 + $0x8e8] ss:$16 sps:$4 sm:$0xff]   ;;  %v2791_v3 = vld.sshfl [vmem:[%s4909_s0 + $0x10] sm:$0x3 pattern:$0x76325410] }
  0xfb   :  { %1994 = vmatpush1.bf16.msra.mxu0 %v3558_v27  ;;  %2199 = vmatpush1.bf16.msra.mxu1 %v3561_v28  ;;  %v3621_v4 = vld [vmem:[%s4912_s3 + $0x4] ss:$8 sps:$4 sm:$0xff]   ;;  %v91_v6 = vpack.c.bf16 %v2791_v3, %v2791_v3  ;;  %v3619_v7 = vld [vmem:[%s4912_s3] ss:$8 sps:$4 sm:$0xff]   ;;  %v3627_v10 = vld [vmem:[%s4912_s3 + $0x14] ss:$8 sps:$4 sm:$0xff]  }
  0xfc   :  { %1995 = vmatprep.subr.bf16.mxu0 %v3566_v29  ;;  %2200 = vmatprep.subr.bf16.mxu1 %v3569_v30  ;;  %v3624_v5 = vld [vmem:[%s4912_s3 + $0x104] ss:$8 sps:$4 sm:$0xff]   ;;  %v3622_v8 = vld [vmem:[%s4912_s3 + $0x100] ss:$8 sps:$4 sm:$0xff]   ;;  %v3630_v11 = vld [vmem:[%s4912_s3 + $0x114] ss:$8 sps:$4 sm:$0xff]  }
  0xfd   :  { %v3625_v12 = vld [vmem:[%s4912_s3 + $0x10] ss:$8 sps:$4 sm:$0xff]   ;;  %v3633_v14 = vld [vmem:[%s4912_s3 + $0x24] ss:$8 sps:$4 sm:$0xff]   ;;  %v3631_v16 = vld [vmem:[%s4912_s3 + $0x20] ss:$8 sps:$4 sm:$0xff]  }
  0xfe   :  { %v3628_v13 = vld [vmem:[%s4912_s3 + $0x110] ss:$8 sps:$4 sm:$0xff]   ;;  %v3636_v15 = vld [vmem:[%s4912_s3 + $0x124] ss:$8 sps:$4 sm:$0xff]   ;;  %v3634_v17 = vld [vmem:[%s4912_s3 + $0x120] ss:$8 sps:$4 sm:$0xff]  }
  0xff   :  { %1996 = vmatpush1.bf16.msra.mxu0 %v3564_v31  ;;  %2201 = vmatpush1.bf16.msra.mxu1 %v3567_v32  ;;  %v3639_v18 = vld [vmem:[%s4912_s3 + $0x34] ss:$8 sps:$4 sm:$0xff]   ;;  %v3637_v20 = vld [vmem:[%s4912_s3 + $0x30] ss:$8 sps:$4 sm:$0xff]   ;;  %v3645_v22 = vld [vmem:[%s4912_s3 + $0x44] ss:$8 sps:$4 sm:$0xff]  }
 0x100   :  { %2006 = vmatprep.subr.bf16.mxu0 %v3573_v33  ;;  %2211 = vmatprep.subr.bf16.mxu1 %v3576_v34  ;;  %v3642_v19 = vld [vmem:[%s4912_s3 + $0x134] ss:$8 sps:$4 sm:$0xff]   ;;  %v3640_v21 = vld [vmem:[%s4912_s3 + $0x130] ss:$8 sps:$4 sm:$0xff]   ;;  %v3648_v23 = vld [vmem:[%s4912_s3 + $0x144] ss:$8 sps:$4 sm:$0xff]  }
 0x101   :  { %v3643_v9 = vld [vmem:[%s4912_s3 + $0x40] ss:$8 sps:$4 sm:$0xff]   ;;  %v3651_v27 = vld [vmem:[%s4912_s3 + $0x54] ss:$8 sps:$4 sm:$0xff]   ;;  %v3649_v29 = vld [vmem:[%s4912_s3 + $0x50] ss:$8 sps:$4 sm:$0xff]  }
 0x102   :  { %1998 = vmatmul.mubr.bf16.vlgmr.msra.gmra.mrb[0].mxu0 %v89_v35  ;;  %2203 = vmatmul.mubr.bf16.vlgmr.msra.gmra.mrb[0].mxu1 %v89_v35  ;;  %v3646_v26 = vld [vmem:[%s4912_s3 + $0x140] ss:$8 sps:$4 sm:$0xff]   ;;  %v3654_v28 = vld [vmem:[%s4912_s3 + $0x154] ss:$8 sps:$4 sm:$0xff]   ;;  %v3652_v30 = vld [vmem:[%s4912_s3 + $0x150] ss:$8 sps:$4 sm:$0xff]  }
 0x103   :  { %2007 = vmatpush1.bf16.msra.mxu0 %v3571_v25  ;;  %2212 = vmatpush1.bf16.msra.mxu1 %v3574_v36  ;;  %v3657_v31 = vld [vmem:[%s4912_s3 + $0x64] ss:$8 sps:$4 sm:$0xff]   ;;  %v3655_v33 = vld [vmem:[%s4912_s3 + $0x60] ss:$8 sps:$4 sm:$0xff]   ;;  %v3663_v35 = vld [vmem:[%s4912_s3 + $0x74] ss:$8 sps:$4 sm:$0xff]  }
 0x104   :  { %2008 = vmatprep.subr.bf16.mxu0 %v3579_v37  ;;  %2213 = vmatprep.subr.bf16.mxu1 %v3582_v24  ;;  %v3660_v32 = vld [vmem:[%s4912_s3 + $0x164] ss:$8 sps:$4 sm:$0xff]   ;;  %v3658_v34 = vld [vmem:[%s4912_s3 + $0x160] ss:$8 sps:$4 sm:$0xff]   ;;  %v3666_v25 = vld [vmem:[%s4912_s3 + $0x174] ss:$8 sps:$4 sm:$0xff]  }
 0x105   :  { %2038 = vmatprep.mubr.bf16.mxu0 %v3740_v42  ;;  %2243 = vmatprep.mubr.bf16.mxu1 %v3740_v42  ;;  %v3661_v36 = vld [vmem:[%s4912_s3 + $0x70] ss:$8 sps:$4 sm:$0xff]   ;;  %v3669_v24 = vld [vmem:[%s4912_s3 + $0x84] ss:$8 sps:$4 sm:$0xff]   ;;  %v3678_v42 = vld [vmem:[%s4912_s3 + $0x194] ss:$8 sps:$4 sm:$0xff]  }
 0x106   :  { %v3664_v37 = vld [vmem:[%s4912_s3 + $0x170] ss:$8 sps:$4 sm:$0xff]   ;;  %v3711_v3 = vld [vmem:[%s4912_s3 + $0xf4] ss:$8 sps:$4 sm:$0xff]   ;;  %vm2764_vm1 = vcmask 871426  }
 0x107   :  { %2009 = vmatpush1.bf16.msra.mxu0 %v3577_v38  ;;  %2214 = vmatpush1.bf16.msra.mxu1 %v3580_v39  ;;  %v3672_v38 = vld [vmem:[%s4912_s3 + $0x184] ss:$8 sps:$4 sm:$0xff]   ;;  %v3667_v39 = vld [vmem:[%s4912_s3 + $0x80] ss:$8 sps:$4 sm:$0xff]   ;;  %vm2765_vm2 = vmor %vm2764_vm1, %vm2763_vm0 }
 0x108   :  { %2010 = vmatprep.subr.bf16.mxu0 %v3585_v40  ;;  %2215 = vmatprep.subr.bf16.mxu1 %v3588_v41  ;;  %v3670_v40 = vld [vmem:[%s4912_s3 + $0x180] ss:$8 sps:$4 sm:$0xff]   ;;  %v3675_v41 = vld [vmem:[%s4912_s3 + $0x94] ss:$8 sps:$4 sm:$0xff]  }
 0x10b   :  { %2011 = vmatpush1.bf16.msra.mxu0 %v3583_v44  ;;  %2216 = vmatpush1.bf16.msra.mxu1 %v3586_v45  ;;  %v3673_v44 = vld [vmem:[%s4912_s3 + $0x90] ss:$8 sps:$4 sm:$0xff]  }
 0x10c   :  { %2012 = vmatprep.subr.bf16.mxu0 %v3591_v46  ;;  %2217 = vmatprep.subr.bf16.mxu1 %v3594_v47  ;;  %v3676_v45 = vld [vmem:[%s4912_s3 + $0x190] ss:$8 sps:$4 sm:$0xff]   ;;  %v3681_v46 = vld [vmem:[%s4912_s3 + $0xa4] ss:$8 sps:$4 sm:$0xff]  }
 0x10d   :  { %v3684_v47 = vld [vmem:[%s4912_s3 + $0x1a4] ss:$8 sps:$4 sm:$0xff]  }
 0x10f   :  { %2013 = vmatpush1.bf16.msra.mxu0 %v3589_v48  ;;  %2218 = vmatpush1.bf16.msra.mxu1 %v3592_v50  ;;  %v3679_v48 = vld [vmem:[%s4912_s3 + $0xa0] ss:$8 sps:$4 sm:$0xff]  }
 0x110   :  { %2014 = vmatprep.subr.bf16.mxu0 %v3597_v51  ;;  %2219 = vmatprep.subr.bf16.mxu1 %v3600_v52  ;;  %v3682_v50 = vld [vmem:[%s4912_s3 + $0x1a0] ss:$8 sps:$4 sm:$0xff]   ;;  %v3687_v51 = vld [vmem:[%s4912_s3 + $0xb4] ss:$8 sps:$4 sm:$0xff]  }
 0x111   :  { %v3690_v52 = vld [vmem:[%s4912_s3 + $0x1b4] ss:$8 sps:$4 sm:$0xff]  }
 0x113   :  { %2015 = vmatpush1.bf16.msra.mxu0 %v3595_v53  ;;  %2220 = vmatpush1.bf16.msra.mxu1 %v3598_v54  ;;  %v3685_v53 = vld [vmem:[%s4912_s3 + $0xb0] ss:$8 sps:$4 sm:$0xff]  }
 0x114   :  { %2016 = vmatprep.subr.bf16.mxu0 %v3603_v55  ;;  %2221 = vmatprep.subr.bf16.mxu1 %v3606_v56  ;;  %v3688_v54 = vld [vmem:[%s4912_s3 + $0x1b0] ss:$8 sps:$4 sm:$0xff]   ;;  %v3693_v55 = vld [vmem:[%s4912_s3 + $0xc4] ss:$8 sps:$4 sm:$0xff]  }
 0x115   :  { %v3696_v56 = vld [vmem:[%s4912_s3 + $0x1c4] ss:$8 sps:$4 sm:$0xff]  }
 0x117   :  { %2017 = vmatpush1.bf16.msra.mxu0 %v3601_v57  ;;  %2222 = vmatpush1.bf16.msra.mxu1 %v3604_v58  ;;  %v3691_v57 = vld [vmem:[%s4912_s3 + $0xc0] ss:$8 sps:$4 sm:$0xff]  }
 0x118   :  { %2018 = vmatprep.subr.bf16.mxu0 %v3609_v59  ;;  %2223 = vmatprep.subr.bf16.mxu1 %v3612_v60  ;;  %v3694_v58 = vld [vmem:[%s4912_s3 + $0x1c0] ss:$8 sps:$4 sm:$0xff]   ;;  %v3699_v59 = vld [vmem:[%s4912_s3 + $0xd4] ss:$8 sps:$4 sm:$0xff]  }
 0x119   :  { %v3702_v60 = vld [vmem:[%s4912_s3 + $0x1d4] ss:$8 sps:$4 sm:$0xff]  }
 0x11b   :  { %2019 = vmatpush1.bf16.msra.mxu0 %v3607_v61  ;;  %2224 = vmatpush1.bf16.msra.mxu1 %v3610_v62  ;;  %v3697_v61 = vld [vmem:[%s4912_s3 + $0xd0] ss:$8 sps:$4 sm:$0xff]  }
 0x11c   :  { %2020 = vmatprep.subr.bf16.mxu0 %v3615_v63  ;;  %2225 = vmatprep.subr.bf16.mxu1 %v3618_v0  ;;  %v3700_v62 = vld [vmem:[%s4912_s3 + $0x1d0] ss:$8 sps:$4 sm:$0xff]   ;;  %v3705_v63 = vld [vmem:[%s4912_s3 + $0xe4] ss:$8 sps:$4 sm:$0xff]  }
 0x11d   :  { %v3708_v0 = vld [vmem:[%s4912_s3 + $0x1e4] ss:$8 sps:$4 sm:$0xff]  }
 0x11f   :  { %2021 = vmatpush1.bf16.msra.mxu0 %v3613_v1  ;;  %2226 = vmatpush1.bf16.msra.mxu1 %v3616_v2  ;;  %v3703_v1 = vld [vmem:[%s4912_s3 + $0xe0] ss:$8 sps:$4 sm:$0xff]  }
 0x120   :  { %2656 = vmatprep.subr.bf16.mxu0 %v3621_v4  ;;  %2697 = vmatprep.subr.bf16.mxu1 %v3624_v5  ;;  %v3706_v2 = vld [vmem:[%s4912_s3 + $0x1e0] ss:$8 sps:$4 sm:$0xff]   ;;  %v3714_v4 = vld [vmem:[%s4912_s3 + $0x1f4] ss:$8 sps:$4 sm:$0xff]   ;;  %v3709_v5 = vld [vmem:[%s4912_s3 + $0xf0] ss:$8 sps:$4 sm:$0xff]  }
 0x122   :  { %2039 = vmatmul.mubr.bf16.vlgmr.msra.gmra.mrb[0].mxu0 %v91_v6  ;;  %2244 = vmatmul.mubr.bf16.vlgmr.msra.gmra.mrb[0].mxu1 %v91_v6  ;;  %v3712_v6 = vld [vmem:[%s4912_s3 + $0x1f0] ss:$8 sps:$4 sm:$0xff]  }
 0x123   :  { %2657 = vmatpush1.bf16.msra.mxu0 %v3619_v7  ;;  %2698 = vmatpush1.bf16.msra.mxu1 %v3622_v8  ;;  %v384_v7 = vsub.s32 0, %v3900_v43  ;;  %v392_v8 = vsub.s32 2, %v3900_v43 }
 0x124   :  { %2658 = vmatprep.subr.bf16.mxu0 %v3627_v10  ;;  %2699 = vmatprep.subr.bf16.mxu1 %v3630_v11  ;;  %v380_v10 = vld [vmem:[%s4911_s2] sm:$0xf]  ;;  %v388_v11 = vsub.s32 1, %v3900_v43 }
 0x127   :  { %2659 = vmatpush1.bf16.msra.mxu0 %v3625_v12  ;;  %2700 = vmatpush1.bf16.msra.mxu1 %v3628_v13  ;;  %v396_v12 = vsub.s32 3, %v3900_v43  ;;  %v385_v13 = vrot.slane %v380_v10, %v384_v7 }
 0x128   :  { %2660 = vmatprep.subr.bf16.mxu0 %v3633_v14  ;;  %2701 = vmatprep.subr.bf16.mxu1 %v3636_v15  ;;  %v393_v14 = vrot.slane %v380_v10, %v392_v8  ;;  %v389_v15 = vrot.slane %v380_v10, %v388_v11 }
 0x12b   :  { %2661 = vmatpush1.bf16.msra.mxu0 %v3631_v16  ;;  %2702 = vmatpush1.bf16.msra.mxu1 %v3634_v17  ;;  %v397_v16 = vrot.slane %v380_v10, %v396_v12 }
 0x12c   :  { %2662 = vmatprep.subr.bf16.mxu0 %v3639_v18  ;;  %2703 = vmatprep.subr.bf16.mxu1 %v3642_v19 }
 0x12f   :  { %2663 = vmatpush1.bf16.msra.mxu0 %v3637_v20  ;;  %2704 = vmatpush1.bf16.msra.mxu1 %v3640_v21 }
 0x130   :  { %2664 = vmatprep.subr.bf16.mxu0 %v3645_v22  ;;  %2705 = vmatprep.subr.bf16.mxu1 %v3648_v23 }
 0x133   :  { %2665 = vmatpush1.bf16.msra.mxu0 %v3643_v9  ;;  %2706 = vmatpush1.bf16.msra.mxu1 %v3646_v26 }
 0x134   :  { %2666 = vmatprep.subr.bf16.mxu0 %v3651_v27  ;;  %2707 = vmatprep.subr.bf16.mxu1 %v3654_v28 }
 0x137   :  { %2667 = vmatpush1.bf16.msra.mxu0 %v3649_v29  ;;  %2708 = vmatpush1.bf16.msra.mxu1 %v3652_v30 }
 0x138   :  { %2668 = vmatprep.subr.bf16.mxu0 %v3657_v31  ;;  %2709 = vmatprep.subr.bf16.mxu1 %v3660_v32 }
 0x13b   :  { %2669 = vmatpush1.bf16.msra.mxu0 %v3655_v33  ;;  %2710 = vmatpush1.bf16.msra.mxu1 %v3658_v34 }
 0x13c   :  { %2670 = vmatprep.subr.bf16.mxu0 %v3663_v35  ;;  %2711 = vmatprep.subr.bf16.mxu1 %v3666_v25 }
 0x13f   :  { %2671 = vmatpush1.bf16.msra.mxu0 %v3661_v36  ;;  %2712 = vmatpush1.bf16.msra.mxu1 %v3664_v37  ;;  %v2324_v36 = vld [vmem:[%s4913_s4] sm:$0x3]  ;;  %s3741_s4 = smov 21  }
 0x140   :  { %2672 = vmatprep.subr.bf16.mxu0 %v3669_v24  ;;  %2713 = vmatprep.subr.bf16.mxu1 %v3672_v38  ;;  %v2329_v37 = vrot.slane %v2324_v36, %v384_v7  ;;  %v2333_v24 = vrot.slane %v2324_v36, %v388_v11  ;;  %v3144_v38 = vld.sshfl [vmem:[%s4914_s5] sm:$0x33 pattern:$0x76325410]  ;;  %s3742_s5 = smov [#allocation2]  }
 0x141   :  { %s2779_s14 = sshll.u32 %s3742_s5, 4  ;;  %s2780_s14 = int_to_ptr.vmem [resolvable:$true] %s2779_s14 }
 0x142   :  { %s3715_s0 = scalar_lea.vmem %s2780_s14, 64  ;;  %p3720_p1 = scmp.lt.s32.totalorder %s2780_s14, %s2780_s14 }
 0x143   :  { %2673 = vmatpush1.bf16.msra.mxu0 %v3667_v39  ;;  %2714 = vmatpush1.bf16.msra.mxu1 %v3670_v40  ;;  %p3716_p0 = scmp.ne.s32.totalorder %s2780_s14, %s3715_s0  ;;  %p3721_p2 = scmp.lt.s32.totalorder %s3715_s0, %s3715_s0 }
 0x144   :  { %2674 = vmatprep.subr.bf16.mxu0 %v3675_v41  ;;  %2715 = vmatprep.subr.bf16.mxu1 %v3678_v42 }
 0x145   :  { %p3722_p3 = por %p3721_p2, %p3720_p1 }
 0x147   :  { %2675 = vmatpush1.bf16.msra.mxu0 %v3673_v44  ;;  %2716 = vmatpush1.bf16.msra.mxu1 %v3676_v45  ;;  %p3723_p4 = pnand %p3722_p3, %p3716_p0 }
 0x148   :  { %2676 = vmatprep.subr.bf16.mxu0 %v3681_v46  ;;  %2717 = vmatprep.subr.bf16.mxu1 %v3684_v47  ;;  %v2747_v46 = vcombine.high %v3144_v38, %v3144_v38 }
 0x14b   :  { %2677 = vmatpush1.bf16.msra.mxu0 %v3679_v48  ;;  %2718 = vmatpush1.bf16.msra.mxu1 %v3682_v50 }
 0x14c   :  { %2678 = vmatprep.subr.bf16.mxu0 %v3687_v51  ;;  %2719 = vmatprep.subr.bf16.mxu1 %v3690_v52 }
 0x14f   :  { %2679 = vmatpush1.bf16.msra.mxu0 %v3685_v53  ;;  %2720 = vmatpush1.bf16.msra.mxu1 %v3688_v54 }
 0x150   :  { %2680 = vmatprep.subr.bf16.mxu0 %v3693_v55  ;;  %2721 = vmatprep.subr.bf16.mxu1 %v3696_v56 }
 0x153   :  { %2681 = vmatpush1.bf16.msra.mxu0 %v3691_v57  ;;  %2722 = vmatpush1.bf16.msra.mxu1 %v3694_v58 }
 0x154   :  { %2682 = vmatprep.subr.bf16.mxu0 %v3699_v59  ;;  %2723 = vmatprep.subr.bf16.mxu1 %v3702_v60 }
 0x157   :  { %2683 = vmatpush1.bf16.msra.mxu0 %v3697_v61  ;;  %2724 = vmatpush1.bf16.msra.mxu1 %v3700_v62 }
 0x158   :  { %2684 = vmatprep.subr.bf16.mxu0 %v3705_v63  ;;  %2725 = vmatprep.subr.bf16.mxu1 %v3708_v0 }
 0x15b   :  { %2685 = vmatpush1.bf16.msra.mxu0 %v3703_v1  ;;  %2726 = vmatpush1.bf16.msra.mxu1 %v3706_v2 }
 0x15c   :  { %2686 = vmatprep.subr.bf16.mxu0 %v3711_v3  ;;  %2727 = vmatprep.subr.bf16.mxu1 %v3714_v4 }
 0x15f   :  { %2687 = vmatpush1.bf16.msra.mxu0 %v3709_v5  ;;  %2728 = vmatpush1.bf16.msra.mxu1 %v3712_v6 }
 0x1f5   :  { %v2040_v17 = vpop.f32.mrb[0].mxu0  ;;  %v2245_v18 = vpop.f32.mrb[0].mxu1 }
 0x1f6   :  { %v3145_v19 = vadd.f32 %v2040_v17, %v385_v13  ;;  %v3147_v20 = vadd.f32 %v2245_v18, %v393_v14  ;;  %v2042_v21 = vpop.f32.mrb[1].mxu0  ;;  %v2247_v22 = vpop.f32.mrb[1].mxu1 }
 0x1f7   :  { %v3146_v23 = vadd.f32 %v2042_v21, %v389_v15  ;;  %v3148_v9 = vadd.f32 %v2247_v22, %v397_v16  ;;  %v2044_v26 = vpop.f32.mrb[2].mxu0  ;;  %v2249_v27 = vpop.f32.mrb[2].mxu1 }
 0x1f8   :  { %v2252_v28 = vmax.f32 %v3145_v19, 0.0  ;;  %v2254_v29 = vmax.f32 %v3147_v20, 0.0  ;;  %v2045_v30 = vpop.f32.mrb[3].mxu0  ;;  %v2250_v31 = vpop.f32.mrb[3].mxu1 }
 0x1f9   :  { %v2253_v32 = vmax.f32 %v3146_v23, 0.0  ;;  %v2255_v43 = vmax.f32 %v3148_v9, 0.0 }
 0x1fa   :  { %v2256_v35 = vpack.c.bf16 %v2252_v28, %v2252_v28  ;;  %v2258_v25 = vpack.c.bf16 %v2254_v29, %v2254_v29 }
 0x1fb   :  { %v2257_v33 = vpack.c.bf16 %v2253_v32, %v2253_v32  ;;  %v2259_v34 = vpack.c.bf16 %v2255_v43, %v2255_v43 }
 0x1fd   :  { %2688 = vmatprep.mubr.bf16.mxu0 %v2257_v33  ;;  %2729 = vmatprep.mubr.bf16.mxu1 %v2259_v34 }
 0x1fe   :  { %2689 = vmatmul.mubr.bf16.vlgmr.msra.gmra.mrb[4].mxu0 %v2256_v35  ;;  %2730 = vmatmul.mubr.bf16.vlgmr.msra.gmra.mrb[4].mxu1 %v2258_v25 }
 0x2d1   :  { %v2690_v39 = vpop.f32.mrb[4].mxu0  ;;  %v2731_v40 = vpop.f32.mrb[4].mxu1 }
 0x2d2   :  { %v2691_v41 = vadd.f32 %v2690_v39, %v2329_v37  ;;  %v2692_v42 = vpop.f32.mrb[5].mxu0  ;;  %v2733_v44 = vpop.f32.mrb[5].mxu1 }
 0x2d3   :  { %v2693_v45 = vadd.f32 %v2692_v42, %v2333_v24  ;;  %v2694_v47 = vpop.f32.mrb[6].mxu0  ;;  %v2735_v48 = vpop.f32.mrb[6].mxu1 }
 0x2d4   :  { %v2732_v50 = vadd.f32 %v2731_v40, %v2691_v41  ;;  %v2695_v51 = vpop.f32.mrb[7].mxu0  ;;  %v2736_v52 = vpop.f32.mrb[7].mxu1 }
 0x2d5   :  { %v2734_v53 = vadd.f32 %v2733_v44, %v2693_v45 }
 0x2d6   :  { %v2750_v54 = vadd.f32 %v3144_v38, %v2732_v50 }
 0x2d7   :  { %v2751_v55 = vadd.f32 %v2747_v46, %v2734_v53  ;;  %2768 = vrot.lane.b32.xlu0 %v2734_v53, %s3741_s4 }
 0x2d9   :  { %v2754_v56 = vcombine.low %v2750_v54, %v2751_v55 }
 0x2db   :  { %v2761_v57 = vrot.slane %v2754_v56, %v3918_v49 }
 0x2dd   :  { %2766 = vst.msk [vmem:[#allocation2] sm:$0xf] %vm2765_vm2, %v2761_v57 }
 0x2de   :  { %3726 = shalt.err (!%p3723_p4)
}
 0x2df   :  { %s3727_s17 = scalar_lea.hbm %s4915_s6, 64 }
 0x2e0   :  { %p3728_p5 = scmp.ne.s32.totalorder %s4915_s6, %s3727_s17  ;;  %p3731_p6 = scmp.lt.u32.totalorder %s3727_s17, %s4915_s6 }
 0x2e2   :  { %p3733_p7 = pnand %p3731_p6, %p3728_p5 }
 0x2e4   :  { %3736 = shalt.err (!%p3733_p7)
}
 0x2e5   :  { %2782 = dma.vmem_to_hbm [thread:$0]  %s2780_s14, 64, %s4915_s6, [#allocation3]   ;;  %vm2771_vm3 = vcmask 1024  }
 0x349   :  { %v2769_v49 = vpop.permute.xlu0 %2768 }
 0x34a   :  { %2772 = vst.msk [vmem:[%s4916_s7] sm:$0x3] %vm2771_vm3, %v2769_v49 }
 0x34b   :  { %3737 = dma.done.wait [#allocation3], 64  }
 0x34c   :  { %3738 = vsyncadd [#allocation3], 4294967232 }
 0x34d   :  { %2790 = vsyncpa [#allocation3], 1 }

</bundles_post_ra>
